<compile_context>
chip_gen: v7x
topology: tpu7x:2x2x1
jax: 0.10.0
libtpu: 0.0.40
codegen_flags: <defaults>
</compile_context>

<pallas_src>
import functools
import numpy as np
import jax
import jax.numpy as jnp
from jax.experimental import pallas as pl
from jax.experimental.pallas import tpu as pltpu


def _unrolled_robust_kernel(depth,
                            y_ref,                 # (B, 2*NVIS)  f32, packed [re|im]
                            wt_ref,                # (2*NVIS, 2*NPIX2) bf16  adjoint (incl. 1/npix2)
                            fw_ref,                # (2*NPIX2, 2*NVIS) bf16  forward
                            we_ref,                # (NVIS, NVIS)      bf16  estep
                            wum_ref,               # (2*NVIS, NVIS)    bf16  update+memory fused
                            be_ref, bum_ref,       # (1, NVIS) f32 biases
                            alpha_ref,             # (1, 1) SMEM scalar
                            out_ref,               # (B, NPIX2) f32
                            wt_tau_ref):           # scratch (B, 2*NVIS) f32: [wtemp | tau]
    f32 = jnp.float32
    bf16 = jnp.bfloat16

    B, two_nvis = y_ref.shape
    nvis = two_nvis // 2
    npix2 = out_ref.shape[1]
    inv_nvis = f32(1.0 / nvis)

    def dot(a, b_ref):
        # Single-pass bf16 MXU matmul with f32 accumulation; RHS loaded at point of use.
        return jnp.dot(a.astype(bf16), b_ref[...], preferred_element_type=f32)

    y = y_ref[...]                       # packed (B, 2*NVIS)
    alpha = alpha_ref[0, 0]

    # Hoist bias broadcasts out of the (unrolled) depth loop — JAX does not CSE them.
    be_b = jnp.broadcast_to(be_ref[...], (B, nvis))
    bum_b = jnp.broadcast_to(bum_ref[...], (B, nvis))

    # x0 = Wt(y)   (packed (B, 2*NPIX2));  tau0 = 1 written into the staging buffer.
    xk = dot(y, wt_ref)
    wt_tau_ref[:, nvis:] = jnp.ones((B, nvis), f32)

    # depth is a small static int -> unrolled in trace
    for _ in range(depth):
        # zk = W(xk)  and residual, all packed.
        zk = dot(xk, fw_ref)             # (B, 2*NVIS)
        d = y - zk                       # packed residual
        d_re = d[:, :nvis]               # lane-aligned slices (free)
        d_im = d[:, nvis:]
        res = d_re * d_re + d_im * d_im  # |y - zk|^2 (real f32)

        # expectation step: wtemp = sigmoid(estep(res));
        # tau = relu(update(wtemp) + memory(tau))  -> one fused K=2*NVIS dot.
        wt_tau_ref[:, :nvis] = jax.nn.sigmoid(dot(res, we_ref) + be_b)
        tau = jnp.maximum(dot(wt_tau_ref[...], wum_ref) + bum_b, f32(0.0))
        wt_tau_ref[:, nvis:] = tau       # feeds next iteration's memory path

        # x = xk - Wt(zk*tau)/nvis + Wt(y*tau)/nvis  ==  xk + Wt((y - zk)*tau)/nvis
        s2 = jnp.tile(tau * inv_nvis, (1, 2))     # per-visibility scale on both halves
        x = xk + dot(d * s2, wt_ref)              # packed (B, 2*NPIX2)

        # soft threshold: sgn(x) * relu(|x| - alpha * max|x|)   (global max, incl. batch)
        x_re = x[:, :npix2]
        x_im = x[:, npix2:]
        mag2 = x_re * x_re + x_im * x_im
        r = jax.lax.rsqrt(jnp.where(mag2 > 0.0, mag2, f32(1.0)))   # EUP, off the VALU path
        mag = mag2 * r
        gmax = jnp.max(mag)              # inherent serialization point; do not fight it
        thr = jnp.maximum(mag - alpha * gmax, f32(0.0))
        scale = thr * r                  # == thr / |x|;  0 where x == 0
        xk = x * jnp.tile(scale, (1, 2))

    # return torch.abs(xk).real
    xr = xk[:, :npix2]
    xi = xk[:, npix2:]
    out_ref[...] = jnp.sqrt(xr * xr + xi * xi)


def pack_unrolled_robust_params(h_re, h_im, we_t, be, wu_t, bu, wm_t, bm):
    """Fold/pack the static weights ONCE (outside the per-forward path).

    wt_mat : adjoint  Wt(a) = a @ conj(H) / npix2, LHS packed [a_re|a_im], out [re|im]
    fw_mat : forward  W(x)  = x @ H^T (zero bias),  LHS packed [x_re|x_im], out [re|im]
    wum    : update_layer + memory_layer stacked along K; biases summed.
    """
    f32 = jnp.float32
    bf16 = jnp.bfloat16
    npix2 = h_re.shape[1]

    wt_mat = jnp.concatenate(
        [jnp.concatenate([h_re, -h_im], axis=1),
         jnp.concatenate([h_im,  h_re], axis=1)], axis=0) * f32(1.0 / npix2)
    ht_re, ht_im = h_re.T, h_im.T
    fw_mat = jnp.concatenate(
        [jnp.concatenate([ht_re, ht_im], axis=1),
         jnp.concatenate([-ht_im, ht_re], axis=1)], axis=0)
    wum = jnp.concatenate([wu_t, wm_t], axis=0)
    bum = bu + bm

    return {
        "wt": wt_mat.astype(bf16),
        "fw": fw_mat.astype(bf16),
        "we": we_t.astype(bf16),
        "wum": wum.astype(bf16),
        "be": be.astype(f32),
        "bum": bum.astype(f32),
    }


def unrolled_robust_forward(y_re, y_im, params, alpha, depth):
    f32 = jnp.float32
    B, nvis = y_re.shape
    npix2 = params["wt"].shape[1] // 2

    y_pack = jnp.concatenate([y_re.astype(f32), y_im.astype(f32)], axis=-1)
    alpha_arr = jnp.asarray(alpha, f32).reshape(1, 1)

    # VMEM budget: resident weights + packed activations + scratch, with headroom.
    # Matters on v5e (16 MiB default scoped limit) as soon as NVIS*NPIX2 grows past toy size.
    weight_bytes = sum(int(np.prod(params[k].shape)) * params[k].dtype.itemsize
                       for k in ("wt", "fw", "we", "wum", "be", "bum"))
    act_bytes = (B * 2 * nvis + B * npix2 + B * 2 * nvis) * 4          # y, out, scratch
    act_bytes += 8 * B * 2 * max(nvis, npix2) * 4                      # in-flight temporaries
    vmem_limit = int(min(max(2 * (weight_bytes + act_bytes), 16 << 20), 48 << 20))
    # TODO(synk): above ~48 MiB of resident weights (v7x), tile NPIX2/NVIS with a grid +
    # f32 accumulator scratch instead of the single-invocation design.

    vmem = pl.BlockSpec(memory_space=pltpu.MemorySpace.VMEM)
    smem = pl.BlockSpec(memory_space=pltpu.MemorySpace.SMEM)
    kernel = functools.partial(_unrolled_robust_kernel, depth)

    return pl.pallas_call(
        kernel,
        out_shape=jax.ShapeDtypeStruct((B, npix2), f32),
        in_specs=[vmem,                          # y (packed re|im, f32)
                  vmem, vmem, vmem, vmem,        # wt_mat, fw_mat, we, wum (bf16)
                  vmem, vmem,                    # be, bum (f32)
                  smem],                         # alpha scalar
        out_specs=vmem,
        scratch_shapes=[pltpu.VMEM((B, 2 * nvis), f32)],   # [wtemp | tau] staging buffer
        compiler_params=pltpu.CompilerParams(vmem_limit_bytes=vmem_limit),
    )(y_pack, params["wt"], params["fw"], params["we"], params["wum"],
      params["be"], params["bum"], alpha_arr)


def _reference_forward(y, H, we_t, be, wu_t, bu, wm_t, bm, alpha, depth):
    """Pure numpy (float64 / complex128) replica of UnrolledRobust.forward."""
    nvis, npix2 = H.shape

    def Wt(a):
        return a @ np.conj(H) / npix2

    xk = Wt(y)
    tau = np.ones((nvis,), np.float64)
    for _ in range(depth):
        zk = xk @ H.T
        res = np.abs(y - zk) ** 2
        wtemp = 1.0 / (1.0 + np.exp(-(res @ we_t + be)))
        tau = np.maximum(wtemp @ wu_t + bu + tau @ wm_t + bm, 0.0)
        zk = zk * tau
        x = xk - Wt(zk) / nvis
        x = x + Wt(y * tau) / nvis
        mag = np.abs(x)
        thr = np.maximum(mag - alpha * np.max(mag), 0.0)
        sgn = np.where(mag > 0, x / np.where(mag > 0, mag, 1.0), 0.0)
        xk = sgn * thr
    return np.abs(xk)


if __name__ == "__main__":
    # B is a multiple of 16 so the bf16 MXU LHS fills its sublane packing (review item).
    B = 16         # batch of visibility vectors
    NVIS = 128     # number of visibilities (rows of uvw)
    NPIXEL = 16
    NPIX2 = NPIXEL * NPIXEL  # 256 image pixels
    DEPTH = 3
    ALPHA = 0.1

    key = jax.random.PRNGKey(0)
    ks = jax.random.split(key, 12)

    # Deterministic synthetic forward_operator: H = exp(-1j * phase), |H_ij| = 1.
    # TODO(synk): speed_of_light / generate_directions / cellsize plumbing is not
    # reproduced; we synthesize an equivalent unit-modulus phase matrix.
    uvw = jax.random.normal(ks[0], (NVIS, 3), jnp.float32)
    lmn = jax.random.normal(ks[1], (3, NPIX2), jnp.float32) * 0.1
    phase = 2.0 * np.pi * (uvw @ lmn)
    h_re = jnp.cos(phase)
    h_im = -jnp.sin(phase)   # exp(-1j*phase) = cos(phase) - i sin(phase)

    # Robust-layer parameters (nn.Linear(nvis, nvis)-style init), stored pre-transposed (in, out).
    bound = 1.0 / np.sqrt(NVIS)
    we_t = jax.random.uniform(ks[2], (NVIS, NVIS), jnp.float32, -bound, bound)
    be = jax.random.uniform(ks[3], (1, NVIS), jnp.float32, -bound, bound)
    wu_t = jax.random.uniform(ks[4], (NVIS, NVIS), jnp.float32, -bound, bound)
    bu = jax.random.uniform(ks[5], (1, NVIS), jnp.float32, -bound, bound)
    wm_t = jax.random.uniform(ks[6], (NVIS, NVIS), jnp.float32, -bound, bound)
    bm = jax.random.uniform(ks[7], (1, NVIS), jnp.float32, -bound, bound)

    # Input visibilities y (complex, split into re/im).
    y_re = jax.random.normal(ks[8], (B, NVIS), jnp.float32)
    y_im = jax.random.normal(ks[9], (B, NVIS), jnp.float32)

    # Weight packing happens once, outside the per-forward path.
    params = jax.block_until_ready(
        pack_unrolled_robust_params(h_re, h_im, we_t, be, wu_t, bu, wm_t, bm))

    out = unrolled_robust_forward(y_re, y_im, params, ALPHA, DEPTH)
    out = jax.block_until_ready(out)

    # Correctness check against a float64 numpy reference of the torch forward.
    # Tolerance reflects single-pass bf16 MXU matmuls (f32 accumulation) over depth=3.
    H_np = np.asarray(h_re, np.float64) + 1j * np.asarray(h_im, np.float64)
    y_np = np.asarray(y_re, np.float64) + 1j * np.asarray(y_im, np.float64)
    ref = _reference_forward(
        y_np, H_np,
        np.asarray(we_t, np.float64), np.asarray(be, np.float64)[0],
        np.asarray(wu_t, np.float64), np.asarray(bu, np.float64)[0],
        np.asarray(wm_t, np.float64), np.asarray(bm, np.float64)[0],
        ALPHA, DEPTH)

    assert out.shape == (B, NPIX2)
    assert np.allclose(np.asarray(out, np.float64), ref, rtol=5e-2, atol=5e-3), \
        f"max abs diff = {np.max(np.abs(np.asarray(out) - ref))}"
    print("KERNEL_OK")
</pallas_src>

<mosaic_0001>
module attributes {stable_mosaic.version = 11 : i64} {
  func.func @_unrolled_robust_kernel(%arg0: memref<16x256xf32, #tpu.memory_space<vmem>>, %arg1: memref<256x512xbf16, #tpu.memory_space<vmem>>, %arg2: memref<512x256xbf16, #tpu.memory_space<vmem>>, %arg3: memref<128x128xbf16, #tpu.memory_space<vmem>>, %arg4: memref<256x128xbf16, #tpu.memory_space<vmem>>, %arg5: memref<1x128xf32, #tpu.memory_space<vmem>>, %arg6: memref<1x128xf32, #tpu.memory_space<vmem>>, %arg7: memref<1x1xf32, #tpu.memory_space<smem>>, %arg8: memref<16x256xf32, #tpu.memory_space<vmem>>, %arg9: memref<16x256xf32, #tpu.memory_space<vmem>>) attributes {dimension_semantics = [], scalar_prefetch = 0 : i64, scratch_operands = 1 : i64, tpu.core_type = #tpu.core_type<tc>} {
    %c0 = arith.constant 0 : index
    %c0_0 = arith.constant 0 : index
    %0 = vector.load %arg0[%c0, %c0_0] : memref<16x256xf32, #tpu.memory_space<vmem>>, vector<16x256xf32>
    %c0_1 = arith.constant 0 : index
    %c0_2 = arith.constant 0 : index
    %1 = memref.load %arg7[%c0_1, %c0_2] : memref<1x1xf32, #tpu.memory_space<smem>>
    %c0_3 = arith.constant 0 : index
    %c0_4 = arith.constant 0 : index
    %2 = vector.load %arg5[%c0_3, %c0_4] : memref<1x128xf32, #tpu.memory_space<vmem>>, vector<1x128xf32>
    %3 = vector.shape_cast %2 : vector<1x128xf32> to vector<1x128xf32>
    %4 = vector.broadcast %3 : vector<1x128xf32> to vector<16x128xf32>
    %c0_5 = arith.constant 0 : index
    %c0_6 = arith.constant 0 : index
    %5 = vector.load %arg6[%c0_5, %c0_6] : memref<1x128xf32, #tpu.memory_space<vmem>>, vector<1x128xf32>
    %6 = vector.shape_cast %5 : vector<1x128xf32> to vector<1x128xf32>
    %7 = vector.broadcast %6 : vector<1x128xf32> to vector<16x128xf32>
    %8 = arith.truncf %0 : vector<16x256xf32> to vector<16x256xbf16>
    %c0_7 = arith.constant 0 : index
    %c0_8 = arith.constant 0 : index
    %9 = vector.load %arg1[%c0_7, %c0_8] : memref<256x512xbf16, #tpu.memory_space<vmem>>, vector<256x512xbf16>
    %cst = arith.constant dense<0.000000e+00> : vector<16x512xf32>
    %10 = tpu.matmul %8, %9, %cst {dimension_numbers = #tpu.dot_dimension_numbers<[1], [0], [0], [1], [0, 0, 1, 1], [], []>} : vector<16x256xbf16>, vector<256x512xbf16>, vector<16x512xf32> -> vector<16x512xf32>
    %cst_9 = arith.constant 1.000000e+00 : f32
    %11 = vector.broadcast %cst_9 : f32 to vector<16x128xf32>
    %c0_10 = arith.constant 0 : index
    %c128 = arith.constant 128 : index
    %12 = vector.load %arg9[%c0_10, %c128] : memref<16x256xf32, #tpu.memory_space<vmem>>, vector<16x128xf32>
    tpu.vector_store %arg9[%c0_10, %c128], %11 {strides = array<i32>} : memref<16x256xf32, #tpu.memory_space<vmem>>, vector<16x128xf32>,
    %13 = arith.truncf %10 : vector<16x512xf32> to vector<16x512xbf16>
    %c0_11 = arith.constant 0 : index
    %c0_12 = arith.constant 0 : index
    %14 = vector.load %arg2[%c0_11, %c0_12] : memref<512x256xbf16, #tpu.memory_space<vmem>>, vector<512x256xbf16>
    %cst_13 = arith.constant dense<0.000000e+00> : vector<16x256xf32>
    %15 = tpu.matmul %13, %14, %cst_13 {dimension_numbers = #tpu.dot_dimension_numbers<[1], [0], [0], [1], [0, 0, 1, 1], [], []>} : vector<16x512xbf16>, vector<512x256xbf16>, vector<16x256xf32> -> vector<16x256xf32>
    %16 = arith.subf %0, %15 : vector<16x256xf32>
    %17 = vector.extract_strided_slice %16 {offsets = [0, 0], sizes = [16, 128], strides = [1, 1]} : vector<16x256xf32> to vector<16x128xf32>
    %18 = vector.extract_strided_slice %16 {offsets = [0, 128], sizes = [16, 128], strides = [1, 1]} : vector<16x256xf32> to vector<16x128xf32>
    %19 = arith.mulf %17, %17 : vector<16x128xf32>
    %20 = arith.mulf %18, %18 : vector<16x128xf32>
    %21 = arith.addf %19, %20 : vector<16x128xf32>
    %22 = arith.truncf %21 : vector<16x128xf32> to vector<16x128xbf16>
    %c0_14 = arith.constant 0 : index
    %c0_15 = arith.constant 0 : index
    %23 = vector.load %arg3[%c0_14, %c0_15] : memref<128x128xbf16, #tpu.memory_space<vmem>>, vector<128x128xbf16>
    %cst_16 = arith.constant dense<0.000000e+00> : vector<16x128xf32>
    %24 = tpu.matmul %22, %23, %cst_16 {dimension_numbers = #tpu.dot_dimension_numbers<[1], [0], [0], [1], [0, 0, 1, 1], [], []>} : vector<16x128xbf16>, vector<128x128xbf16>, vector<16x128xf32> -> vector<16x128xf32>
    %25 = arith.addf %24, %4 : vector<16x128xf32>
    %26 = arith.negf %25 : vector<16x128xf32>
    %27 = math.exp %26 : vector<16x128xf32>
    %cst_17 = arith.constant 1.000000e+00 : f32
    %28 = vector.broadcast %cst_17 : f32 to vector<16x128xf32>
    %29 = arith.addf %28, %27 : vector<16x128xf32>
    %30 = arith.divf %28, %29 : vector<16x128xf32>
    %c0_18 = arith.constant 0 : index
    %c0_19 = arith.constant 0 : index
    %31 = vector.load %arg9[%c0_18, %c0_19] : memref<16x256xf32, #tpu.memory_space<vmem>>, vector<16x128xf32>
    tpu.vector_store %arg9[%c0_18, %c0_19], %30 {strides = array<i32>} : memref<16x256xf32, #tpu.memory_space<vmem>>, vector<16x128xf32>,
    %c0_20 = arith.constant 0 : index
    %c0_21 = arith.constant 0 : index
    %32 = vector.load %arg9[%c0_20, %c0_21] : memref<16x256xf32, #tpu.memory_space<vmem>>, vector<16x256xf32>
    %33 = arith.truncf %32 : vector<16x256xf32> to vector<16x256xbf16>
    %c0_22 = arith.constant 0 : index
    %c0_23 = arith.constant 0 : index
    %34 = vector.load %arg4[%c0_22, %c0_23] : memref<256x128xbf16, #tpu.memory_space<vmem>>, vector<256x128xbf16>
    %cst_24 = arith.constant dense<0.000000e+00> : vector<16x128xf32>
    %35 = tpu.matmul %33, %34, %cst_24 {dimension_numbers = #tpu.dot_dimension_numbers<[1], [0], [0], [1], [0, 0, 1, 1], [], []>} : vector<16x256xbf16>, vector<256x128xbf16>, vector<16x128xf32> -> vector<16x128xf32>
    %36 = arith.addf %35, %7 : vector<16x128xf32>
    %cst_25 = arith.constant 0.000000e+00 : f32
    %37 = vector.broadcast %cst_25 : f32 to vector<16x128xf32>
    %38 = arith.maximumf %36, %37 : vector<16x128xf32>
    %c0_26 = arith.constant 0 : index
    %c128_27 = arith.constant 128 : index
    %39 = vector.load %arg9[%c0_26, %c128_27] : memref<16x256xf32, #tpu.memory_space<vmem>>, vector<16x128xf32>
    tpu.vector_store %arg9[%c0_26, %c128_27], %38 {strides = array<i32>} : memref<16x256xf32, #tpu.memory_space<vmem>>, vector<16x128xf32>,
    %cst_28 = arith.constant 7.812500e-03 : f32
    %40 = vector.broadcast %cst_28 : f32 to vector<16x128xf32>
    %41 = arith.mulf %38, %40 : vector<16x128xf32>
    %42 = tpu.concatenate %41, %41 in 1 : vector<16x128xf32>, vector<16x128xf32> -> vector<16x256xf32>
    %43 = arith.mulf %16, %42 : vector<16x256xf32>
    %44 = arith.truncf %43 : vector<16x256xf32> to vector<16x256xbf16>
    %c0_29 = arith.constant 0 : index
    %c0_30 = arith.constant 0 : index
    %45 = vector.load %arg1[%c0_29, %c0_30] : memref<256x512xbf16, #tpu.memory_space<vmem>>, vector<256x512xbf16>
    %cst_31 = arith.constant dense<0.000000e+00> : vector<16x512xf32>
    %46 = tpu.matmul %44, %45, %cst_31 {dimension_numbers = #tpu.dot_dimension_numbers<[1], [0], [0], [1], [0, 0, 1, 1], [], []>} : vector<16x256xbf16>, vector<256x512xbf16>, vector<16x512xf32> -> vector<16x512xf32>
    %47 = arith.addf %10, %46 : vector<16x512xf32>
    %48 = vector.extract_strided_slice %47 {offsets = [0, 0], sizes = [16, 256], strides = [1, 1]} : vector<16x512xf32> to vector<16x256xf32>
    %49 = vector.extract_strided_slice %47 {offsets = [0, 256], sizes = [16, 256], strides = [1, 1]} : vector<16x512xf32> to vector<16x256xf32>
    %50 = arith.mulf %48, %48 : vector<16x256xf32>
    %51 = arith.mulf %49, %49 : vector<16x256xf32>
    %52 = arith.addf %50, %51 : vector<16x256xf32>
    %cst_32 = arith.constant 0.000000e+00 : f32
    %53 = vector.broadcast %cst_32 : f32 to vector<16x256xf32>
    %54 = arith.cmpf ogt, %52, %53 : vector<16x256xf32>
    %cst_33 = arith.constant 1.000000e+00 : f32
    %55 = vector.broadcast %cst_33 : f32 to vector<16x256xf32>
    %56 = arith.select %54, %52, %55 : vector<16x256xi1>, vector<16x256xf32>
    %57 = math.rsqrt %56 : vector<16x256xf32>
    %58 = arith.mulf %52, %57 : vector<16x256xf32>
    %59 = vector.shape_cast %58 : vector<16x256xf32> to vector<1x16x256xf32>
    %cst_34 = arith.constant dense<0xFF800000> : vector<1xf32>
    %60 = vector.multi_reduction <maximumf>, %59, %cst_34 [1, 2] : vector<1x16x256xf32> to vector<1xf32>
    %61 = vector.shape_cast %60 : vector<1xf32> to vector<1x1x1xf32>
    %62 = vector.extract %61[0, 0, 0] : f32 from vector<1x1x1xf32>
    %63 = arith.mulf %1, %62 : f32
    %64 = vector.broadcast %63 : f32 to vector<16x256xf32>
    %65 = arith.subf %58, %64 : vector<16x256xf32>
    %cst_35 = arith.constant 0.000000e+00 : f32
    %66 = vector.broadcast %cst_35 : f32 to vector<16x256xf32>
    %67 = arith.maximumf %65, %66 : vector<16x256xf32>
    %68 = arith.mulf %67, %57 : vector<16x256xf32>
    %69 = tpu.concatenate %68, %68 in 1 : vector<16x256xf32>, vector<16x256xf32> -> vector<16x512xf32>
    %70 = arith.mulf %47, %69 : vector<16x512xf32>
    %71 = arith.truncf %70 : vector<16x512xf32> to vector<16x512xbf16>
    %c0_36 = arith.constant 0 : index
    %c0_37 = arith.constant 0 : index
    %72 = vector.load %arg2[%c0_36, %c0_37] : memref<512x256xbf16, #tpu.memory_space<vmem>>, vector<512x256xbf16>
    %cst_38 = arith.constant dense<0.000000e+00> : vector<16x256xf32>
    %73 = tpu.matmul %71, %72, %cst_38 {dimension_numbers = #tpu.dot_dimension_numbers<[1], [0], [0], [1], [0, 0, 1, 1], [], []>} : vector<16x512xbf16>, vector<512x256xbf16>, vector<16x256xf32> -> vector<16x256xf32>
    %74 = arith.subf %0, %73 : vector<16x256xf32>
    %75 = vector.extract_strided_slice %74 {offsets = [0, 0], sizes = [16, 128], strides = [1, 1]} : vector<16x256xf32> to vector<16x128xf32>
    %76 = vector.extract_strided_slice %74 {offsets = [0, 128], sizes = [16, 128], strides = [1, 1]} : vector<16x256xf32> to vector<16x128xf32>
    %77 = arith.mulf %75, %75 : vector<16x128xf32>
    %78 = arith.mulf %76, %76 : vector<16x128xf32>
    %79 = arith.addf %77, %78 : vector<16x128xf32>
    %80 = arith.truncf %79 : vector<16x128xf32> to vector<16x128xbf16>
    %c0_39 = arith.constant 0 : index
    %c0_40 = arith.constant 0 : index
    %81 = vector.load %arg3[%c0_39, %c0_40] : memref<128x128xbf16, #tpu.memory_space<vmem>>, vector<128x128xbf16>
    %cst_41 = arith.constant dense<0.000000e+00> : vector<16x128xf32>
    %82 = tpu.matmul %80, %81, %cst_41 {dimension_numbers = #tpu.dot_dimension_numbers<[1], [0], [0], [1], [0, 0, 1, 1], [], []>} : vector<16x128xbf16>, vector<128x128xbf16>, vector<16x128xf32> -> vector<16x128xf32>
    %83 = arith.addf %82, %4 : vector<16x128xf32>
    %84 = arith.negf %83 : vector<16x128xf32>
    %85 = math.exp %84 : vector<16x128xf32>
    %cst_42 = arith.constant 1.000000e+00 : f32
    %86 = vector.broadcast %cst_42 : f32 to vector<16x128xf32>
    %87 = arith.addf %86, %85 : vector<16x128xf32>
    %88 = arith.divf %86, %87 : vector<16x128xf32>
    %c0_43 = arith.constant 0 : index
    %c0_44 = arith.constant 0 : index
    %89 = vector.load %arg9[%c0_43, %c0_44] : memref<16x256xf32, #tpu.memory_space<vmem>>, vector<16x128xf32>
    tpu.vector_store %arg9[%c0_43, %c0_44], %88 {strides = array<i32>} : memref<16x256xf32, #tpu.memory_space<vmem>>, vector<16x128xf32>,
    %c0_45 = arith.constant 0 : index
    %c0_46 = arith.constant 0 : index
    %90 = vector.load %arg9[%c0_45, %c0_46] : memref<16x256xf32, #tpu.memory_space<vmem>>, vector<16x256xf32>
    %91 = arith.truncf %90 : vector<16x256xf32> to vector<16x256xbf16>
    %c0_47 = arith.constant 0 : index
    %c0_48 = arith.constant 0 : index
    %92 = vector.load %arg4[%c0_47, %c0_48] : memref<256x128xbf16, #tpu.memory_space<vmem>>, vector<256x128xbf16>
    %cst_49 = arith.constant dense<0.000000e+00> : vector<16x128xf32>
    %93 = tpu.matmul %91, %92, %cst_49 {dimension_numbers = #tpu.dot_dimension_numbers<[1], [0], [0], [1], [0, 0, 1, 1], [], []>} : vector<16x256xbf16>, vector<256x128xbf16>, vector<16x128xf32> -> vector<16x128xf32>
    %94 = arith.addf %93, %7 : vector<16x128xf32>
    %cst_50 = arith.constant 0.000000e+00 : f32
    %95 = vector.broadcast %cst_50 : f32 to vector<16x128xf32>
    %96 = arith.maximumf %94, %95 : vector<16x128xf32>
    %c0_51 = arith.constant 0 : index
    %c128_52 = arith.constant 128 : index
    %97 = vector.load %arg9[%c0_51, %c128_52] : memref<16x256xf32, #tpu.memory_space<vmem>>, vector<16x128xf32>
    tpu.vector_store %arg9[%c0_51, %c128_52], %96 {strides = array<i32>} : memref<16x256xf32, #tpu.memory_space<vmem>>, vector<16x128xf32>,
    %cst_53 = arith.constant 7.812500e-03 : f32
    %98 = vector.broadcast %cst_53 : f32 to vector<16x128xf32>
    %99 = arith.mulf %96, %98 : vector<16x128xf32>
    %100 = tpu.concatenate %99, %99 in 1 : vector<16x128xf32>, vector<16x128xf32> -> vector<16x256xf32>
    %101 = arith.mulf %74, %100 : vector<16x256xf32>
    %102 = arith.truncf %101 : vector<16x256xf32> to vector<16x256xbf16>
    %c0_54 = arith.constant 0 : index
    %c0_55 = arith.constant 0 : index
    %103 = vector.load %arg1[%c0_54, %c0_55] : memref<256x512xbf16, #tpu.memory_space<vmem>>, vector<256x512xbf16>
    %cst_56 = arith.constant dense<0.000000e+00> : vector<16x512xf32>
    %104 = tpu.matmul %102, %103, %cst_56 {dimension_numbers = #tpu.dot_dimension_numbers<[1], [0], [0], [1], [0, 0, 1, 1], [], []>} : vector<16x256xbf16>, vector<256x512xbf16>, vector<16x512xf32> -> vector<16x512xf32>
    %105 = arith.addf %70, %104 : vector<16x512xf32>
    %106 = vector.extract_strided_slice %105 {offsets = [0, 0], sizes = [16, 256], strides = [1, 1]} : vector<16x512xf32> to vector<16x256xf32>
    %107 = vector.extract_strided_slice %105 {offsets = [0, 256], sizes = [16, 256], strides = [1, 1]} : vector<16x512xf32> to vector<16x256xf32>
    %108 = arith.mulf %106, %106 : vector<16x256xf32>
    %109 = arith.mulf %107, %107 : vector<16x256xf32>
    %110 = arith.addf %108, %109 : vector<16x256xf32>
    %cst_57 = arith.constant 0.000000e+00 : f32
    %111 = vector.broadcast %cst_57 : f32 to vector<16x256xf32>
    %112 = arith.cmpf ogt, %110, %111 : vector<16x256xf32>
    %cst_58 = arith.constant 1.000000e+00 : f32
    %113 = vector.broadcast %cst_58 : f32 to vector<16x256xf32>
    %114 = arith.select %112, %110, %113 : vector<16x256xi1>, vector<16x256xf32>
    %115 = math.rsqrt %114 : vector<16x256xf32>
    %116 = arith.mulf %110, %115 : vector<16x256xf32>
    %117 = vector.shape_cast %116 : vector<16x256xf32> to vector<1x16x256xf32>
    %cst_59 = arith.constant dense<0xFF800000> : vector<1xf32>
    %118 = vector.multi_reduction <maximumf>, %117, %cst_59 [1, 2] : vector<1x16x256xf32> to vector<1xf32>
    %119 = vector.shape_cast %118 : vector<1xf32> to vector<1x1x1xf32>
    %120 = vector.extract %119[0, 0, 0] : f32 from vector<1x1x1xf32>
    %121 = arith.mulf %1, %120 : f32
    %122 = vector.broadcast %121 : f32 to vector<16x256xf32>
    %123 = arith.subf %116, %122 : vector<16x256xf32>
    %cst_60 = arith.constant 0.000000e+00 : f32
    %124 = vector.broadcast %cst_60 : f32 to vector<16x256xf32>
    %125 = arith.maximumf %123, %124 : vector<16x256xf32>
    %126 = arith.mulf %125, %115 : vector<16x256xf32>
    %127 = tpu.concatenate %126, %126 in 1 : vector<16x256xf32>, vector<16x256xf32> -> vector<16x512xf32>
    %128 = arith.mulf %105, %127 : vector<16x512xf32>
    %129 = arith.truncf %128 : vector<16x512xf32> to vector<16x512xbf16>
    %c0_61 = arith.constant 0 : index
    %c0_62 = arith.constant 0 : index
    %130 = vector.load %arg2[%c0_61, %c0_62] : memref<512x256xbf16, #tpu.memory_space<vmem>>, vector<512x256xbf16>
    %cst_63 = arith.constant dense<0.000000e+00> : vector<16x256xf32>
    %131 = tpu.matmul %129, %130, %cst_63 {dimension_numbers = #tpu.dot_dimension_numbers<[1], [0], [0], [1], [0, 0, 1, 1], [], []>} : vector<16x512xbf16>, vector<512x256xbf16>, vector<16x256xf32> -> vector<16x256xf32>
    %132 = arith.subf %0, %131 : vector<16x256xf32>
    %133 = vector.extract_strided_slice %132 {offsets = [0, 0], sizes = [16, 128], strides = [1, 1]} : vector<16x256xf32> to vector<16x128xf32>
    %134 = vector.extract_strided_slice %132 {offsets = [0, 128], sizes = [16, 128], strides = [1, 1]} : vector<16x256xf32> to vector<16x128xf32>
    %135 = arith.mulf %133, %133 : vector<16x128xf32>
    %136 = arith.mulf %134, %134 : vector<16x128xf32>
    %137 = arith.addf %135, %136 : vector<16x128xf32>
    %138 = arith.truncf %137 : vector<16x128xf32> to vector<16x128xbf16>
    %c0_64 = arith.constant 0 : index
    %c0_65 = arith.constant 0 : index
    %139 = vector.load %arg3[%c0_64, %c0_65] : memref<128x128xbf16, #tpu.memory_space<vmem>>, vector<128x128xbf16>
    %cst_66 = arith.constant dense<0.000000e+00> : vector<16x128xf32>
    %140 = tpu.matmul %138, %139, %cst_66 {dimension_numbers = #tpu.dot_dimension_numbers<[1], [0], [0], [1], [0, 0, 1, 1], [], []>} : vector<16x128xbf16>, vector<128x128xbf16>, vector<16x128xf32> -> vector<16x128xf32>
    %141 = arith.addf %140, %4 : vector<16x128xf32>
    %142 = arith.negf %141 : vector<16x128xf32>
    %143 = math.exp %142 : vector<16x128xf32>
    %cst_67 = arith.constant 1.000000e+00 : f32
    %144 = vector.broadcast %cst_67 : f32 to vector<16x128xf32>
    %145 = arith.addf %144, %143 : vector<16x128xf32>
    %146 = arith.divf %144, %145 : vector<16x128xf32>
    %c0_68 = arith.constant 0 : index
    %c0_69 = arith.constant 0 : index
    %147 = vector.load %arg9[%c0_68, %c0_69] : memref<16x256xf32, #tpu.memory_space<vmem>>, vector<16x128xf32>
    tpu.vector_store %arg9[%c0_68, %c0_69], %146 {strides = array<i32>} : memref<16x256xf32, #tpu.memory_space<vmem>>, vector<16x128xf32>,
    %c0_70 = arith.constant 0 : index
    %c0_71 = arith.constant 0 : index
    %148 = vector.load %arg9[%c0_70, %c0_71] : memref<16x256xf32, #tpu.memory_space<vmem>>, vector<16x256xf32>
    %149 = arith.truncf %148 : vector<16x256xf32> to vector<16x256xbf16>
    %c0_72 = arith.constant 0 : index
    %c0_73 = arith.constant 0 : index
    %150 = vector.load %arg4[%c0_72, %c0_73] : memref<256x128xbf16, #tpu.memory_space<vmem>>, vector<256x128xbf16>
    %cst_74 = arith.constant dense<0.000000e+00> : vector<16x128xf32>
    %151 = tpu.matmul %149, %150, %cst_74 {dimension_numbers = #tpu.dot_dimension_numbers<[1], [0], [0], [1], [0, 0, 1, 1], [], []>} : vector<16x256xbf16>, vector<256x128xbf16>, vector<16x128xf32> -> vector<16x128xf32>
    %152 = arith.addf %151, %7 : vector<16x128xf32>
    %cst_75 = arith.constant 0.000000e+00 : f32
    %153 = vector.broadcast %cst_75 : f32 to vector<16x128xf32>
    %154 = arith.maximumf %152, %153 : vector<16x128xf32>
    %c0_76 = arith.constant 0 : index
    %c128_77 = arith.constant 128 : index
    %155 = vector.load %arg9[%c0_76, %c128_77] : memref<16x256xf32, #tpu.memory_space<vmem>>, vector<16x128xf32>
    tpu.vector_store %arg9[%c0_76, %c128_77], %154 {strides = array<i32>} : memref<16x256xf32, #tpu.memory_space<vmem>>, vector<16x128xf32>,
    %cst_78 = arith.constant 7.812500e-03 : f32
    %156 = vector.broadcast %cst_78 : f32 to vector<16x128xf32>
    %157 = arith.mulf %154, %156 : vector<16x128xf32>
    %158 = tpu.concatenate %157, %157 in 1 : vector<16x128xf32>, vector<16x128xf32> -> vector<16x256xf32>
    %159 = arith.mulf %132, %158 : vector<16x256xf32>
    %160 = arith.truncf %159 : vector<16x256xf32> to vector<16x256xbf16>
    %c0_79 = arith.constant 0 : index
    %c0_80 = arith.constant 0 : index
    %161 = vector.load %arg1[%c0_79, %c0_80] : memref<256x512xbf16, #tpu.memory_space<vmem>>, vector<256x512xbf16>
    %cst_81 = arith.constant dense<0.000000e+00> : vector<16x512xf32>
    %162 = tpu.matmul %160, %161, %cst_81 {dimension_numbers = #tpu.dot_dimension_numbers<[1], [0], [0], [1], [0, 0, 1, 1], [], []>} : vector<16x256xbf16>, vector<256x512xbf16>, vector<16x512xf32> -> vector<16x512xf32>
    %163 = arith.addf %128, %162 : vector<16x512xf32>
    %164 = vector.extract_strided_slice %163 {offsets = [0, 0], sizes = [16, 256], strides = [1, 1]} : vector<16x512xf32> to vector<16x256xf32>
    %165 = vector.extract_strided_slice %163 {offsets = [0, 256], sizes = [16, 256], strides = [1, 1]} : vector<16x512xf32> to vector<16x256xf32>
    %166 = arith.mulf %164, %164 : vector<16x256xf32>
    %167 = arith.mulf %165, %165 : vector<16x256xf32>
    %168 = arith.addf %166, %167 : vector<16x256xf32>
    %cst_82 = arith.constant 0.000000e+00 : f32
    %169 = vector.broadcast %cst_82 : f32 to vector<16x256xf32>
    %170 = arith.cmpf ogt, %168, %169 : vector<16x256xf32>
    %cst_83 = arith.constant 1.000000e+00 : f32
    %171 = vector.broadcast %cst_83 : f32 to vector<16x256xf32>
    %172 = arith.select %170, %168, %171 : vector<16x256xi1>, vector<16x256xf32>
    %173 = math.rsqrt %172 : vector<16x256xf32>
    %174 = arith.mulf %168, %173 : vector<16x256xf32>
    %175 = vector.shape_cast %174 : vector<16x256xf32> to vector<1x16x256xf32>
    %cst_84 = arith.constant dense<0xFF800000> : vector<1xf32>
    %176 = vector.multi_reduction <maximumf>, %175, %cst_84 [1, 2] : vector<1x16x256xf32> to vector<1xf32>
    %177 = vector.shape_cast %176 : vector<1xf32> to vector<1x1x1xf32>
    %178 = vector.extract %177[0, 0, 0] : f32 from vector<1x1x1xf32>
    %179 = arith.mulf %1, %178 : f32
    %180 = vector.broadcast %179 : f32 to vector<16x256xf32>
    %181 = arith.subf %174, %180 : vector<16x256xf32>
    %cst_85 = arith.constant 0.000000e+00 : f32
    %182 = vector.broadcast %cst_85 : f32 to vector<16x256xf32>
    %183 = arith.maximumf %181, %182 : vector<16x256xf32>
    %184 = arith.mulf %183, %173 : vector<16x256xf32>
    %185 = tpu.concatenate %184, %184 in 1 : vector<16x256xf32>, vector<16x256xf32> -> vector<16x512xf32>
    %186 = arith.mulf %163, %185 : vector<16x512xf32>
    %187 = vector.extract_strided_slice %186 {offsets = [0, 0], sizes = [16, 256], strides = [1, 1]} : vector<16x512xf32> to vector<16x256xf32>
    %188 = vector.extract_strided_slice %186 {offsets = [0, 256], sizes = [16, 256], strides = [1, 1]} : vector<16x512xf32> to vector<16x256xf32>
    %189 = arith.mulf %187, %187 : vector<16x256xf32>
    %190 = arith.mulf %188, %188 : vector<16x256xf32>
    %191 = arith.addf %189, %190 : vector<16x256xf32>
    %192 = math.sqrt %191 : vector<16x256xf32>
    %c0_86 = arith.constant 0 : index
    %c0_87 = arith.constant 0 : index
    %193 = vector.load %arg8[%c0_86, %c0_87] : memref<16x256xf32, #tpu.memory_space<vmem>>, vector<16x256xf32>
    tpu.vector_store %arg8[%c0_86, %c0_87], %192 {strides = array<i32>} : memref<16x256xf32, #tpu.memory_space<vmem>>, vector<16x256xf32>,
    return
  }
}

</mosaic_0001>

<bundles_post_ra>
// kernel: tpu_custom_call.1
= control target key start
LH: loop header
LB: loop body
LE: loop exit
PB: predicated region body
PF: predicated region fallthrough
CT: control target
= control target key end

     0   :  { %14 = vsyncpa [#allocation5], 0  ;;  %s6897_s0 = inlined_call_operand.hbm [shape: f32[16,256], index: 0, kind: input, shape index: {}]   ;;  %s6898_s1 = inlined_call_operand.hbm [shape: bf16[256,512], index: 1, kind: input, shape index: {}]   ;;  %s6899_s2 = inlined_call_operand.hbm [shape: bf16[512,256], index: 2, kind: input, shape index: {}]   ;;  %s6900_s3 = inlined_call_operand.hbm [shape: bf16[128,128], index: 3, kind: input, shape index: {}]   ;;  %s6901_s4 = inlined_call_operand.hbm [shape: bf16[256,128], index: 4, kind: input, shape index: {}]   ;;  %s6902_s5 = inlined_call_operand.vmem [shape: f32[1,128], index: 5, kind: input, shape index: {}]   ;;  %s6903_s6 = inlined_call_operand.vmem [shape: f32[1,128], index: 6, kind: input, shape index: {}]   ;;  %s6904_s7 = inlined_call_operand.<no memory space> [shape: f32[1,1], index: 7, kind: input, shape index: {}]   ;;  %s6905_s8 = inlined_call_operand.hbm [shape: f32[16,256], index: 8, kind: output, shape index: {}]  }
   0x1   :  { %15 = vsyncpa [#allocation8], 0 }
   0x2   :  { %16 = vsyncpa [#allocation11], 0 }
   0x3   :  { %17 = vsyncpa [#allocation6], 0  ;;  %s6303_s27 = smov [#allocation7]   ;;  %s6304_s29 = smov [#allocation10]  }
   0x4   :  { %s35_s28 = sshll.u32 %s6303_s27, 4  ;;  %s59_s30 = sshll.u32 %s6304_s29, 4  ;;  %s36_s28 = int_to_ptr.vmem [resolvable:$true] %s35_s28  ;;  %s6363_s30 = int_to_ptr.vmem [resolvable:$true] %s59_s30 }
   0x5   :  { %s6163_s11 = scalar_lea.hbm %s6898_s1, 8192 }
   0x6   :  { %p6164_p0 = scmp.ne.s32.totalorder %s6898_s1, %s6163_s11  ;;  %p6167_p1 = scmp.lt.u32.totalorder %s6163_s11, %s6898_s1 }
   0x8   :  { %p6169_p2 = pnand %p6167_p1, %p6164_p0 }
   0xa   :  { %6172 = shalt.err (!%p6169_p2)
}
   0xb   :  { %s6173_s16 = scalar_lea.vmem %s36_s28, 8192  ;;  %p6178_p4 = scmp.lt.s32.totalorder %s36_s28, %s36_s28 }
   0xc   :  { %p6174_p3 = scmp.ne.s32.totalorder %s36_s28, %s6173_s16  ;;  %p6179_p5 = scmp.lt.s32.totalorder %s6173_s16, %s6173_s16 }
   0xe   :  { %p6180_p6 = por %p6179_p5, %p6178_p4 }
  0x10   :  { %p6181_p7 = pnand %p6180_p6, %p6174_p3 }
  0x12   :  { %6184 = shalt.err (!%p6181_p7)
}
  0x13   :  { %s6305_s17 = smov 256   ;;  %s6306_s18 = smov 16  }
  0x14   :  { %41 = dma.hbm_to_vmem [thread:$0]  %s6898_s1, 8192, %s36_s28, [#allocation8], %s6305_s17, %s6305_s17, %s6306_s18  }
  0x15   :  { %s6185_s23 = scalar_lea.hbm %s6900_s3, 1024 }
  0x16   :  { %p6186_p8 = scmp.ne.s32.totalorder %s6900_s3, %s6185_s23  ;;  %p6189_p9 = scmp.lt.u32.totalorder %s6185_s23, %s6900_s3 }
  0x18   :  { %p6191_p10 = pnand %p6189_p9, %p6186_p8 }
  0x1a   :  { %6194 = shalt.err (!%p6191_p10)
}
  0x1b   :  { %s6195_s29 = scalar_lea.vmem %s6363_s30, 1024  ;;  %p6200_p12 = scmp.lt.s32.totalorder %s6363_s30, %s6363_s30 }
  0x1c   :  { %p6196_p11 = scmp.ne.s32.totalorder %s6363_s30, %s6195_s29  ;;  %p6201_p13 = scmp.lt.s32.totalorder %s6195_s29, %s6195_s29 }
  0x1e   :  { %p6202_p0 = por %p6201_p13, %p6200_p12 }
  0x20   :  { %p6203_p1 = pnand %p6202_p0, %p6196_p11 }
  0x22   :  { %6206 = shalt.err (!%p6203_p1)
}
  0x23   :  { %s6307_s1 = smov 64   ;;  %s6308_s28 = smov 4  }
  0x24   :  { %65 = dma.hbm_to_vmem [thread:$0]  %s6900_s3, 1024, %s6363_s30, [#allocation11], %s6307_s1, %s6307_s1, %s6308_s28  }
  0x25   :  { %s6309_s11 = smov [#allocation4]   ;;  %s6310_s13 = smov [#allocation9]  }
  0x26   :  { %s23_s12 = sshll.u32 %s6309_s11, 4  ;;  %s47_s14 = sshll.u32 %s6310_s13, 4  ;;  %s24_s12 = int_to_ptr.vmem [resolvable:$true] %s23_s12  ;;  %s6400_s14 = int_to_ptr.vmem [resolvable:$true] %s47_s14 }
  0x27   :  { %s6207_s19 = scalar_lea.hbm %s6897_s0, 512 }
  0x28   :  { %p6208_p2 = scmp.ne.s32.totalorder %s6897_s0, %s6207_s19  ;;  %p6211_p3 = scmp.lt.u32.totalorder %s6207_s19, %s6897_s0 }
  0x2a   :  { %p6213_p4 = pnand %p6211_p3, %p6208_p2 }
  0x2c   :  { %6216 = shalt.err (!%p6213_p4)
}
  0x2d   :  { %s6217_s3 = scalar_lea.vmem %s24_s12, 512  ;;  %p6222_p6 = scmp.lt.s32.totalorder %s24_s12, %s24_s12 }
  0x2e   :  { %p6218_p5 = scmp.ne.s32.totalorder %s24_s12, %s6217_s3  ;;  %p6223_p7 = scmp.lt.s32.totalorder %s6217_s3, %s6217_s3 }
  0x30   :  { %p6224_p8 = por %p6223_p7, %p6222_p6 }
  0x32   :  { %p6225_p9 = pnand %p6224_p8, %p6218_p5 }
  0x34   :  { %6228 = shalt.err (!%p6225_p9)
}
  0x35   :  { %29 = dma.hbm_to_vmem [thread:$0]  %s6897_s0, 512, %s24_s12, [#allocation5], %s6305_s17, %s6305_s17, %s6306_s18  }
  0x36   :  { %s6229_s27 = scalar_lea.hbm %s6899_s2, 8192 }
  0x37   :  { %p6230_p10 = scmp.ne.s32.totalorder %s6899_s2, %s6229_s27  ;;  %p6233_p11 = scmp.lt.u32.totalorder %s6229_s27, %s6899_s2 }
  0x39   :  { %p6235_p12 = pnand %p6233_p11, %p6230_p10 }
  0x3b   :  { %6238 = shalt.err (!%p6235_p12)
}
  0x3c   :  { %s6239_s13 = scalar_lea.vmem %s6400_s14, 8192  ;;  %p6244_p0 = scmp.lt.s32.totalorder %s6400_s14, %s6400_s14 }
  0x3d   :  { %p6240_p13 = scmp.ne.s32.totalorder %s6400_s14, %s6239_s13  ;;  %p6245_p1 = scmp.lt.s32.totalorder %s6239_s13, %s6239_s13 }
  0x3f   :  { %p6246_p2 = por %p6245_p1, %p6244_p0 }
  0x41   :  { %p6247_p3 = pnand %p6246_p2, %p6240_p13 }
  0x43   :  { %6250 = shalt.err (!%p6247_p3)
}
  0x44   :  { %s6311_s0 = smov 128   ;;  %s6312_s12 = smov 8  }
  0x45   :  { %53 = dma.hbm_to_vmem [thread:$0]  %s6899_s2, 8192, %s6400_s14, [#allocation8], %s6311_s0, %s6311_s0, %s6312_s12  }
  0x46   :  { %s6313_s19 = smov [#allocation12]   ;;  %s6251_s23 = scalar_lea.hbm %s6901_s4, 2048 }
  0x47   :  { %s71_s20 = sshll.u32 %s6313_s19, 4  ;;  %p6252_p4 = scmp.ne.s32.totalorder %s6901_s4, %s6251_s23  ;;  %s72_s20 = int_to_ptr.vmem [resolvable:$true] %s71_s20 }
  0x48   :  { %p6255_p5 = scmp.lt.u32.totalorder %s6251_s23, %s6901_s4 }
  0x4a   :  { %p6257_p6 = pnand %p6255_p5, %p6252_p4 }
  0x4c   :  { %6260 = shalt.err (!%p6257_p6)
}
  0x4d   :  { %s6261_s26 = scalar_lea.vmem %s72_s20, 2048  ;;  %p6266_p8 = scmp.lt.s32.totalorder %s72_s20, %s72_s20 }
  0x4e   :  { %p6262_p7 = scmp.ne.s32.totalorder %s72_s20, %s6261_s26  ;;  %p6267_p9 = scmp.lt.s32.totalorder %s6261_s26, %s6261_s26 }
  0x50   :  { %p6268_p10 = por %p6267_p9, %p6266_p8 }
  0x52   :  { %p6269_p11 = pnand %p6268_p10, %p6262_p7 }
  0x54   :  { %6272 = shalt.err (!%p6269_p11)
}
  0x55   :  { %77 = dma.hbm_to_vmem [thread:$0]  %s6901_s4, 2048, %s72_s20, [#allocation11], %s6307_s1, %s6307_s1, %s6308_s28  }
  0x56   :  { %6295 = dma.done.wait [#allocation5], 512  }
  0x57   :  { %6296 = vsyncadd [#allocation5], 4294966784 }
  0x58   :  { %6297 = dma.done.wait [#allocation8], 16384  }
  0x59   :  { %6298 = vsyncadd [#allocation8], 4294950912 }
  0x5a   :  { %6299 = dma.done.wait [#allocation11], 3072  }
  0x5b   :  { %6300 = vsyncadd [#allocation11], 4294964224  ;;  %v5363_v0 = vld [vmem:[#allocation7 + $0x4] ss:$16 sps:$4 sm:$0xff]   ;;  %v5365_v1 = vld [vmem:[#allocation7] ss:$16 sps:$4 sm:$0xff]  }
  0x5c   :  { %505 = vmatprep.subr.bf16.mxu0 %v5363_v0  ;;  %v5366_v2 = vld [vmem:[#allocation7 + $0x24] ss:$16 sps:$4 sm:$0xff]   ;;  %v5368_v3 = vld [vmem:[#allocation7 + $0x20] ss:$16 sps:$4 sm:$0xff]   ;;  %v5410_v13 = vld [vmem:[#allocation7 + $0xc] ss:$16 sps:$4 sm:$0xff]  }
  0x5d   :  { %506 = vmatpush1.bf16.msra.mxu0 %v5365_v1  ;;  %v5369_v4 = vld [vmem:[#allocation7 + $0x44] ss:$16 sps:$4 sm:$0xff]   ;;  %v5371_v5 = vld [vmem:[#allocation7 + $0x40] ss:$16 sps:$4 sm:$0xff]   ;;  %v5413_v14 = vld [vmem:[#allocation7 + $0x8] ss:$16 sps:$4 sm:$0xff]   ;;  %548 = vmatprep.subr.bf16.mxu1 %v5410_v13 }
  0x5e   :  { %507 = vmatprep.subr.bf16.mxu0 %v5366_v2  ;;  %v5372_v6 = vld [vmem:[#allocation7 + $0x64] ss:$16 sps:$4 sm:$0xff]   ;;  %v5374_v7 = vld [vmem:[#allocation7 + $0x60] ss:$16 sps:$4 sm:$0xff]   ;;  %v101_v15 = vld [vmem:[#allocation4 + $0x8] sm:$0xff]  ;;  %549 = vmatpush1.bf16.msra.mxu1 %v5413_v14  ;;  %vm6315_vm0 = vmmov 0  }
  0x5f   :  { %v5375_v8 = vld [vmem:[#allocation7 + $0x84] ss:$16 sps:$4 sm:$0xff]   ;;  %v5377_v9 = vld [vmem:[#allocation7 + $0x80] ss:$16 sps:$4 sm:$0xff]   ;;  %v103_v18 = vld [vmem:[#allocation4 + $0x18] sm:$0xff] }
  0x60   :  { %v5378_v10 = vld [vmem:[#allocation7 + $0xa4] ss:$16 sps:$4 sm:$0xff]   ;;  %v5380_v11 = vld [vmem:[#allocation7 + $0xa0] ss:$16 sps:$4 sm:$0xff]   ;;  %v120_v19 = vpack.c.bf16 %v103_v18, %v101_v15  ;;  %v5414_v20 = vld [vmem:[#allocation7 + $0x2c] ss:$16 sps:$4 sm:$0xff]  }
  0x61   :  { %508 = vmatpush1.bf16.msra.mxu0 %v5368_v3  ;;  %v5381_v12 = vld [vmem:[#allocation7 + $0xc4] ss:$16 sps:$4 sm:$0xff]   ;;  %v5383_v16 = vld [vmem:[#allocation7 + $0xc0] ss:$16 sps:$4 sm:$0xff]   ;;  %v5416_v21 = vld [vmem:[#allocation7 + $0x28] ss:$16 sps:$4 sm:$0xff]   ;;  %550 = vmatprep.subr.bf16.mxu1 %v5414_v20 }
  0x62   :  { %509 = vmatprep.subr.bf16.mxu0 %v5369_v4  ;;  %v5384_v17 = vld [vmem:[#allocation7 + $0xe4] ss:$16 sps:$4 sm:$0xff]   ;;  %537 = vmatprep.mubr.bf16.mxu0 %v120_v19  ;;  %v5417_v22 = vld [vmem:[#allocation7 + $0x4c] ss:$16 sps:$4 sm:$0xff]   ;;  %v5386_v23 = vld [vmem:[#allocation7 + $0xe0] ss:$16 sps:$4 sm:$0xff]  }
  0x63   :  { %v5387_v24 = vld [vmem:[#allocation7 + $0x104] ss:$16 sps:$4 sm:$0xff]   ;;  %580 = vmatprep.mubr.bf16.mxu1 %v120_v19  ;;  %551 = vmatpush1.bf16.msra.mxu1 %v5416_v21  ;;  %v5419_v25 = vld [vmem:[#allocation7 + $0x48] ss:$16 sps:$4 sm:$0xff]   ;;  %v5420_v26 = vld [vmem:[#allocation7 + $0x6c] ss:$16 sps:$4 sm:$0xff]  }
  0x64   :  { %552 = vmatprep.subr.bf16.mxu1 %v5417_v22  ;;  %v5389_v27 = vld [vmem:[#allocation7 + $0x100] ss:$16 sps:$4 sm:$0xff]   ;;  %v5390_v28 = vld [vmem:[#allocation7 + $0x124] ss:$16 sps:$4 sm:$0xff]   ;;  %v5422_v29 = vld [vmem:[#allocation7 + $0x68] ss:$16 sps:$4 sm:$0xff]  }
  0x65   :  { %510 = vmatpush1.bf16.msra.mxu0 %v5371_v5  ;;  %v5423_v30 = vld [vmem:[#allocation7 + $0x8c] ss:$16 sps:$4 sm:$0xff]   ;;  %v5392_v31 = vld [vmem:[#allocation7 + $0x120] ss:$16 sps:$4 sm:$0xff]   ;;  %v5393_v32 = vld [vmem:[#allocation7 + $0x144] ss:$16 sps:$4 sm:$0xff]  }
  0x66   :  { %511 = vmatprep.subr.bf16.mxu0 %v5372_v6  ;;  %v5425_v33 = vld [vmem:[#allocation7 + $0x88] ss:$16 sps:$4 sm:$0xff]   ;;  %v5426_v34 = vld [vmem:[#allocation7 + $0xac] ss:$16 sps:$4 sm:$0xff]   ;;  %v5395_v35 = vld [vmem:[#allocation7 + $0x140] ss:$16 sps:$4 sm:$0xff]  }
  0x67   :  { %553 = vmatpush1.bf16.msra.mxu1 %v5419_v25  ;;  %v5396_v36 = vld [vmem:[#allocation7 + $0x164] ss:$16 sps:$4 sm:$0xff]   ;;  %v5428_v37 = vld [vmem:[#allocation7 + $0xa8] ss:$16 sps:$4 sm:$0xff]   ;;  %v5429_v38 = vld [vmem:[#allocation7 + $0xcc] ss:$16 sps:$4 sm:$0xff]  }
  0x68   :  { %554 = vmatprep.subr.bf16.mxu1 %v5420_v26  ;;  %v5398_v39 = vld [vmem:[#allocation7 + $0x160] ss:$16 sps:$4 sm:$0xff]   ;;  %v5399_v40 = vld [vmem:[#allocation7 + $0x184] ss:$16 sps:$4 sm:$0xff]   ;;  %v5431_v41 = vld [vmem:[#allocation7 + $0xc8] ss:$16 sps:$4 sm:$0xff]  }
  0x69   :  { %512 = vmatpush1.bf16.msra.mxu0 %v5374_v7  ;;  %v5432_v42 = vld [vmem:[#allocation7 + $0xec] ss:$16 sps:$4 sm:$0xff]   ;;  %v5401_v43 = vld [vmem:[#allocation7 + $0x180] ss:$16 sps:$4 sm:$0xff]   ;;  %v5402_v44 = vld [vmem:[#allocation7 + $0x1a4] ss:$16 sps:$4 sm:$0xff]  }
  0x6a   :  { %513 = vmatprep.subr.bf16.mxu0 %v5375_v8  ;;  %v5434_v45 = vld [vmem:[#allocation7 + $0xe8] ss:$16 sps:$4 sm:$0xff]   ;;  %v5435_v46 = vld [vmem:[#allocation7 + $0x10c] ss:$16 sps:$4 sm:$0xff]   ;;  %v5404_v47 = vld [vmem:[#allocation7 + $0x1a0] ss:$16 sps:$4 sm:$0xff]  }
  0x6b   :  { %555 = vmatpush1.bf16.msra.mxu1 %v5422_v29  ;;  %v5405_v48 = vld [vmem:[#allocation7 + $0x1c4] ss:$16 sps:$4 sm:$0xff]   ;;  %v5437_v49 = vld [vmem:[#allocation7 + $0x108] ss:$16 sps:$4 sm:$0xff]   ;;  %v5438_v50 = vld [vmem:[#allocation7 + $0x12c] ss:$16 sps:$4 sm:$0xff]  }
  0x6c   :  { %556 = vmatprep.subr.bf16.mxu1 %v5423_v30  ;;  %v5407_v51 = vld [vmem:[#allocation7 + $0x1c0] ss:$16 sps:$4 sm:$0xff]   ;;  %v5408_v52 = vld [vmem:[#allocation7 + $0x1e4] ss:$16 sps:$4 sm:$0xff]   ;;  %v5440_v53 = vld [vmem:[#allocation7 + $0x128] ss:$16 sps:$4 sm:$0xff]  }
  0x6d   :  { %514 = vmatpush1.bf16.msra.mxu0 %v5377_v9  ;;  %v5441_v54 = vld [vmem:[#allocation7 + $0x14c] ss:$16 sps:$4 sm:$0xff]   ;;  %v5412_v55 = vld [vmem:[#allocation7 + $0x1e0] ss:$16 sps:$4 sm:$0xff]   ;;  %v5443_v58 = vld [vmem:[#allocation7 + $0x148] ss:$16 sps:$4 sm:$0xff]  }
  0x6e   :  { %515 = vmatprep.subr.bf16.mxu0 %v5378_v10  ;;  %v100_v56 = vld [vmem:[#allocation4] sm:$0xff]  ;;  %v102_v57 = vld [vmem:[#allocation4 + $0x10] sm:$0xff]  ;;  %v5444_v60 = vld [vmem:[#allocation7 + $0x16c] ss:$16 sps:$4 sm:$0xff]  }
  0x6f   :  { %557 = vmatpush1.bf16.msra.mxu1 %v5425_v33  ;;  %v5461_v59 = vld [vmem:[#allocation9 + $0x4] ss:$8 sps:$4 sm:$0xff]   ;;  %v119_v61 = vpack.c.bf16 %v102_v57, %v100_v56  ;;  %v5446_v62 = vld [vmem:[#allocation7 + $0x168] ss:$16 sps:$4 sm:$0xff]   ;;  %v5464_v1 = vld [vmem:[#allocation9 + $0x14] ss:$8 sps:$4 sm:$0xff]  }
  0x70   :  { %558 = vmatprep.subr.bf16.mxu1 %v5426_v34  ;;  %v5447_v63 = vld [vmem:[#allocation7 + $0x18c] ss:$16 sps:$4 sm:$0xff]   ;;  %v5459_v0 = vld [vmem:[#allocation9] ss:$8 sps:$4 sm:$0xff]   ;;  %v5462_v2 = vld [vmem:[#allocation9 + $0x10] ss:$8 sps:$4 sm:$0xff]  }
  0x71   :  { %516 = vmatpush1.bf16.msra.mxu0 %v5380_v11  ;;  %v5449_v3 = vld [vmem:[#allocation7 + $0x188] ss:$16 sps:$4 sm:$0xff]   ;;  %v5467_v4 = vld [vmem:[#allocation9 + $0x24] ss:$8 sps:$4 sm:$0xff]   ;;  %v5470_v8 = vld [vmem:[#allocation9 + $0x34] ss:$8 sps:$4 sm:$0xff]  }
  0x72   :  { %517 = vmatprep.subr.bf16.mxu0 %v5381_v12  ;;  %v5450_v5 = vld [vmem:[#allocation7 + $0x1ac] ss:$16 sps:$4 sm:$0xff]   ;;  %v5465_v6 = vld [vmem:[#allocation9 + $0x20] ss:$8 sps:$4 sm:$0xff]   ;;  %v5468_v10 = vld [vmem:[#allocation9 + $0x30] ss:$8 sps:$4 sm:$0xff]  }
  0x73   :  { %559 = vmatpush1.bf16.msra.mxu1 %v5428_v37  ;;  %v5452_v7 = vld [vmem:[#allocation7 + $0x1a8] ss:$16 sps:$4 sm:$0xff]   ;;  %v5453_v9 = vld [vmem:[#allocation7 + $0x1cc] ss:$16 sps:$4 sm:$0xff]  }
  0x74   :  { %560 = vmatprep.subr.bf16.mxu1 %v5429_v38  ;;  %v5455_v11 = vld [vmem:[#allocation7 + $0x1c8] ss:$16 sps:$4 sm:$0xff]   ;;  %v5473_v12 = vld [vmem:[#allocation9 + $0x44] ss:$8 sps:$4 sm:$0xff]   ;;  %v5482_v20 = vld [vmem:[#allocation9 + $0x74] ss:$8 sps:$4 sm:$0xff]  }
  0x75   :  { %518 = vmatpush1.bf16.msra.mxu0 %v5383_v16  ;;  %v5456_v13 = vld [vmem:[#allocation7 + $0x1ec] ss:$16 sps:$4 sm:$0xff]   ;;  %v5471_v14 = vld [vmem:[#allocation9 + $0x40] ss:$8 sps:$4 sm:$0xff]   ;;  %v5480_v21 = vld [vmem:[#allocation9 + $0x70] ss:$8 sps:$4 sm:$0xff]  }
  0x76   :  { %519 = vmatprep.subr.bf16.mxu0 %v5384_v17  ;;  %v5458_v15 = vld [vmem:[#allocation7 + $0x1e8] ss:$16 sps:$4 sm:$0xff]   ;;  %v5476_v16 = vld [vmem:[#allocation9 + $0x54] ss:$8 sps:$4 sm:$0xff]   ;;  %v5479_v18 = vld [vmem:[#allocation9 + $0x64] ss:$8 sps:$4 sm:$0xff]  }
  0x77   :  { %561 = vmatpush1.bf16.msra.mxu1 %v5431_v41  ;;  %v5474_v17 = vld [vmem:[#allocation9 + $0x50] ss:$8 sps:$4 sm:$0xff]   ;;  %v5477_v19 = vld [vmem:[#allocation9 + $0x60] ss:$8 sps:$4 sm:$0xff]   ;;  %v5485_v22 = vld [vmem:[#allocation9 + $0x84] ss:$8 sps:$4 sm:$0xff]  }
  0x78   :  { %562 = vmatprep.subr.bf16.mxu1 %v5432_v42  ;;  %v5486_v25 = vld [vmem:[#allocation9 + $0x90] ss:$8 sps:$4 sm:$0xff]   ;;  %v5491_v26 = vld [vmem:[#allocation9 + $0xa4] ss:$8 sps:$4 sm:$0xff]   ;;  %v5518_v56 = vld [vmem:[#allocation9 + $0x134] ss:$8 sps:$4 sm:$0xff]  }
  0x79   :  { %520 = vmatpush1.bf16.msra.mxu0 %v5386_v23  ;;  %v5483_v23 = vld [vmem:[#allocation9 + $0x80] ss:$8 sps:$4 sm:$0xff]   ;;  %v5492_v29 = vld [vmem:[#allocation9 + $0xb0] ss:$8 sps:$4 sm:$0xff]   ;;  %v5497_v30 = vld [vmem:[#allocation9 + $0xc4] ss:$8 sps:$4 sm:$0xff]  }
  0x7a   :  { %521 = vmatprep.subr.bf16.mxu0 %v5387_v24  ;;  %v5488_v24 = vld [vmem:[#allocation9 + $0x94] ss:$8 sps:$4 sm:$0xff]   ;;  %v5498_v33 = vld [vmem:[#allocation9 + $0xd0] ss:$8 sps:$4 sm:$0xff]   ;;  %v5503_v34 = vld [vmem:[#allocation9 + $0xe4] ss:$8 sps:$4 sm:$0xff]  }
  0x7b   :  { %563 = vmatpush1.bf16.msra.mxu1 %v5434_v45  ;;  %v5504_v37 = vld [vmem:[#allocation9 + $0xf0] ss:$8 sps:$4 sm:$0xff]   ;;  %v5509_v38 = vld [vmem:[#allocation9 + $0x104] ss:$8 sps:$4 sm:$0xff]  }
  0x7c   :  { %564 = vmatprep.subr.bf16.mxu1 %v5435_v46  ;;  %v5556_v41 = vld [vmem:[#allocation10 + $0x8] sm:$0xff]   ;;  %v5557_v42 = vld [vmem:[#allocation10 + $0x10] sm:$0xff]  }
  0x7d   :  { %522 = vmatpush1.bf16.msra.mxu0 %v5389_v27  ;;  %v5489_v27 = vld [vmem:[#allocation9 + $0xa0] ss:$8 sps:$4 sm:$0xff]   ;;  %v5516_v57 = vld [vmem:[#allocation9 + $0x130] ss:$8 sps:$4 sm:$0xff]  }
  0x7e   :  { %523 = vmatprep.subr.bf16.mxu0 %v5390_v28  ;;  %v5494_v28 = vld [vmem:[#allocation9 + $0xb4] ss:$8 sps:$4 sm:$0xff]  }
  0x7f   :  { %565 = vmatpush1.bf16.msra.mxu1 %v5437_v49 }
  0x80   :  { %566 = vmatprep.subr.bf16.mxu1 %v5438_v50 }
  0x81   :  { %524 = vmatpush1.bf16.msra.mxu0 %v5392_v31  ;;  %v5495_v31 = vld [vmem:[#allocation9 + $0xc0] ss:$8 sps:$4 sm:$0xff]  }
  0x82   :  { %525 = vmatprep.subr.bf16.mxu0 %v5393_v32  ;;  %v5500_v32 = vld [vmem:[#allocation9 + $0xd4] ss:$8 sps:$4 sm:$0xff]  }
  0x83   :  { %567 = vmatpush1.bf16.msra.mxu1 %v5440_v53  ;;  %v5510_v53 = vld [vmem:[#allocation9 + $0x110] ss:$8 sps:$4 sm:$0xff]  }
  0x84   :  { %568 = vmatprep.subr.bf16.mxu1 %v5441_v54  ;;  %v5515_v54 = vld [vmem:[#allocation9 + $0x124] ss:$8 sps:$4 sm:$0xff]  }
  0x85   :  { %526 = vmatpush1.bf16.msra.mxu0 %v5395_v35  ;;  %v5501_v35 = vld [vmem:[#allocation9 + $0xe0] ss:$8 sps:$4 sm:$0xff]  }
  0x86   :  { %527 = vmatprep.subr.bf16.mxu0 %v5396_v36  ;;  %v5506_v36 = vld [vmem:[#allocation9 + $0xf4] ss:$8 sps:$4 sm:$0xff]  }
  0x87   :  { %569 = vmatpush1.bf16.msra.mxu1 %v5443_v58  ;;  %v5521_v58 = vld [vmem:[#allocation9 + $0x144] ss:$8 sps:$4 sm:$0xff]  }
  0x88   :  { %570 = vmatprep.subr.bf16.mxu1 %v5444_v60  ;;  %v5524_v60 = vld [vmem:[#allocation9 + $0x154] ss:$8 sps:$4 sm:$0xff]  }
  0x89   :  { %528 = vmatpush1.bf16.msra.mxu0 %v5398_v39  ;;  %v5555_v39 = vld [vmem:[#allocation10] sm:$0xff]  }
  0x8a   :  { %529 = vmatprep.subr.bf16.mxu0 %v5399_v40  ;;  %v6314_v40 = vmov 0.0  }
  0x8b   :  { %571 = vmatpush1.bf16.msra.mxu1 %v5446_v62 }
  0x8c   :  { %572 = vmatprep.subr.bf16.mxu1 %v5447_v63 }
  0x8d   :  { %530 = vmatpush1.bf16.msra.mxu0 %v5401_v43  ;;  %v5558_v43 = vld [vmem:[#allocation10 + $0x18] sm:$0xff]  }
  0x8e   :  { %531 = vmatprep.subr.bf16.mxu0 %v5402_v44  ;;  %v5559_v44 = vld [vmem:[#allocation10 + $0x20] sm:$0xff]  }
  0x8f   :  { %573 = vmatpush1.bf16.msra.mxu1 %v5449_v3  ;;  %v5527_v3 = vld [vmem:[#allocation9 + $0x164] ss:$8 sps:$4 sm:$0xff]  }
  0x90   :  { %574 = vmatprep.subr.bf16.mxu1 %v5450_v5  ;;  %v5525_v5 = vld [vmem:[#allocation9 + $0x160] ss:$8 sps:$4 sm:$0xff]  }
  0x91   :  { %532 = vmatpush1.bf16.msra.mxu0 %v5404_v47 }
  0x92   :  { %533 = vmatprep.subr.bf16.mxu0 %v5405_v48 }
  0x93   :  { %575 = vmatpush1.bf16.msra.mxu1 %v5452_v7  ;;  %v5528_v7 = vld [vmem:[#allocation9 + $0x170] ss:$8 sps:$4 sm:$0xff]  }
  0x94   :  { %576 = vmatprep.subr.bf16.mxu1 %v5453_v9  ;;  %v5531_v9 = vld [vmem:[#allocation9 + $0x180] ss:$8 sps:$4 sm:$0xff]  }
  0x95   :  { %534 = vmatpush1.bf16.msra.mxu0 %v5407_v51  ;;  %v5507_v51 = vld [vmem:[#allocation9 + $0x100] ss:$8 sps:$4 sm:$0xff]  }
  0x96   :  { %535 = vmatprep.subr.bf16.mxu0 %v5408_v52  ;;  %v5512_v52 = vld [vmem:[#allocation9 + $0x114] ss:$8 sps:$4 sm:$0xff]  }
  0x97   :  { %577 = vmatpush1.bf16.msra.mxu1 %v5455_v11  ;;  %v5534_v11 = vld [vmem:[#allocation9 + $0x190] ss:$8 sps:$4 sm:$0xff]  }
  0x98   :  { %578 = vmatprep.subr.bf16.mxu1 %v5456_v13  ;;  %v5537_v13 = vld [vmem:[#allocation9 + $0x1a0] ss:$8 sps:$4 sm:$0xff]  }
  0x99   :  { %536 = vmatpush1.bf16.msra.mxu0 %v5412_v55  ;;  %v5513_v55 = vld [vmem:[#allocation9 + $0x120] ss:$8 sps:$4 sm:$0xff]  }
  0x9a   :  { %981 = vmatprep.subr.bf16.mxu0 %v5461_v59  ;;  %v5519_v59 = vld [vmem:[#allocation9 + $0x140] ss:$8 sps:$4 sm:$0xff]  }
  0x9b   :  { %579 = vmatpush1.bf16.msra.mxu1 %v5458_v15  ;;  %v5540_v15 = vld [vmem:[#allocation9 + $0x1b0] ss:$8 sps:$4 sm:$0xff]  }
  0x9c   :  { %538 = vmatmul.mubr.bf16.vlgmr.msra.gmra.mrb[0].mxu0 %v119_v61  ;;  %5270 = vmatprep.subr.bf16.mxu1 %v6314_v40 }
  0x9d   :  { %982 = vmatpush1.bf16.msra.mxu0 %v5459_v0  ;;  %v5522_v0 = vld [vmem:[#allocation9 + $0x150] ss:$8 sps:$4 sm:$0xff]  }
  0x9e   :  { %983 = vmatprep.subr.bf16.mxu0 %v5464_v1  ;;  %581 = vmatmul.mubr.bf16.vlgmr.msra.gmra.mrb[0].mxu1 %v119_v61 }
  0x9f   :  { %5271 = vmatpush3.bf16.msra.mxu1 %v5555_v39  ;;  %v6148_v39 = vld [vmem:[#allocation7 + $0xe8] ss:$16 sps:$4 sm:$0xff]   ;;  %5286 = vmatprep.mubr.msk.bf16.mxu1 %vm6315_vm0, %v6314_v40 }
  0xa0   :  { %5272 = vmatprep.subr.bf16.mxu1 %v6314_v40 }
  0xa1   :  { %984 = vmatpush1.bf16.msra.mxu0 %v5462_v2 }
  0xa2   :  { %985 = vmatprep.subr.bf16.mxu0 %v5467_v4 }
  0xa3   :  { %5273 = vmatpush3.bf16.msra.mxu1 %v5556_v41  ;;  %v6149_v41 = vld [vmem:[#allocation7 + $0x10c] ss:$16 sps:$4 sm:$0xff]  }
  0xa4   :  { %5274 = vmatprep.subr.bf16.mxu1 %v6314_v40 }
  0xa5   :  { %986 = vmatpush1.bf16.msra.mxu0 %v5465_v6  ;;  %v5530_v6 = vld [vmem:[#allocation9 + $0x174] ss:$8 sps:$4 sm:$0xff]  }
  0xa6   :  { %987 = vmatprep.subr.bf16.mxu0 %v5470_v8  ;;  %v5533_v8 = vld [vmem:[#allocation9 + $0x184] ss:$8 sps:$4 sm:$0xff]  }
  0xa7   :  { %5275 = vmatpush3.bf16.msra.mxu1 %v5557_v42  ;;  %v6150_v42 = vld [vmem:[#allocation7 + $0x108] ss:$16 sps:$4 sm:$0xff]  }
  0xa8   :  { %5276 = vmatprep.subr.bf16.mxu1 %v6314_v40 }
  0xa9   :  { %988 = vmatpush1.bf16.msra.mxu0 %v5468_v10  ;;  %v5536_v10 = vld [vmem:[#allocation9 + $0x194] ss:$8 sps:$4 sm:$0xff]  }
  0xaa   :  { %989 = vmatprep.subr.bf16.mxu0 %v5473_v12  ;;  %v5539_v12 = vld [vmem:[#allocation9 + $0x1a4] ss:$8 sps:$4 sm:$0xff]  }
  0xab   :  { %5277 = vmatpush3.bf16.msra.mxu1 %v5558_v43  ;;  %v6151_v43 = vld [vmem:[#allocation7 + $0x12c] ss:$16 sps:$4 sm:$0xff]  }
  0xac   :  { %5278 = vmatprep.subr.bf16.mxu1 %v6314_v40 }
  0xad   :  { %990 = vmatpush1.bf16.msra.mxu0 %v5471_v14  ;;  %v5542_v14 = vld [vmem:[#allocation9 + $0x1b4] ss:$8 sps:$4 sm:$0xff]  }
  0xae   :  { %991 = vmatprep.subr.bf16.mxu0 %v5476_v16  ;;  %v5545_v16 = vld [vmem:[#allocation9 + $0x1c4] ss:$8 sps:$4 sm:$0xff]  }
  0xaf   :  { %5279 = vmatpush3.bf16.msra.mxu1 %v5559_v44  ;;  %v6152_v44 = vld [vmem:[#allocation7 + $0x128] ss:$16 sps:$4 sm:$0xff]  }
  0xb0   :  { %5280 = vmatprep.subr.bf16.mxu1 %v6314_v40 }
  0xb1   :  { %992 = vmatpush1.bf16.msra.mxu0 %v5474_v17  ;;  %v5543_v17 = vld [vmem:[#allocation9 + $0x1c0] ss:$8 sps:$4 sm:$0xff]  }
  0xb2   :  { %993 = vmatprep.subr.bf16.mxu0 %v5479_v18  ;;  %v5548_v18 = vld [vmem:[#allocation9 + $0x1d4] ss:$8 sps:$4 sm:$0xff]  }
  0xb5   :  { %994 = vmatpush1.bf16.msra.mxu0 %v5477_v19  ;;  %v5546_v19 = vld [vmem:[#allocation9 + $0x1d0] ss:$8 sps:$4 sm:$0xff]  }
  0xb6   :  { %995 = vmatprep.subr.bf16.mxu0 %v5482_v20  ;;  %v5551_v20 = vld [vmem:[#allocation9 + $0x1e4] ss:$8 sps:$4 sm:$0xff]  }
  0xb9   :  { %996 = vmatpush1.bf16.msra.mxu0 %v5480_v21  ;;  %v5549_v21 = vld [vmem:[#allocation9 + $0x1e0] ss:$8 sps:$4 sm:$0xff]  }
  0xba   :  { %997 = vmatprep.subr.bf16.mxu0 %v5485_v22  ;;  %v5554_v22 = vld [vmem:[#allocation9 + $0x1f4] ss:$8 sps:$4 sm:$0xff]  }
  0xbd   :  { %998 = vmatpush1.bf16.msra.mxu0 %v5483_v23  ;;  %v5552_v23 = vld [vmem:[#allocation9 + $0x1f0] ss:$8 sps:$4 sm:$0xff]  }
  0xbe   :  { %999 = vmatprep.subr.bf16.mxu0 %v5488_v24  ;;  %v6133_v24 = vld [vmem:[#allocation7 + $0xc] ss:$16 sps:$4 sm:$0xff]  }
  0xc1   :  { %1000 = vmatpush1.bf16.msra.mxu0 %v5486_v25  ;;  %v6134_v25 = vld [vmem:[#allocation7 + $0x8] ss:$16 sps:$4 sm:$0xff]  }
  0xc2   :  { %1001 = vmatprep.subr.bf16.mxu0 %v5491_v26  ;;  %v6135_v26 = vld [vmem:[#allocation7 + $0x2c] ss:$16 sps:$4 sm:$0xff]  }
  0xc5   :  { %1002 = vmatpush1.bf16.msra.mxu0 %v5489_v27  ;;  %v6136_v27 = vld [vmem:[#allocation7 + $0x28] ss:$16 sps:$4 sm:$0xff]  }
  0xc6   :  { %1003 = vmatprep.subr.bf16.mxu0 %v5494_v28  ;;  %v6137_v28 = vld [vmem:[#allocation7 + $0x4c] ss:$16 sps:$4 sm:$0xff]  }
  0xc9   :  { %1004 = vmatpush1.bf16.msra.mxu0 %v5492_v29  ;;  %v6138_v29 = vld [vmem:[#allocation7 + $0x48] ss:$16 sps:$4 sm:$0xff]  }
  0xca   :  { %1005 = vmatprep.subr.bf16.mxu0 %v5497_v30  ;;  %v6139_v30 = vld [vmem:[#allocation7 + $0x6c] ss:$16 sps:$4 sm:$0xff]  }
  0xcd   :  { %1006 = vmatpush1.bf16.msra.mxu0 %v5495_v31  ;;  %v6140_v31 = vld [vmem:[#allocation7 + $0x68] ss:$16 sps:$4 sm:$0xff]  }
  0xce   :  { %1007 = vmatprep.subr.bf16.mxu0 %v5500_v32  ;;  %v6141_v32 = vld [vmem:[#allocation7 + $0x8c] ss:$16 sps:$4 sm:$0xff]  }
  0xd1   :  { %1008 = vmatpush1.bf16.msra.mxu0 %v5498_v33  ;;  %v6142_v33 = vld [vmem:[#allocation7 + $0x88] ss:$16 sps:$4 sm:$0xff]  }
  0xd2   :  { %1009 = vmatprep.subr.bf16.mxu0 %v5503_v34  ;;  %v6143_v34 = vld [vmem:[#allocation7 + $0xac] ss:$16 sps:$4 sm:$0xff]  }
  0xd5   :  { %1010 = vmatpush1.bf16.msra.mxu0 %v5501_v35  ;;  %v6144_v35 = vld [vmem:[#allocation7 + $0xa8] ss:$16 sps:$4 sm:$0xff]  }
  0xd6   :  { %1011 = vmatprep.subr.bf16.mxu0 %v5506_v36  ;;  %v6145_v36 = vld [vmem:[#allocation7 + $0xcc] ss:$16 sps:$4 sm:$0xff]  }
  0xd9   :  { %1012 = vmatpush1.bf16.msra.mxu0 %v5504_v37  ;;  %v6146_v37 = vld [vmem:[#allocation7 + $0xc8] ss:$16 sps:$4 sm:$0xff]  }
  0xda   :  { %1024 = vmatprep.subr.bf16.mxu0 %v5509_v38  ;;  %v6147_v38 = vld [vmem:[#allocation7 + $0xec] ss:$16 sps:$4 sm:$0xff]  }
 0x16f   :  { %v6455_v45 = vpop.f32.mrb[0].mxu0 }
 0x170   :  { %v6457_v46 = vpop.f32.mrb[1].mxu0 }
 0x171   :  { %v6459_v47 = vpop.f32.mrb[2].mxu0  ;;  %v6467_v61 = vpop.f32.mrb[0].mxu1 }
 0x172   :  { %v593_v48 = vpack.c.bf16 %v6459_v47, %v6455_v45  ;;  %v6463_v49 = vpop.f32.mrb[3].mxu0  ;;  %v6469_v62 = vpop.f32.mrb[1].mxu1 }
 0x173   :  { %v594_v50 = vpack.c.bf16 %v6463_v49, %v6457_v46  ;;  %v6471_v63 = vpop.f32.mrb[2].mxu1 }
 0x174   :  { %v595_v1 = vpack.c.bf16 %v6471_v63, %v6467_v61  ;;  %v6475_v2 = vpop.f32.mrb[3].mxu1 }
 0x175   :  { %1013 = vmatprep.mubr.bf16.mxu0 %v594_v50  ;;  %v596_v4 = vpack.c.bf16 %v6475_v2, %v6469_v62  ;;  %v5561_v50 = vld [vmem:[#allocation10 + $0x30] sm:$0xff]  }
 0x176   :  { %1014 = vmatmul.mubr.bf16.vlgmr.msra.gmra.mrb[4].mxu0 %v593_v48  ;;  %v5560_v48 = vld [vmem:[#allocation10 + $0x28] sm:$0xff]  }
 0x177   :  { %1025 = vmatpush1.bf16.msra.mxu0 %v5507_v51  ;;  %1056 = vmatprep.mubr.bf16.mxu0 %v596_v4  ;;  %v5562_v51 = vld [vmem:[#allocation10 + $0x38] sm:$0xff]  }
 0x178   :  { %1026 = vmatprep.subr.bf16.mxu0 %v5512_v52  ;;  %5281 = vmatpush3.bf16.msra.mxu1 %v5560_v48  ;;  %v6502_v4 = vld [vmem:[#allocation4 + $0x18] sm:$0xff] }
 0x179   :  { %5282 = vmatprep.subr.bf16.mxu1 %v6314_v40 }
 0x17b   :  { %1027 = vmatpush1.bf16.msra.mxu0 %v5510_v53  ;;  %v6483_v53 = vld [vmem:[#allocation4] sm:$0xff] }
 0x17c   :  { %1028 = vmatprep.subr.bf16.mxu0 %v5515_v54  ;;  %5283 = vmatpush3.bf16.msra.mxu1 %v5561_v50 }
 0x17d   :  { %5284 = vmatprep.subr.bf16.mxu1 %v6314_v40 }
 0x17f   :  { %1029 = vmatpush1.bf16.msra.mxu0 %v5513_v55 }
 0x180   :  { %1030 = vmatprep.subr.bf16.mxu0 %v5518_v56  ;;  %5285 = vmatpush3.bf16.msra.mxu1 %v5562_v51  ;;  %v6488_v56 = vld [vmem:[#allocation4 + $0x8] sm:$0xff] }
 0x183   :  { %1031 = vmatpush1.bf16.msra.mxu0 %v5516_v57 }
 0x184   :  { %1032 = vmatprep.subr.bf16.mxu0 %v5521_v58 }
 0x187   :  { %1033 = vmatpush1.bf16.msra.mxu0 %v5519_v59  ;;  %v6493_v59 = vld [vmem:[#allocation4 + $0x10] sm:$0xff] }
 0x188   :  { %1034 = vmatprep.subr.bf16.mxu0 %v5524_v60 }
 0x18b   :  { %1035 = vmatpush1.bf16.msra.mxu0 %v5522_v0 }
 0x18c   :  { %1036 = vmatprep.subr.bf16.mxu0 %v5527_v3 }
 0x18f   :  { %1037 = vmatpush1.bf16.msra.mxu0 %v5525_v5 }
 0x190   :  { %1038 = vmatprep.subr.bf16.mxu0 %v5530_v6 }
 0x193   :  { %1039 = vmatpush1.bf16.msra.mxu0 %v5528_v7 }
 0x194   :  { %1040 = vmatprep.subr.bf16.mxu0 %v5533_v8 }
 0x197   :  { %1041 = vmatpush1.bf16.msra.mxu0 %v5531_v9 }
 0x198   :  { %1042 = vmatprep.subr.bf16.mxu0 %v5536_v10 }
 0x19b   :  { %1043 = vmatpush1.bf16.msra.mxu0 %v5534_v11  ;;  %v5563_v11 = vld [vmem:[#allocation12 + $0x40] sm:$0xff]  }
 0x19c   :  { %1044 = vmatprep.subr.bf16.mxu0 %v5539_v12  ;;  %v5564_v12 = vld [vmem:[#allocation12] sm:$0xff]   ;;  %5186 = vmatprep.subr.bf16.mxu1 %v5563_v11 }
 0x19d   :  { %v5596_v11 = vld [vmem:[#allocation7 + $0xa4] ss:$16 sps:$4 sm:$0xff]  }
 0x19f   :  { %1045 = vmatpush1.bf16.msra.mxu0 %v5537_v13  ;;  %v5565_v13 = vld [vmem:[#allocation12 + $0x48] sm:$0xff]  }
 0x1a0   :  { %1046 = vmatprep.subr.bf16.mxu0 %v5542_v14  ;;  %v5566_v14 = vld [vmem:[#allocation12 + $0x8] sm:$0xff]  }
 0x1a3   :  { %1047 = vmatpush1.bf16.msra.mxu0 %v5540_v15  ;;  %v5567_v15 = vld [vmem:[#allocation12 + $0x50] sm:$0xff]  }
 0x1a4   :  { %1048 = vmatprep.subr.bf16.mxu0 %v5545_v16  ;;  %v5568_v16 = vld [vmem:[#allocation12 + $0x10] sm:$0xff]  }
 0x1a7   :  { %1049 = vmatpush1.bf16.msra.mxu0 %v5543_v17  ;;  %v5569_v17 = vld [vmem:[#allocation12 + $0x58] sm:$0xff]  }
 0x1a8   :  { %1050 = vmatprep.subr.bf16.mxu0 %v5548_v18  ;;  %v5570_v18 = vld [vmem:[#allocation12 + $0x18] sm:$0xff]  }
 0x1ab   :  { %1051 = vmatpush1.bf16.msra.mxu0 %v5546_v19  ;;  %v5571_v19 = vld [vmem:[#allocation12 + $0x60] sm:$0xff]  }
 0x1ac   :  { %1052 = vmatprep.subr.bf16.mxu0 %v5551_v20  ;;  %v5572_v20 = vld [vmem:[#allocation12 + $0x20] sm:$0xff]  }
 0x1af   :  { %1053 = vmatpush1.bf16.msra.mxu0 %v5549_v21  ;;  %v5573_v21 = vld [vmem:[#allocation12 + $0x68] sm:$0xff]  }
 0x1b0   :  { %1054 = vmatprep.subr.bf16.mxu0 %v5554_v22  ;;  %v5574_v22 = vld [vmem:[#allocation12 + $0x28] sm:$0xff]  }
 0x1b3   :  { %1055 = vmatpush1.bf16.msra.mxu0 %v5552_v23  ;;  %v5575_v23 = vld [vmem:[#allocation12 + $0x70] sm:$0xff]  }
 0x1b4   :  { %1811 = vmatprep.subr.bf16.mxu0 %v6133_v24  ;;  %v6316_v24 = vmov 1.0|1.0  }
 0x1b6   :  { %1057 = vmatmul.mubr.bf16.vlgmr.msra.gmra.mrb[4].mxu0 %v595_v1 }
 0x1b7   :  { %1812 = vmatpush1.bf16.msra.mxu0 %v6134_v25  ;;  %v5576_v25 = vld [vmem:[#allocation12 + $0x30] sm:$0xff]  }
 0x1b8   :  { %1813 = vmatprep.subr.bf16.mxu0 %v6135_v26  ;;  %v5577_v26 = vld [vmem:[#allocation12 + $0x78] sm:$0xff]  }
 0x1bb   :  { %1814 = vmatpush1.bf16.msra.mxu0 %v6136_v27  ;;  %v5578_v27 = vld [vmem:[#allocation12 + $0x38] sm:$0xff]  }
 0x1bc   :  { %1815 = vmatprep.subr.bf16.mxu0 %v6137_v28  ;;  %v5581_v28 = vld [vmem:[#allocation7 + $0x4] ss:$16 sps:$4 sm:$0xff]  }
 0x1bf   :  { %1816 = vmatpush1.bf16.msra.mxu0 %v6138_v29  ;;  %v5612_v29 = vld [vmem:[#allocation7 + $0x148] ss:$16 sps:$4 sm:$0xff]  }
 0x1c0   :  { %1817 = vmatprep.subr.bf16.mxu0 %v6139_v30  ;;  %v5614_v30 = vld [vmem:[#allocation7 + $0x14c] ss:$16 sps:$4 sm:$0xff]  }
 0x1c3   :  { %1818 = vmatpush1.bf16.msra.mxu0 %v6140_v31  ;;  %v5618_v31 = vld [vmem:[#allocation7 + $0x168] ss:$16 sps:$4 sm:$0xff]  }
 0x1c4   :  { %1819 = vmatprep.subr.bf16.mxu0 %v6141_v32  ;;  %v5620_v32 = vld [vmem:[#allocation7 + $0x16c] ss:$16 sps:$4 sm:$0xff]  }
 0x1c7   :  { %1820 = vmatpush1.bf16.msra.mxu0 %v6142_v33  ;;  %v6514_v33 = vld [vmem:[%s6902_s5] ss:$0 sm:$0xff] }
 0x1c8   :  { %1821 = vmatprep.subr.bf16.mxu0 %v6143_v34 }
 0x1cb   :  { %1822 = vmatpush1.bf16.msra.mxu0 %v6144_v35 }
 0x1cc   :  { %1823 = vmatprep.subr.bf16.mxu0 %v6145_v36 }
 0x1cf   :  { %1824 = vmatpush1.bf16.msra.mxu0 %v6146_v37 }
 0x1d0   :  { %1825 = vmatprep.subr.bf16.mxu0 %v6147_v38 }
 0x1d3   :  { %1826 = vmatpush1.bf16.msra.mxu0 %v6148_v39 }
 0x1d4   :  { %1827 = vmatprep.subr.bf16.mxu0 %v6149_v41 }
 0x1d7   :  { %1828 = vmatpush1.bf16.msra.mxu0 %v6150_v42 }
 0x1d8   :  { %1829 = vmatprep.subr.bf16.mxu0 %v6151_v43 }
 0x1db   :  { %1830 = vmatpush1.bf16.msra.mxu0 %v6152_v44 }
 0x1dc   :  { %1831 = vmatprep.subr.bf16.mxu0 %v5614_v30  ;;  %v5632_v30 = vld [vmem:[#allocation7 + $0x1ac] ss:$16 sps:$4 sm:$0xff]  }
 0x1df   :  { %1832 = vmatpush1.bf16.msra.mxu0 %v5612_v29  ;;  %v5629_v29 = vld [vmem:[#allocation7 + $0x1a4] ss:$16 sps:$4 sm:$0xff]  }
 0x1e0   :  { %1833 = vmatprep.subr.bf16.mxu0 %v5620_v32  ;;  %v5630_v32 = vld [vmem:[#allocation7 + $0x1a8] ss:$16 sps:$4 sm:$0xff]  }
 0x1e3   :  { %1834 = vmatpush1.bf16.msra.mxu0 %v5618_v31  ;;  %v5627_v31 = vld [vmem:[#allocation7 + $0x1a0] ss:$16 sps:$4 sm:$0xff]  }
 0x289   :  { %v1058_v52 = vpop.f32.mrb[4].mxu0 }
 0x28a   :  { %v6486_v54 = vsub.f32 %v6483_v53, %v1058_v52  ;;  %v1060_v55 = vpop.f32.mrb[5].mxu0 }
 0x28b   :  { %v6491_v57 = vsub.f32 %v6488_v56, %v1060_v55  ;;  %v1062_v58 = vpop.f32.mrb[6].mxu0  ;;  %v5579_v55 = vld [vmem:[#allocation7] ss:$16 sps:$4 sm:$0xff]  }
 0x28c   :  { %v6496_v60 = vsub.f32 %v6493_v59, %v1062_v58  ;;  %v1064_v0 = vpop.f32.mrb[7].mxu0  ;;  %v1071_v1 = vmul.f32 %v6486_v54, %v6486_v54 }
 0x28d   :  { %v1073_v3 = vmul.f32 %v6491_v57, %v6491_v57  ;;  %v6505_v5 = vsub.f32 %v6502_v4, %v1064_v0  ;;  %v5584_v0 = vld [vmem:[#allocation7 + $0x24] ss:$16 sps:$4 sm:$0xff]  }
 0x28e   :  { %v1072_v6 = vmul.f32 %v6496_v60, %v6496_v60 }
 0x28f   :  { %v1074_v7 = vmul.f32 %v6505_v5, %v6505_v5  ;;  %v1075_v8 = vadd.f32 %v1073_v3, %v1071_v1  ;;  %v5582_v1 = vld [vmem:[#allocation7 + $0x20] ss:$16 sps:$4 sm:$0xff]   ;;  %v5587_v3 = vld [vmem:[#allocation7 + $0x44] ss:$16 sps:$4 sm:$0xff]  }
 0x291   :  { %v1076_v9 = vadd.f32 %v1074_v7, %v1072_v6  ;;  %v5585_v6 = vld [vmem:[#allocation7 + $0x40] ss:$16 sps:$4 sm:$0xff]   ;;  %v5590_v7 = vld [vmem:[#allocation7 + $0x64] ss:$16 sps:$4 sm:$0xff]  }
 0x293   :  { %v1077_v10 = vpack.c.bf16 %v1076_v9, %v1075_v8  ;;  %v5588_v8 = vld [vmem:[#allocation7 + $0x60] ss:$16 sps:$4 sm:$0xff]   ;;  %v5593_v9 = vld [vmem:[#allocation7 + $0x84] ss:$16 sps:$4 sm:$0xff]  }
 0x295   :  { %5287 = vmatmul.mubr.bf16.vlgmr.msra.gmra.mrb[4].mxu1 %v1077_v10  ;;  %v5591_v10 = vld [vmem:[#allocation7 + $0x80] ss:$16 sps:$4 sm:$0xff]  }
 0x296   :  { %5187 = vmatpush3.bf16.msra.mxu1 %v5564_v12  ;;  %1363 = vmatprep.mubr.bf16.mxu1 %v6316_v24  ;;  %v5594_v12 = vld [vmem:[#allocation7 + $0xa0] ss:$16 sps:$4 sm:$0xff]  }
 0x297   :  { %5188 = vmatprep.subr.bf16.mxu1 %v5565_v13  ;;  %v5599_v13 = vld [vmem:[#allocation7 + $0xc4] ss:$16 sps:$4 sm:$0xff]   ;;  %v5615_v24 = vld [vmem:[#allocation7 + $0x160] ss:$16 sps:$4 sm:$0xff]  }
 0x29a   :  { %5189 = vmatpush3.bf16.msra.mxu1 %v5566_v14  ;;  %v5597_v14 = vld [vmem:[#allocation7 + $0xc0] ss:$16 sps:$4 sm:$0xff]  }
 0x29b   :  { %5190 = vmatprep.subr.bf16.mxu1 %v5567_v15  ;;  %v5602_v15 = vld [vmem:[#allocation7 + $0xe4] ss:$16 sps:$4 sm:$0xff]  }
 0x29e   :  { %5191 = vmatpush3.bf16.msra.mxu1 %v5568_v16  ;;  %v5600_v16 = vld [vmem:[#allocation7 + $0xe0] ss:$16 sps:$4 sm:$0xff]  }
 0x29f   :  { %5192 = vmatprep.subr.bf16.mxu1 %v5569_v17  ;;  %v5605_v17 = vld [vmem:[#allocation7 + $0x104] ss:$16 sps:$4 sm:$0xff]  }
 0x2a2   :  { %5193 = vmatpush3.bf16.msra.mxu1 %v5570_v18  ;;  %v5603_v18 = vld [vmem:[#allocation7 + $0x100] ss:$16 sps:$4 sm:$0xff]  }
 0x2a3   :  { %5194 = vmatprep.subr.bf16.mxu1 %v5571_v19  ;;  %v5608_v19 = vld [vmem:[#allocation7 + $0x124] ss:$16 sps:$4 sm:$0xff]  }
 0x2a6   :  { %5195 = vmatpush3.bf16.msra.mxu1 %v5572_v20  ;;  %v5606_v20 = vld [vmem:[#allocation7 + $0x120] ss:$16 sps:$4 sm:$0xff]  }
 0x2a7   :  { %5196 = vmatprep.subr.bf16.mxu1 %v5573_v21  ;;  %v5611_v21 = vld [vmem:[#allocation7 + $0x144] ss:$16 sps:$4 sm:$0xff]  }
 0x2aa   :  { %5197 = vmatpush3.bf16.msra.mxu1 %v5574_v22  ;;  %v5609_v22 = vld [vmem:[#allocation7 + $0x140] ss:$16 sps:$4 sm:$0xff]  }
 0x2ab   :  { %5198 = vmatprep.subr.bf16.mxu1 %v5575_v23  ;;  %v5617_v23 = vld [vmem:[#allocation7 + $0x164] ss:$16 sps:$4 sm:$0xff]  }
 0x2ae   :  { %5199 = vmatpush3.bf16.msra.mxu1 %v5576_v25  ;;  %v5623_v25 = vld [vmem:[#allocation7 + $0x184] ss:$16 sps:$4 sm:$0xff]  }
 0x2af   :  { %5200 = vmatprep.subr.bf16.mxu1 %v5577_v26  ;;  %v5626_v26 = vld [vmem:[#allocation7 + $0x18c] ss:$16 sps:$4 sm:$0xff]  }
 0x2b0   :  { %1835 = vmatprep.subr.bf16.mxu0 %v5626_v26 }
 0x2b2   :  { %5201 = vmatpush3.bf16.msra.mxu1 %v5578_v27  ;;  %v5621_v27 = vld [vmem:[#allocation7 + $0x180] ss:$16 sps:$4 sm:$0xff]  }
 0x2b3   :  { %1768 = vmatprep.subr.bf16.mxu1 %v5581_v28  ;;  %v5624_v28 = vld [vmem:[#allocation7 + $0x188] ss:$16 sps:$4 sm:$0xff]  }
 0x2b4   :  { %1836 = vmatpush1.bf16.msra.mxu0 %v5624_v28 }
 0x2b5   :  { %1837 = vmatprep.subr.bf16.mxu0 %v5632_v30 }
 0x2b8   :  { %1838 = vmatpush1.bf16.msra.mxu0 %v5630_v32 }
 0x368   :  { %v1176_v34 = vpop.f32.mrb[4].mxu1 }
 0x369   :  { %v1177_v35 = vadd.f32 %v6514_v33, %v1176_v34  ;;  %v5288_v36 = vpop.f32.mrb[5].mxu1  ;;  %v5635_v34 = vld [vmem:[#allocation7 + $0x1c4] ss:$16 sps:$4 sm:$0xff]  }
 0x36a   :  { %v1179_v37 = vpop.f32.mrb[6].mxu1  ;;  %v5633_v36 = vld [vmem:[#allocation7 + $0x1c0] ss:$16 sps:$4 sm:$0xff]  }
 0x36b   :  { %v4787_v38 = vmul.f32 -1.442695, %v1177_v35  ;;  %v1180_v39 = vadd.f32 %v6514_v33, %v1179_v37  ;;  %v5289_v41 = vpop.f32.mrb[7].mxu1  ;;  %v5638_v35 = vld [vmem:[#allocation7 + $0x1cc] ss:$16 sps:$4 sm:$0xff]  }
 0x36c   :  { %v5636_v37 = vld [vmem:[#allocation7 + $0x1c8] ss:$16 sps:$4 sm:$0xff]   ;;  %1839 = vmatprep.subr.bf16.mxu0 %v5638_v35  ;;  %v5639_v41 = vld [vmem:[#allocation7 + $0x1e0] ss:$16 sps:$4 sm:$0xff]  }
 0x36d   :  { %6077 = vpow2.f32 %v4787_v38  ;;  %v4788_v42 = vmul.f32 -1.442695, %v1180_v39  ;;  %1840 = vmatpush1.bf16.msra.mxu0 %v5636_v37  ;;  %v5641_v38 = vld [vmem:[#allocation7 + $0x1e4] ss:$16 sps:$4 sm:$0xff]   ;;  %v5644_v39 = vld [vmem:[#allocation7 + $0x1ec] ss:$16 sps:$4 sm:$0xff]  }
 0x36e   :  { %1841 = vmatprep.subr.bf16.mxu0 %v5644_v39 }
 0x36f   :  { %6079 = vpow2.f32 %v4788_v42  ;;  %v5642_v42 = vld [vmem:[#allocation7 + $0x1e8] ss:$16 sps:$4 sm:$0xff]  }
 0x371   :  { %1842 = vmatpush1.bf16.msra.mxu0 %v5642_v42 }
 0x377   :  { %v6078_v43 = vpop.eup %6077 }
 0x378   :  { %v1189_v44 = vadd.f32 1.0, %v6078_v43 }
 0x379   :  { %v6080_v48 = vpop.eup %6079 }
 0x37a   :  { %v1190_v50 = vadd.f32 1.0, %v6080_v48  ;;  %6081 = vrcp.f32 %v1189_v44  ;;  %v6521_v44 = vld [vmem:[%s6903_s6] ss:$0 sm:$0xff] }
 0x37c   :  { %6083 = vrcp.f32 %v1190_v50 }
 0x384   :  { %v6082_v51 = vpop.eup %6081 }
 0x386   :  { %v6084_v52 = vpop.eup %6083 }
 0x387   :  { %v1201_v58 = vpack.c.bf16 %v6084_v52, %v6082_v51 }
 0x389   :  { %1364 = vmatmul.mubr.bf16.vlgmr.msra.gmra.mrb[8].mxu1 %v1201_v58 }
 0x38a   :  { %1769 = vmatpush1.bf16.msra.mxu1 %v5579_v55 }
 0x38b   :  { %1770 = vmatprep.subr.bf16.mxu1 %v5584_v0 }
 0x38e   :  { %1771 = vmatpush1.bf16.msra.mxu1 %v5582_v1 }
 0x38f   :  { %1772 = vmatprep.subr.bf16.mxu1 %v5587_v3 }
 0x392   :  { %1773 = vmatpush1.bf16.msra.mxu1 %v5585_v6 }
 0x393   :  { %1774 = vmatprep.subr.bf16.mxu1 %v5590_v7 }
 0x396   :  { %1775 = vmatpush1.bf16.msra.mxu1 %v5588_v8 }
 0x397   :  { %1776 = vmatprep.subr.bf16.mxu1 %v5593_v9 }
 0x39a   :  { %1777 = vmatpush1.bf16.msra.mxu1 %v5591_v10 }
 0x39b   :  { %1778 = vmatprep.subr.bf16.mxu1 %v5596_v11 }
 0x39e   :  { %1779 = vmatpush1.bf16.msra.mxu1 %v5594_v12 }
 0x39f   :  { %1780 = vmatprep.subr.bf16.mxu1 %v5599_v13 }
 0x3a2   :  { %1781 = vmatpush1.bf16.msra.mxu1 %v5597_v14 }
 0x3a3   :  { %1782 = vmatprep.subr.bf16.mxu1 %v5602_v15 }
 0x3a6   :  { %1783 = vmatpush1.bf16.msra.mxu1 %v5600_v16 }
 0x3a7   :  { %1784 = vmatprep.subr.bf16.mxu1 %v5605_v17 }
 0x3aa   :  { %1785 = vmatpush1.bf16.msra.mxu1 %v5603_v18 }
 0x3ab   :  { %1786 = vmatprep.subr.bf16.mxu1 %v5608_v19 }
 0x3ae   :  { %1787 = vmatpush1.bf16.msra.mxu1 %v5606_v20 }
 0x3af   :  { %1788 = vmatprep.subr.bf16.mxu1 %v5611_v21 }
 0x3b2   :  { %1789 = vmatpush1.bf16.msra.mxu1 %v5609_v22 }
 0x3b3   :  { %1790 = vmatprep.subr.bf16.mxu1 %v5617_v23 }
 0x3b6   :  { %1791 = vmatpush1.bf16.msra.mxu1 %v5615_v24 }
 0x3b7   :  { %1792 = vmatprep.subr.bf16.mxu1 %v5623_v25 }
 0x3ba   :  { %1793 = vmatpush1.bf16.msra.mxu1 %v5621_v27 }
 0x3bb   :  { %1794 = vmatprep.subr.bf16.mxu1 %v5629_v29 }
 0x3be   :  { %1795 = vmatpush1.bf16.msra.mxu1 %v5627_v31 }
 0x3bf   :  { %1796 = vmatprep.subr.bf16.mxu1 %v5635_v34 }
 0x3c2   :  { %1797 = vmatpush1.bf16.msra.mxu1 %v5633_v36 }
 0x3c3   :  { %1798 = vmatprep.subr.bf16.mxu1 %v5641_v38 }
 0x3c6   :  { %1799 = vmatpush1.bf16.msra.mxu1 %v5639_v41 }
 0x45c   :  { %v5202_v43 = vpop.f32.mrb[8].mxu1 }
 0x45d   :  { %v5203_v48 = vpop.f32.mrb[9].mxu1 }
 0x45e   :  { %v5204_v50 = vadd.f32 %v5203_v48, %v5202_v43  ;;  %v5205_v51 = vpop.f32.mrb[10].mxu1 }
 0x45f   :  { %v5206_v52 = vpop.f32.mrb[11].mxu1 }
 0x460   :  { %v1366_v55 = vadd.f32 %v5204_v50, %v6521_v44  ;;  %v5207_v58 = vadd.f32 %v5206_v52, %v5205_v51 }
 0x462   :  { %v1372_v0 = vmax.f32 %v1366_v55, 0.0  ;;  %v1369_v1 = vadd.f32 %v5207_v58, %v6521_v44  ;;  %v5645_v55 = vld [vmem:[#allocation9] ss:$8 sps:$4 sm:$0xff]   ;;  %v5647_v58 = vld [vmem:[#allocation9 + $0x4] ss:$8 sps:$4 sm:$0xff]  }
 0x463   :  { %2312 = vmatprep.subr.bf16.mxu1 %v5647_v58 }
 0x464   :  { %v1376_v3 = vmul.f32 0.0078125, %v1372_v0  ;;  %v1373_v6 = vmax.f32 %v1369_v1, 0.0  ;;  %v5650_v1 = vld [vmem:[#allocation9 + $0x14] ss:$8 sps:$4 sm:$0xff]  }
 0x466   :  { %v1377_v7 = vmul.f32 0.0078125, %v1373_v6  ;;  %v2533_v8 = vpack.c.bf16 %v1373_v6, %v1372_v0  ;;  %v1378_v9 = vmul.f32 %v1376_v3, %v6486_v54  ;;  %v1379_v11 = vmul.f32 %v1376_v3, %v6491_v57  ;;  %v5648_v0 = vld [vmem:[#allocation9 + $0x10] ss:$8 sps:$4 sm:$0xff]   ;;  %v5653_v3 = vld [vmem:[#allocation9 + $0x24] ss:$8 sps:$4 sm:$0xff]  }
 0x467   :  { %v5651_v6 = vld [vmem:[#allocation9 + $0x20] ss:$8 sps:$4 sm:$0xff]  }
 0x468   :  { %v1380_v10 = vmul.f32 %v1377_v7, %v6496_v60  ;;  %v1381_v12 = vmul.f32 %v1377_v7, %v6505_v5  ;;  %v5656_v7 = vld [vmem:[#allocation9 + $0x34] ss:$8 sps:$4 sm:$0xff]  }
 0x46a   :  { %v1383_v13 = vpack.c.bf16 %v1381_v12, %v1379_v11  ;;  %v1382_v14 = vpack.c.bf16 %v1380_v10, %v1378_v9  ;;  %v5659_v9 = vld [vmem:[#allocation9 + $0x44] ss:$8 sps:$4 sm:$0xff]   ;;  %v5657_v10 = vld [vmem:[#allocation9 + $0x40] ss:$8 sps:$4 sm:$0xff]   ;;  %v5662_v11 = vld [vmem:[#allocation9 + $0x54] ss:$8 sps:$4 sm:$0xff]  }
 0x46b   :  { %v5660_v12 = vld [vmem:[#allocation9 + $0x50] ss:$8 sps:$4 sm:$0xff]  }
 0x46c   :  { %1800 = vmatprep.mubr.bf16.mxu1 %v1383_v13  ;;  %1843 = vmatprep.mubr.bf16.mxu0 %v1383_v13  ;;  %v5665_v13 = vld [vmem:[#allocation9 + $0x64] ss:$8 sps:$4 sm:$0xff]  }
 0x46d   :  { %1801 = vmatmul.mubr.bf16.vlgmr.msra.gmra.mrb[12].mxu1 %v1382_v14  ;;  %1844 = vmatmul.mubr.bf16.vlgmr.msra.gmra.mrb[8].mxu0 %v1382_v14  ;;  %v5663_v14 = vld [vmem:[#allocation9 + $0x60] ss:$8 sps:$4 sm:$0xff]  }
 0x46e   :  { %2694 = vmatprep.mubr.bf16.mxu0 %v2533_v8  ;;  %2313 = vmatpush1.bf16.msra.mxu1 %v5645_v55  ;;  %v5654_v8 = vld [vmem:[#allocation9 + $0x30] ss:$8 sps:$4 sm:$0xff]  }
 0x46f   :  { %2314 = vmatprep.subr.bf16.mxu1 %v5650_v1 }
 0x472   :  { %2315 = vmatpush1.bf16.msra.mxu1 %v5648_v0 }
 0x473   :  { %2316 = vmatprep.subr.bf16.mxu1 %v5653_v3 }
 0x476   :  { %2317 = vmatpush1.bf16.msra.mxu1 %v5651_v6 }
 0x477   :  { %2318 = vmatprep.subr.bf16.mxu1 %v5656_v7 }
 0x47a   :  { %2319 = vmatpush1.bf16.msra.mxu1 %v5654_v8 }
 0x47b   :  { %2320 = vmatprep.subr.bf16.mxu1 %v5659_v9 }
 0x47e   :  { %2321 = vmatpush1.bf16.msra.mxu1 %v5657_v10 }
 0x47f   :  { %2322 = vmatprep.subr.bf16.mxu1 %v5662_v11 }
 0x482   :  { %2323 = vmatpush1.bf16.msra.mxu1 %v5660_v12  ;;  %v5698_v12 = vld [vmem:[#allocation9 + $0x114] ss:$8 sps:$4 sm:$0xff]  }
 0x483   :  { %2324 = vmatprep.subr.bf16.mxu1 %v5665_v13  ;;  %v5704_v13 = vld [vmem:[#allocation9 + $0x134] ss:$8 sps:$4 sm:$0xff]  }
 0x486   :  { %2325 = vmatpush1.bf16.msra.mxu1 %v5663_v14  ;;  %v5702_v14 = vld [vmem:[#allocation9 + $0x130] ss:$8 sps:$4 sm:$0xff]  }
 0x540   :  { %v1802_v15 = vpop.f32.mrb[12].mxu1  ;;  %v1845_v16 = vpop.f32.mrb[8].mxu0 }
 0x541   :  { %v6530_v17 = vadd.f32 %v1802_v15, %v6455_v45  ;;  %v6533_v54 = vadd.f32 %v1845_v16, %v6467_v61  ;;  %v1804_v60 = vpop.f32.mrb[13].mxu1  ;;  %v1847_v18 = vpop.f32.mrb[9].mxu0  ;;  %v5668_v15 = vld [vmem:[#allocation9 + $0x74] ss:$8 sps:$4 sm:$0xff]   ;;  %v5666_v16 = vld [vmem:[#allocation9 + $0x70] ss:$8 sps:$4 sm:$0xff]  }
 0x542   :  { %v6536_v57 = vadd.f32 %v1804_v60, %v6457_v46  ;;  %v6539_v5 = vadd.f32 %v1847_v18, %v6469_v62  ;;  %v1806_v19 = vpop.f32.mrb[14].mxu1  ;;  %v1849_v20 = vpop.f32.mrb[10].mxu0  ;;  %2326 = vmatprep.subr.bf16.mxu1 %v5668_v15  ;;  %v5671_v60 = vld [vmem:[#allocation9 + $0x84] ss:$8 sps:$4 sm:$0xff]   ;;  %v5669_v18 = vld [vmem:[#allocation9 + $0x80] ss:$8 sps:$4 sm:$0xff]  }
 0x543   :  { %v1862_v21 = vmul.f32 %v6530_v17, %v6530_v17  ;;  %v1866_v45 = vmul.f32 %v6533_v54, %v6533_v54  ;;  %v6546_v22 = vadd.f32 %v1806_v19, %v6459_v47  ;;  %v6549_v61 = vadd.f32 %v1849_v20, %v6471_v63  ;;  %v1808_v23 = vpop.f32.mrb[15].mxu1  ;;  %v1851_v46 = vpop.f32.mrb[11].mxu0  ;;  %2327 = vmatpush1.bf16.msra.mxu1 %v5666_v16  ;;  %v5674_v19 = vld [vmem:[#allocation9 + $0x94] ss:$8 sps:$4 sm:$0xff]   ;;  %v5672_v20 = vld [vmem:[#allocation9 + $0x90] ss:$8 sps:$4 sm:$0xff]  }
 0x544   :  { %v1863_v62 = vmul.f32 %v6536_v57, %v6536_v57  ;;  %v1867_v24 = vmul.f32 %v6539_v5, %v6539_v5  ;;  %v6556_v25 = vadd.f32 %v1808_v23, %v6463_v49  ;;  %v6559_v26 = vadd.f32 %v1851_v46, %v6475_v2  ;;  %2328 = vmatprep.subr.bf16.mxu1 %v5671_v60  ;;  %v5680_v23 = vld [vmem:[#allocation9 + $0xb4] ss:$8 sps:$4 sm:$0xff]   ;;  %v5678_v46 = vld [vmem:[#allocation9 + $0xb0] ss:$8 sps:$4 sm:$0xff]   ;;  %v5707_v15 = vld [vmem:[#allocation9 + $0x144] ss:$8 sps:$4 sm:$0xff]  }
 0x545   :  { %v1870_v27 = vadd.f32 %v1866_v45, %v1862_v21  ;;  %v1864_v47 = vmul.f32 %v6546_v22, %v6546_v22  ;;  %v1868_v63 = vmul.f32 %v6549_v61, %v6549_v61  ;;  %v5677_v21 = vld [vmem:[#allocation9 + $0xa4] ss:$8 sps:$4 sm:$0xff]   ;;  %v5675_v45 = vld [vmem:[#allocation9 + $0xa0] ss:$8 sps:$4 sm:$0xff]   ;;  %v5710_v60 = vld [vmem:[#allocation9 + $0x154] ss:$8 sps:$4 sm:$0xff]  }
 0x546   :  { %v1871_v28 = vadd.f32 %v1867_v24, %v1863_v62  ;;  %v1865_v29 = vmul.f32 %v6556_v25, %v6556_v25  ;;  %v1869_v30 = vmul.f32 %v6559_v26, %v6559_v26  ;;  %v5683_v62 = vld [vmem:[#allocation9 + $0xc4] ss:$8 sps:$4 sm:$0xff]   ;;  %v5681_v24 = vld [vmem:[#allocation9 + $0xc0] ss:$8 sps:$4 sm:$0xff]  }
 0x547   :  { %vm1874_vm1 = vcmp.gt.f32.partialorder %v1870_v27, 0.0  ;;  %v1872_v49 = vadd.f32 %v1868_v63, %v1864_v47  ;;  %2329 = vmatpush1.bf16.msra.mxu1 %v5669_v18  ;;  %v5684_v47 = vld [vmem:[#allocation9 + $0xd0] ss:$8 sps:$4 sm:$0xff]   ;;  %v5689_v63 = vld [vmem:[#allocation9 + $0xe4] ss:$8 sps:$4 sm:$0xff]  }
 0x548   :  { %v1878_v31 = vsel %vm1874_vm1, %v1870_v27, 1.0  ;;  %vm1875_vm2 = vcmp.gt.f32.partialorder %v1871_v28, 0.0  ;;  %v1873_v2 = vadd.f32 %v1869_v30, %v1865_v29  ;;  %2330 = vmatprep.subr.bf16.mxu1 %v5674_v19  ;;  %v5690_v29 = vld [vmem:[#allocation9 + $0xf0] ss:$8 sps:$4 sm:$0xff]   ;;  %v5692_v30 = vld [vmem:[#allocation9 + $0xf4] ss:$8 sps:$4 sm:$0xff]  }
 0x549   :  { %6085 = vrsqrt.f32 %v1878_v31  ;;  %v1879_v32 = vsel %vm1875_vm2, %v1871_v28, 1.0  ;;  %vm1876_vm3 = vcmp.gt.f32.partialorder %v1872_v49, 0.0  ;;  %v5705_v16 = vld [vmem:[#allocation9 + $0x140] ss:$8 sps:$4 sm:$0xff]   ;;  %v5708_v18 = vld [vmem:[#allocation9 + $0x150] ss:$8 sps:$4 sm:$0xff]  }
 0x54a   :  { %6087 = vrsqrt.f32 %v1879_v32  ;;  %v1880_v34 = vsel %vm1876_vm3, %v1872_v49, 1.0  ;;  %vm1877_vm4 = vcmp.gt.f32.partialorder %v1873_v2, 0.0  ;;  %v5713_v19 = vld [vmem:[#allocation9 + $0x164] ss:$8 sps:$4 sm:$0xff]  }
 0x54b   :  { %6089 = vrsqrt.f32 %v1880_v34  ;;  %v1881_v35 = vsel %vm1877_vm4, %v1873_v2, 1.0  ;;  %2331 = vmatpush1.bf16.msra.mxu1 %v5672_v20  ;;  %v5711_v20 = vld [vmem:[#allocation9 + $0x160] ss:$8 sps:$4 sm:$0xff]  }
 0x54c   :  { %6091 = vrsqrt.f32 %v1881_v35  ;;  %2332 = vmatprep.subr.bf16.mxu1 %v5677_v21  ;;  %v5716_v21 = vld [vmem:[#allocation9 + $0x174] ss:$8 sps:$4 sm:$0xff]  }
 0x54f   :  { %2333 = vmatpush1.bf16.msra.mxu1 %v5675_v45  ;;  %v5714_v45 = vld [vmem:[#allocation9 + $0x170] ss:$8 sps:$4 sm:$0xff]  }
 0x550   :  { %2334 = vmatprep.subr.bf16.mxu1 %v5680_v23  ;;  %v5719_v23 = vld [vmem:[#allocation9 + $0x184] ss:$8 sps:$4 sm:$0xff]  }
 0x553   :  { %v6569_v36 = vpop.eup %6085  ;;  %2335 = vmatpush1.bf16.msra.mxu1 %v5678_v46  ;;  %v5717_v46 = vld [vmem:[#allocation9 + $0x180] ss:$8 sps:$4 sm:$0xff]  }
 0x554   :  { %v6571_v37 = vpop.eup %6087  ;;  %v6576_v39 = vmul.f32 %v6569_v36, %v1870_v27  ;;  %2336 = vmatprep.subr.bf16.mxu1 %v5683_v62  ;;  %v5686_v27 = vld [vmem:[#allocation9 + $0xd4] ss:$8 sps:$4 sm:$0xff]  }
 0x555   :  { %v6573_v38 = vpop.eup %6089  ;;  %v6579_v41 = vmul.f32 %v6571_v37, %v1871_v28  ;;  %v5687_v28 = vld [vmem:[#allocation9 + $0xe0] ss:$8 sps:$4 sm:$0xff]   ;;  %v5722_v62 = vld [vmem:[#allocation9 + $0x194] ss:$8 sps:$4 sm:$0xff]  }
 0x556   :  { %v6581_v42 = vpop.eup %6091  ;;  %v6584_v43 = vmul.f32 %v6573_v38, %v1872_v49  ;;  %v5695_v49 = vld [vmem:[#allocation9 + $0x104] ss:$8 sps:$4 sm:$0xff]  }
 0x557   :  { %v6587_v48 = vmul.f32 %v6581_v42, %v1873_v2  ;;  %v1890_v50 = vmax.f32 %v6576_v39, %v6579_v41  ;;  %2337 = vmatpush1.bf16.msra.mxu1 %v5681_v24  ;;  %v5720_v24 = vld [vmem:[#allocation9 + $0x190] ss:$8 sps:$4 sm:$0xff]  }
 0x558   :  { %2338 = vmatprep.subr.bf16.mxu1 %v5686_v27  ;;  %v5725_v27 = vld [vmem:[#allocation9 + $0x1a4] ss:$8 sps:$4 sm:$0xff]  }
 0x559   :  { %v1891_v51 = vmax.f32 %v6584_v43, %v6587_v48 }
 0x55b   :  { %v1892_v52 = vmax.f32 %v1890_v50, %v1891_v51  ;;  %2339 = vmatpush1.bf16.msra.mxu1 %v5684_v47  ;;  %v5723_v47 = vld [vmem:[#allocation9 + $0x1a0] ss:$8 sps:$4 sm:$0xff]  }
 0x55c   :  { %2340 = vmatprep.subr.bf16.mxu1 %v5689_v63  ;;  %v5728_v63 = vld [vmem:[#allocation9 + $0x1b4] ss:$8 sps:$4 sm:$0xff]  }
 0x55d   :  { %1893 = vmax.xlane.f32.xlu0 %v1892_v52 }
 0x55f   :  { %2341 = vmatpush1.bf16.msra.mxu1 %v5687_v28  ;;  %v5726_v28 = vld [vmem:[#allocation9 + $0x1b0] ss:$8 sps:$4 sm:$0xff]  }
 0x560   :  { %2342 = vmatprep.subr.bf16.mxu1 %v5692_v30  ;;  %v5729_v30 = vld [vmem:[#allocation9 + $0x1c0] ss:$8 sps:$4 sm:$0xff]  }
 0x563   :  { %2343 = vmatpush1.bf16.msra.mxu1 %v5690_v29  ;;  %v5731_v29 = vld [vmem:[#allocation9 + $0x1c4] ss:$8 sps:$4 sm:$0xff]  }
 0x564   :  { %2355 = vmatprep.subr.bf16.mxu1 %v5695_v49  ;;  %v5734_v49 = vld [vmem:[#allocation9 + $0x1d4] ss:$8 sps:$4 sm:$0xff]  }
 0x5ea   :  { %v1894_v31 = vpop.xlane.xlu0 %1893 }
 0x5eb   :  { %v1895_v2 = vrot.slane %v1894_v31, 4 }
 0x5ed   :  { %v1896_v32 = vmax.f32 %v1894_v31, %v1895_v2  ;;  %v5732_v31 = vld [vmem:[#allocation9 + $0x1d0] ss:$8 sps:$4 sm:$0xff]   ;;  %v5737_v2 = vld [vmem:[#allocation9 + $0x1e4] ss:$8 sps:$4 sm:$0xff]  }
 0x5ef   :  { %v1897_v34 = vrot.slane %v1896_v32, 2 }
 0x5f1   :  { %v1898_v35 = vmax.f32 %v1896_v32, %v1897_v34  ;;  %v5735_v32 = vld [vmem:[#allocation9 + $0x1e0] ss:$8 sps:$4 sm:$0xff]   ;;  %v5740_v34 = vld [vmem:[#allocation9 + $0x1f4] ss:$8 sps:$4 sm:$0xff]  }
 0x5f3   :  { %v1899_v50 = vrot.slane %v1898_v35, 1 }
 0x5f5   :  { %v1900_v51 = vmax.f32 %v1898_v35, %v1899_v50  ;;  %v5738_v35 = vld [vmem:[#allocation9 + $0x1f0] ss:$8 sps:$4 sm:$0xff]  }
 0x5f7   :  { %5342 = vpush %v1900_v51 }
 0x628   :  { %s5343_s29 = spop %5342 }
 0x629   :  { %s1902_s11 = smul.f32 %s5343_s29, %s6904_s7 }
 0x62b   :  { %v1903_v52 = vstv %s1902_s11 }
 0x62c   :  { %v1904_v55 = vsub.f32 %v6576_v39, %v1903_v52  ;;  %v1905_v58 = vsub.f32 %v6579_v41, %v1903_v52  ;;  %v1906_v0 = vsub.f32 %v6584_v43, %v1903_v52  ;;  %v1907_v1 = vsub.f32 %v6587_v48, %v1903_v52  ;;  %v5741_v52 = vld [vmem:[#allocation10] sm:$0xff]  }
 0x62e   :  { %v1908_v3 = vmax.f32 %v1904_v55, 0.0  ;;  %v1909_v6 = vmax.f32 %v1905_v58, 0.0  ;;  %v1910_v7 = vmax.f32 %v1906_v0, 0.0  ;;  %v1911_v8 = vmax.f32 %v1907_v1, 0.0  ;;  %v5742_v58 = vld [vmem:[#allocation10 + $0x8] sm:$0xff]   ;;  %v5745_v0 = vld [vmem:[#allocation10 + $0x20] sm:$0xff]  }
 0x62f   :  { %v5746_v1 = vld [vmem:[#allocation10 + $0x28] sm:$0xff]  }
 0x630   :  { %v6601_v9 = vmul.f32 %v6569_v36, %v1908_v3  ;;  %v1913_v10 = vmul.f32 %v6571_v37, %v1909_v6  ;;  %v6605_v11 = vmul.f32 %v6573_v38, %v1910_v7  ;;  %v1915_v39 = vmul.f32 %v6581_v42, %v1911_v8  ;;  %v5693_v42 = vld [vmem:[#allocation9 + $0x100] ss:$8 sps:$4 sm:$0xff]   ;;  %v5747_v3 = vld [vmem:[#allocation10 + $0x30] sm:$0xff]   ;;  %v5748_v6 = vld [vmem:[#allocation10 + $0x38] sm:$0xff]  }
 0x632   :  { %v6609_v41 = vmul.f32 %v1913_v10, %v6536_v57  ;;  %v6612_v43 = vmul.f32 %v1915_v39, %v6556_v25  ;;  %v6616_v48 = vmul.f32 %v6601_v9, %v6530_v17  ;;  %v6620_v36 = vmul.f32 %v6605_v11, %v6546_v22  ;;  %v5701_v22 = vld [vmem:[#allocation9 + $0x124] ss:$8 sps:$4 sm:$0xff]  }
 0x633   :  { %v6623_v37 = vmul.f32 %v1913_v10, %v6539_v5  ;;  %v6626_v38 = vmul.f32 %v1915_v39, %v6559_v26  ;;  %v5696_v5 = vld [vmem:[#allocation9 + $0x110] ss:$8 sps:$4 sm:$0xff]   ;;  %v5699_v26 = vld [vmem:[#allocation9 + $0x120] ss:$8 sps:$4 sm:$0xff]   ;;  %v6636_v50 = vmul.f32 %v6601_v9, %v6533_v54  ;;  %v6640_v51 = vmul.f32 %v6605_v11, %v6549_v61 }
 0x634   :  { %v1925_v57 = vpack.c.bf16 %v6612_v43, %v6609_v41  ;;  %v1924_v25 = vpack.c.bf16 %v6620_v36, %v6616_v48  ;;  %v5743_v54 = vld [vmem:[#allocation10 + $0x10] sm:$0xff]   ;;  %v5744_v61 = vld [vmem:[#allocation10 + $0x18] sm:$0xff]  }
 0x635   :  { %v1927_v17 = vpack.c.bf16 %v6626_v38, %v6623_v37  ;;  %v1926_v55 = vpack.c.bf16 %v6640_v51, %v6636_v50 }
 0x636   :  { %2344 = vmatprep.mubr.bf16.mxu1 %v1925_v57 }
 0x637   :  { %2345 = vmatmul.mubr.bf16.vlgmr.msra.gmra.mrb[16].mxu1 %v1924_v25 }
 0x638   :  { %2356 = vmatpush1.bf16.msra.mxu1 %v5693_v42  ;;  %2387 = vmatprep.mubr.bf16.mxu1 %v1927_v17 }
 0x639   :  { %2357 = vmatprep.subr.bf16.mxu1 %v5698_v12 }
 0x63c   :  { %2358 = vmatpush1.bf16.msra.mxu1 %v5696_v5 }
 0x63d   :  { %2359 = vmatprep.subr.bf16.mxu1 %v5701_v22  ;;  %v5749_v22 = vld [vmem:[#allocation12 + $0x40] sm:$0xff]  }
 0x63e   :  { %5217 = vmatprep.subr.bf16.mxu0 %v5749_v22 }
 0x640   :  { %2360 = vmatpush1.bf16.msra.mxu1 %v5699_v26  ;;  %v5750_v26 = vld [vmem:[#allocation12] sm:$0xff]  }
 0x641   :  { %2361 = vmatprep.subr.bf16.mxu1 %v5704_v13  ;;  %5218 = vmatpush3.bf16.msra.mxu0 %v5750_v26  ;;  %v5751_v13 = vld [vmem:[#allocation12 + $0x48] sm:$0xff]  }
 0x642   :  { %5219 = vmatprep.subr.bf16.mxu0 %v5751_v13 }
 0x644   :  { %2362 = vmatpush1.bf16.msra.mxu1 %v5702_v14  ;;  %v5752_v14 = vld [vmem:[#allocation12 + $0x8] sm:$0xff]  }
 0x645   :  { %2363 = vmatprep.subr.bf16.mxu1 %v5707_v15  ;;  %5220 = vmatpush3.bf16.msra.mxu0 %v5752_v14  ;;  %v5754_v15 = vld [vmem:[#allocation12 + $0x10] sm:$0xff]  }
 0x648   :  { %2364 = vmatpush1.bf16.msra.mxu1 %v5705_v16  ;;  %v5755_v16 = vld [vmem:[#allocation12 + $0x58] sm:$0xff]  }
 0x649   :  { %2365 = vmatprep.subr.bf16.mxu1 %v5710_v60  ;;  %v5756_v60 = vld [vmem:[#allocation12 + $0x18] sm:$0xff]  }
 0x64c   :  { %2366 = vmatpush1.bf16.msra.mxu1 %v5708_v18  ;;  %v5757_v18 = vld [vmem:[#allocation12 + $0x60] sm:$0xff]  }
 0x64d   :  { %2367 = vmatprep.subr.bf16.mxu1 %v5713_v19  ;;  %v5758_v19 = vld [vmem:[#allocation12 + $0x20] sm:$0xff]  }
 0x650   :  { %2368 = vmatpush1.bf16.msra.mxu1 %v5711_v20  ;;  %v5759_v20 = vld [vmem:[#allocation12 + $0x68] sm:$0xff]  }
 0x651   :  { %2369 = vmatprep.subr.bf16.mxu1 %v5716_v21  ;;  %v5760_v21 = vld [vmem:[#allocation12 + $0x28] sm:$0xff]  }
 0x654   :  { %2370 = vmatpush1.bf16.msra.mxu1 %v5714_v45  ;;  %v5761_v45 = vld [vmem:[#allocation12 + $0x70] sm:$0xff]  }
 0x655   :  { %2371 = vmatprep.subr.bf16.mxu1 %v5719_v23  ;;  %v5762_v23 = vld [vmem:[#allocation12 + $0x30] sm:$0xff]  }
 0x658   :  { %2372 = vmatpush1.bf16.msra.mxu1 %v5717_v46  ;;  %v5763_v46 = vld [vmem:[#allocation12 + $0x78] sm:$0xff]  }
 0x659   :  { %2373 = vmatprep.subr.bf16.mxu1 %v5722_v62  ;;  %v5764_v62 = vld [vmem:[#allocation12 + $0x38] sm:$0xff]  }
 0x65c   :  { %2374 = vmatpush1.bf16.msra.mxu1 %v5720_v24  ;;  %v5767_v24 = vld [vmem:[#allocation7 + $0x4] ss:$16 sps:$4 sm:$0xff]  }
 0x65d   :  { %2375 = vmatprep.subr.bf16.mxu1 %v5725_v27  ;;  %v5768_v27 = vld [vmem:[#allocation7 + $0x8] ss:$16 sps:$4 sm:$0xff]  }
 0x660   :  { %2376 = vmatpush1.bf16.msra.mxu1 %v5723_v47  ;;  %v5770_v47 = vld [vmem:[#allocation7 + $0xc] ss:$16 sps:$4 sm:$0xff]  }
 0x661   :  { %2377 = vmatprep.subr.bf16.mxu1 %v5728_v63  ;;  %v5776_v63 = vld [vmem:[#allocation7 + $0x2c] ss:$16 sps:$4 sm:$0xff]  }
 0x664   :  { %2378 = vmatpush1.bf16.msra.mxu1 %v5726_v28  ;;  %v5774_v28 = vld [vmem:[#allocation7 + $0x28] ss:$16 sps:$4 sm:$0xff]  }
 0x665   :  { %2379 = vmatprep.subr.bf16.mxu1 %v5731_v29  ;;  %v5782_v29 = vld [vmem:[#allocation7 + $0x4c] ss:$16 sps:$4 sm:$0xff]  }
 0x668   :  { %2380 = vmatpush1.bf16.msra.mxu1 %v5729_v30  ;;  %v5780_v30 = vld [vmem:[#allocation7 + $0x48] ss:$16 sps:$4 sm:$0xff]  }
 0x669   :  { %2381 = vmatprep.subr.bf16.mxu1 %v5734_v49  ;;  %v5788_v49 = vld [vmem:[#allocation7 + $0x6c] ss:$16 sps:$4 sm:$0xff]  }
 0x66c   :  { %2382 = vmatpush1.bf16.msra.mxu1 %v5732_v31  ;;  %v5786_v31 = vld [vmem:[#allocation7 + $0x68] ss:$16 sps:$4 sm:$0xff]  }
 0x66d   :  { %2383 = vmatprep.subr.bf16.mxu1 %v5737_v2  ;;  %v5794_v2 = vld [vmem:[#allocation7 + $0x8c] ss:$16 sps:$4 sm:$0xff]  }
 0x670   :  { %2384 = vmatpush1.bf16.msra.mxu1 %v5735_v32  ;;  %v5792_v32 = vld [vmem:[#allocation7 + $0x88] ss:$16 sps:$4 sm:$0xff]  }
 0x671   :  { %2385 = vmatprep.subr.bf16.mxu1 %v5740_v34  ;;  %v5800_v34 = vld [vmem:[#allocation7 + $0xac] ss:$16 sps:$4 sm:$0xff]  }
 0x674   :  { %2386 = vmatpush1.bf16.msra.mxu1 %v5738_v35  ;;  %v5798_v35 = vld [vmem:[#allocation7 + $0xa8] ss:$16 sps:$4 sm:$0xff]  }
 0x675   :  { %5290 = vmatprep.subr.bf16.mxu1 %v6314_v40 }
 0x677   :  { %2388 = vmatmul.mubr.bf16.vlgmr.msra.gmra.mrb[16].mxu1 %v1926_v55  ;;  %v5804_v55 = vld [vmem:[#allocation7 + $0xc8] ss:$16 sps:$4 sm:$0xff]  }
 0x678   :  { %5291 = vmatpush3.bf16.msra.mxu1 %v5741_v52  ;;  %5306 = vmatprep.mubr.msk.bf16.mxu1 %vm6315_vm0, %v6314_v40  ;;  %v5806_v52 = vld [vmem:[#allocation7 + $0xcc] ss:$16 sps:$4 sm:$0xff]  }
 0x679   :  { %5292 = vmatprep.subr.bf16.mxu1 %v6314_v40 }
 0x67c   :  { %5293 = vmatpush3.bf16.msra.mxu1 %v5742_v58  ;;  %v5812_v58 = vld [vmem:[#allocation7 + $0xec] ss:$16 sps:$4 sm:$0xff]  }
 0x67d   :  { %5294 = vmatprep.subr.bf16.mxu1 %v6314_v40 }
 0x680   :  { %5295 = vmatpush3.bf16.msra.mxu1 %v5743_v54  ;;  %v5810_v54 = vld [vmem:[#allocation7 + $0xe8] ss:$16 sps:$4 sm:$0xff]  }
 0x681   :  { %5296 = vmatprep.subr.bf16.mxu1 %v6314_v40 }
 0x684   :  { %5297 = vmatpush3.bf16.msra.mxu1 %v5744_v61  ;;  %v5818_v61 = vld [vmem:[#allocation7 + $0x10c] ss:$16 sps:$4 sm:$0xff]  }
 0x685   :  { %5298 = vmatprep.subr.bf16.mxu1 %v6314_v40 }
 0x688   :  { %5299 = vmatpush3.bf16.msra.mxu1 %v5745_v0  ;;  %v5816_v0 = vld [vmem:[#allocation7 + $0x108] ss:$16 sps:$4 sm:$0xff]  }
 0x689   :  { %5300 = vmatprep.subr.bf16.mxu1 %v6314_v40 }
 0x68c   :  { %5301 = vmatpush3.bf16.msra.mxu1 %v5746_v1  ;;  %v5824_v1 = vld [vmem:[#allocation7 + $0x12c] ss:$16 sps:$4 sm:$0xff]  }
 0x68d   :  { %5302 = vmatprep.subr.bf16.mxu1 %v6314_v40 }
 0x690   :  { %5303 = vmatpush3.bf16.msra.mxu1 %v5747_v3  ;;  %v5822_v3 = vld [vmem:[#allocation7 + $0x128] ss:$16 sps:$4 sm:$0xff]  }
 0x691   :  { %5304 = vmatprep.subr.bf16.mxu1 %v6314_v40 }
 0x694   :  { %5305 = vmatpush3.bf16.msra.mxu1 %v5748_v6  ;;  %v5830_v6 = vld [vmem:[#allocation7 + $0x14c] ss:$16 sps:$4 sm:$0xff]  }
 0x695   :  { %3142 = vmatprep.subr.bf16.mxu1 %v5770_v47  ;;  %v5801_v47 = vld [vmem:[#allocation7 + $0xc0] ss:$16 sps:$4 sm:$0xff]  }
 0x74a   :  { %v2389_v7 = vpop.f32.mrb[16].mxu1 }
 0x74b   :  { %v6655_v8 = vsub.f32 %v6483_v53, %v2389_v7  ;;  %v2391_v9 = vpop.f32.mrb[17].mxu1  ;;  %v5828_v7 = vld [vmem:[#allocation7 + $0x148] ss:$16 sps:$4 sm:$0xff]  }
 0x74c   :  { %v6658_v10 = vsub.f32 %v6488_v56, %v2391_v9  ;;  %v2393_v11 = vpop.f32.mrb[18].mxu1  ;;  %v5836_v9 = vld [vmem:[#allocation7 + $0x16c] ss:$16 sps:$4 sm:$0xff]  }
 0x74d   :  { %v6661_v39 = vsub.f32 %v6493_v59, %v2393_v11  ;;  %v2395_v57 = vpop.f32.mrb[19].mxu1  ;;  %v2402_v42 = vmul.f32 %v6655_v8, %v6655_v8  ;;  %v5834_v11 = vld [vmem:[#allocation7 + $0x168] ss:$16 sps:$4 sm:$0xff]  }
 0x74e   :  { %v2404_v25 = vmul.f32 %v6658_v10, %v6658_v10  ;;  %v6668_v12 = vsub.f32 %v6502_v4, %v2395_v57  ;;  %v5753_v4 = vld [vmem:[#allocation12 + $0x50] sm:$0xff]  }
 0x74f   :  { %v2403_v53 = vmul.f32 %v6661_v39, %v6661_v39  ;;  %5221 = vmatprep.subr.bf16.mxu0 %v5753_v4 }
 0x750   :  { %v2405_v56 = vmul.f32 %v6668_v12, %v6668_v12  ;;  %v2406_v17 = vadd.f32 %v2404_v25, %v2402_v42  ;;  %5222 = vmatpush3.bf16.msra.mxu0 %v5754_v15 }
 0x751   :  { %5223 = vmatprep.subr.bf16.mxu0 %v5755_v16  ;;  %v5765_v16 = vld [vmem:[#allocation7] ss:$16 sps:$4 sm:$0xff]  }
 0x752   :  { %v2407_v5 = vadd.f32 %v2405_v56, %v2403_v53 }
 0x754   :  { %v2408_v59 = vpack.c.bf16 %v2407_v5, %v2406_v17  ;;  %5224 = vmatpush3.bf16.msra.mxu0 %v5756_v60 }
 0x755   :  { %5225 = vmatprep.subr.bf16.mxu0 %v5757_v18  ;;  %v5773_v18 = vld [vmem:[#allocation7 + $0x24] ss:$16 sps:$4 sm:$0xff]  }
 0x756   :  { %5307 = vmatmul.mubr.bf16.vlgmr.msra.gmra.mrb[20].mxu1 %v2408_v59 }
 0x757   :  { %3143 = vmatpush1.bf16.msra.mxu1 %v5768_v27  ;;  %v5803_v27 = vld [vmem:[#allocation7 + $0xc4] ss:$16 sps:$4 sm:$0xff]  }
 0x758   :  { %5226 = vmatpush3.bf16.msra.mxu0 %v5758_v19  ;;  %3144 = vmatprep.subr.bf16.mxu1 %v5776_v63  ;;  %v5771_v19 = vld [vmem:[#allocation7 + $0x20] ss:$16 sps:$4 sm:$0xff]   ;;  %v5809_v63 = vld [vmem:[#allocation7 + $0xe4] ss:$16 sps:$4 sm:$0xff]  }
 0x759   :  { %5227 = vmatprep.subr.bf16.mxu0 %v5759_v20  ;;  %v5777_v20 = vld [vmem:[#allocation7 + $0x40] ss:$16 sps:$4 sm:$0xff]  }
 0x75b   :  { %3145 = vmatpush1.bf16.msra.mxu1 %v5774_v28  ;;  %v5807_v28 = vld [vmem:[#allocation7 + $0xe0] ss:$16 sps:$4 sm:$0xff]  }
 0x75c   :  { %5228 = vmatpush3.bf16.msra.mxu0 %v5760_v21  ;;  %3146 = vmatprep.subr.bf16.mxu1 %v5782_v29  ;;  %v5785_v21 = vld [vmem:[#allocation7 + $0x64] ss:$16 sps:$4 sm:$0xff]  }
 0x75d   :  { %5229 = vmatprep.subr.bf16.mxu0 %v5761_v45  ;;  %v5783_v45 = vld [vmem:[#allocation7 + $0x60] ss:$16 sps:$4 sm:$0xff]   ;;  %v5815_v29 = vld [vmem:[#allocation7 + $0x104] ss:$16 sps:$4 sm:$0xff]  }
 0x75f   :  { %3147 = vmatpush1.bf16.msra.mxu1 %v5780_v30  ;;  %v5813_v30 = vld [vmem:[#allocation7 + $0x100] ss:$16 sps:$4 sm:$0xff]  }
 0x760   :  { %5230 = vmatpush3.bf16.msra.mxu0 %v5762_v23  ;;  %3148 = vmatprep.subr.bf16.mxu1 %v5788_v49  ;;  %v5791_v23 = vld [vmem:[#allocation7 + $0x84] ss:$16 sps:$4 sm:$0xff]  }
 0x761   :  { %5231 = vmatprep.subr.bf16.mxu0 %v5763_v46  ;;  %v5789_v46 = vld [vmem:[#allocation7 + $0x80] ss:$16 sps:$4 sm:$0xff]   ;;  %v5821_v49 = vld [vmem:[#allocation7 + $0x124] ss:$16 sps:$4 sm:$0xff]  }
 0x763   :  { %3149 = vmatpush1.bf16.msra.mxu1 %v5786_v31  ;;  %v5819_v31 = vld [vmem:[#allocation7 + $0x120] ss:$16 sps:$4 sm:$0xff]  }
 0x764   :  { %5232 = vmatpush3.bf16.msra.mxu0 %v5764_v62  ;;  %3150 = vmatprep.subr.bf16.mxu1 %v5794_v2  ;;  %v5797_v62 = vld [vmem:[#allocation7 + $0xa4] ss:$16 sps:$4 sm:$0xff]  }
 0x765   :  { %3099 = vmatprep.subr.bf16.mxu0 %v5767_v24  ;;  %v5795_v24 = vld [vmem:[#allocation7 + $0xa0] ss:$16 sps:$4 sm:$0xff]   ;;  %v5827_v2 = vld [vmem:[#allocation7 + $0x144] ss:$16 sps:$4 sm:$0xff]  }
 0x767   :  { %3151 = vmatpush1.bf16.msra.mxu1 %v5792_v32  ;;  %v5825_v32 = vld [vmem:[#allocation7 + $0x140] ss:$16 sps:$4 sm:$0xff]  }
 0x768   :  { %3152 = vmatprep.subr.bf16.mxu1 %v5800_v34  ;;  %v5833_v34 = vld [vmem:[#allocation7 + $0x164] ss:$16 sps:$4 sm:$0xff]  }
 0x76b   :  { %3153 = vmatpush1.bf16.msra.mxu1 %v5798_v35  ;;  %v5831_v35 = vld [vmem:[#allocation7 + $0x160] ss:$16 sps:$4 sm:$0xff]  }
 0x76c   :  { %3154 = vmatprep.subr.bf16.mxu1 %v5806_v52  ;;  %v5839_v52 = vld [vmem:[#allocation7 + $0x184] ss:$16 sps:$4 sm:$0xff]  }
 0x76f   :  { %3155 = vmatpush1.bf16.msra.mxu1 %v5804_v55  ;;  %v5842_v55 = vld [vmem:[#allocation7 + $0x18c] ss:$16 sps:$4 sm:$0xff]  }
 0x770   :  { %3156 = vmatprep.subr.bf16.mxu1 %v5812_v58  ;;  %v5837_v58 = vld [vmem:[#allocation7 + $0x180] ss:$16 sps:$4 sm:$0xff]  }
 0x773   :  { %3157 = vmatpush1.bf16.msra.mxu1 %v5810_v54  ;;  %v5840_v54 = vld [vmem:[#allocation7 + $0x188] ss:$16 sps:$4 sm:$0xff]  }
 0x774   :  { %3158 = vmatprep.subr.bf16.mxu1 %v5818_v61  ;;  %v5845_v61 = vld [vmem:[#allocation7 + $0x1a4] ss:$16 sps:$4 sm:$0xff]  }
 0x777   :  { %3159 = vmatpush1.bf16.msra.mxu1 %v5816_v0  ;;  %v5848_v0 = vld [vmem:[#allocation7 + $0x1ac] ss:$16 sps:$4 sm:$0xff]  }
 0x778   :  { %3160 = vmatprep.subr.bf16.mxu1 %v5824_v1  ;;  %v5843_v1 = vld [vmem:[#allocation7 + $0x1a0] ss:$16 sps:$4 sm:$0xff]  }
 0x77b   :  { %3161 = vmatpush1.bf16.msra.mxu1 %v5822_v3  ;;  %v5846_v3 = vld [vmem:[#allocation7 + $0x1a8] ss:$16 sps:$4 sm:$0xff]  }
 0x77c   :  { %3162 = vmatprep.subr.bf16.mxu1 %v5830_v6  ;;  %v5851_v6 = vld [vmem:[#allocation7 + $0x1c4] ss:$16 sps:$4 sm:$0xff]  }
 0x77f   :  { %3163 = vmatpush1.bf16.msra.mxu1 %v5828_v7  ;;  %v5854_v7 = vld [vmem:[#allocation7 + $0x1cc] ss:$16 sps:$4 sm:$0xff]  }
 0x780   :  { %3164 = vmatprep.subr.bf16.mxu1 %v5836_v9  ;;  %v5849_v9 = vld [vmem:[#allocation7 + $0x1c0] ss:$16 sps:$4 sm:$0xff]  }
 0x783   :  { %3165 = vmatpush1.bf16.msra.mxu1 %v5834_v11  ;;  %v5852_v11 = vld [vmem:[#allocation7 + $0x1c8] ss:$16 sps:$4 sm:$0xff]  }
 0x784   :  { %3166 = vmatprep.subr.bf16.mxu1 %v5842_v55 }
 0x787   :  { %3167 = vmatpush1.bf16.msra.mxu1 %v5840_v54 }
 0x788   :  { %3168 = vmatprep.subr.bf16.mxu1 %v5848_v0 }
 0x78b   :  { %3169 = vmatpush1.bf16.msra.mxu1 %v5846_v3 }
 0x78c   :  { %3170 = vmatprep.subr.bf16.mxu1 %v5854_v7 }
 0x78f   :  { %3171 = vmatpush1.bf16.msra.mxu1 %v5852_v11 }
 0x829   :  { %v2507_v57 = vpop.f32.mrb[20].mxu1 }
 0x82a   :  { %v2508_v42 = vadd.f32 %v6514_v33, %v2507_v57  ;;  %v5308_v25 = vpop.f32.mrb[21].mxu1  ;;  %v5857_v57 = vld [vmem:[#allocation7 + $0x1e4] ss:$16 sps:$4 sm:$0xff]  }
 0x82b   :  { %v2510_v53 = vpop.f32.mrb[22].mxu1  ;;  %v5855_v25 = vld [vmem:[#allocation7 + $0x1e0] ss:$16 sps:$4 sm:$0xff]  }
 0x82c   :  { %v4941_v56 = vmul.f32 -1.442695, %v2508_v42  ;;  %v2511_v17 = vadd.f32 %v6514_v33, %v2510_v53  ;;  %v5309_v5 = vpop.f32.mrb[23].mxu1  ;;  %v5779_v33 = vld [vmem:[#allocation7 + $0x44] ss:$16 sps:$4 sm:$0xff]  }
 0x82d   :  { %v5860_v42 = vld [vmem:[#allocation7 + $0x1ec] ss:$16 sps:$4 sm:$0xff]   ;;  %v5858_v53 = vld [vmem:[#allocation7 + $0x1e8] ss:$16 sps:$4 sm:$0xff]  }
 0x82e   :  { %6093 = vpow2.f32 %v4941_v56  ;;  %v4942_v59 = vmul.f32 -1.442695, %v2511_v17  ;;  %3172 = vmatprep.subr.bf16.mxu1 %v5860_v42 }
 0x82f   :  { %3173 = vmatpush1.bf16.msra.mxu1 %v5858_v53  ;;  %v5861_v53 = vld [vmem:[#allocation9] ss:$8 sps:$4 sm:$0xff]  }
 0x830   :  { %6095 = vpow2.f32 %v4942_v59  ;;  %5310 = vmatprep.subr.bf16.mxu1 %v6314_v40 }
 0x838   :  { %v6094_v22 = vpop.eup %6093 }
 0x839   :  { %v2520_v26 = vadd.f32 1.0, %v6094_v22 }
 0x83a   :  { %v6096_v13 = vpop.eup %6095 }
 0x83b   :  { %v2521_v14 = vadd.f32 1.0, %v6096_v13  ;;  %6097 = vrcp.f32 %v2520_v26 }
 0x83d   :  { %6099 = vrcp.f32 %v2521_v14 }
 0x845   :  { %v6098_v4 = vpop.eup %6097 }
 0x847   :  { %v6100_v15 = vpop.eup %6099 }
 0x848   :  { %v2532_v60 = vpack.c.bf16 %v6100_v15, %v6098_v4 }
 0x84a   :  { %2695 = vmatmul.mubr.bf16.vlgmr.msra.gmra.mrb[12].mxu0 %v2532_v60 }
 0x84b   :  { %3100 = vmatpush1.bf16.msra.mxu0 %v5765_v16 }
 0x84c   :  { %3101 = vmatprep.subr.bf16.mxu0 %v5773_v18 }
 0x84f   :  { %3102 = vmatpush1.bf16.msra.mxu0 %v5771_v19 }
 0x850   :  { %3103 = vmatprep.subr.bf16.mxu0 %v5779_v33 }
 0x853   :  { %3104 = vmatpush1.bf16.msra.mxu0 %v5777_v20 }
 0x854   :  { %3105 = vmatprep.subr.bf16.mxu0 %v5785_v21 }
 0x857   :  { %3106 = vmatpush1.bf16.msra.mxu0 %v5783_v45 }
 0x858   :  { %3107 = vmatprep.subr.bf16.mxu0 %v5791_v23 }
 0x85b   :  { %3108 = vmatpush1.bf16.msra.mxu0 %v5789_v46 }
 0x85c   :  { %3109 = vmatprep.subr.bf16.mxu0 %v5797_v62 }
 0x85f   :  { %3110 = vmatpush1.bf16.msra.mxu0 %v5795_v24 }
 0x860   :  { %3111 = vmatprep.subr.bf16.mxu0 %v5803_v27 }
 0x863   :  { %3112 = vmatpush1.bf16.msra.mxu0 %v5801_v47 }
 0x864   :  { %3113 = vmatprep.subr.bf16.mxu0 %v5809_v63 }
 0x867   :  { %3114 = vmatpush1.bf16.msra.mxu0 %v5807_v28 }
 0x868   :  { %3115 = vmatprep.subr.bf16.mxu0 %v5815_v29 }
 0x86b   :  { %3116 = vmatpush1.bf16.msra.mxu0 %v5813_v30 }
 0x86c   :  { %3117 = vmatprep.subr.bf16.mxu0 %v5821_v49 }
 0x86f   :  { %3118 = vmatpush1.bf16.msra.mxu0 %v5819_v31 }
 0x870   :  { %3119 = vmatprep.subr.bf16.mxu0 %v5827_v2 }
 0x873   :  { %3120 = vmatpush1.bf16.msra.mxu0 %v5825_v32 }
 0x874   :  { %3121 = vmatprep.subr.bf16.mxu0 %v5833_v34 }
 0x877   :  { %3122 = vmatpush1.bf16.msra.mxu0 %v5831_v35 }
 0x878   :  { %3123 = vmatprep.subr.bf16.mxu0 %v5839_v52 }
 0x87b   :  { %3124 = vmatpush1.bf16.msra.mxu0 %v5837_v58 }
 0x87c   :  { %3125 = vmatprep.subr.bf16.mxu0 %v5845_v61 }
 0x87f   :  { %3126 = vmatpush1.bf16.msra.mxu0 %v5843_v1 }
 0x880   :  { %3127 = vmatprep.subr.bf16.mxu0 %v5851_v6 }
 0x883   :  { %3128 = vmatpush1.bf16.msra.mxu0 %v5849_v9 }
 0x884   :  { %3129 = vmatprep.subr.bf16.mxu0 %v5857_v57 }
 0x887   :  { %3130 = vmatpush1.bf16.msra.mxu0 %v5855_v25 }
 0x91d   :  { %v5233_v56 = vpop.f32.mrb[12].mxu0 }
 0x91e   :  { %v5234_v17 = vpop.f32.mrb[13].mxu0 }
 0x91f   :  { %v5235_v5 = vadd.f32 %v5234_v17, %v5233_v56  ;;  %v5236_v59 = vpop.f32.mrb[14].mxu0  ;;  %v5863_v56 = vld [vmem:[#allocation9 + $0x4] ss:$8 sps:$4 sm:$0xff]   ;;  %v5864_v17 = vld [vmem:[#allocation9 + $0x10] ss:$8 sps:$4 sm:$0xff]  }
 0x920   :  { %v5237_v22 = vpop.f32.mrb[15].mxu0  ;;  %3643 = vmatprep.subr.bf16.mxu0 %v5863_v56 }
 0x921   :  { %v2697_v26 = vadd.f32 %v5235_v5, %v6521_v44  ;;  %v5238_v13 = vadd.f32 %v5237_v22, %v5236_v59  ;;  %v5866_v5 = vld [vmem:[#allocation9 + $0x14] ss:$8 sps:$4 sm:$0xff]   ;;  %v5869_v59 = vld [vmem:[#allocation9 + $0x24] ss:$8 sps:$4 sm:$0xff]   ;;  %v5867_v22 = vld [vmem:[#allocation9 + $0x20] ss:$8 sps:$4 sm:$0xff]  }
 0x923   :  { %v2703_v14 = vmax.f32 %v2697_v26, 0.0  ;;  %v2700_v4 = vadd.f32 %v5238_v13, %v6521_v44  ;;  %v5872_v26 = vld [vmem:[#allocation9 + $0x34] ss:$8 sps:$4 sm:$0xff]   ;;  %v5870_v13 = vld [vmem:[#allocation9 + $0x30] ss:$8 sps:$4 sm:$0xff]  }
 0x925   :  { %v2707_v15 = vmul.f32 0.0078125, %v2703_v14  ;;  %v2704_v16 = vmax.f32 %v2700_v4, 0.0  ;;  %v5873_v4 = vld [vmem:[#allocation9 + $0x40] ss:$8 sps:$4 sm:$0xff]  }
 0x927   :  { %v2708_v60 = vmul.f32 0.0078125, %v2704_v16  ;;  %v6679_v18 = vpack.c.bf16 %v2704_v16, %v2703_v14  ;;  %v2709_v19 = vmul.f32 %v2707_v15, %v6655_v8  ;;  %v2710_v20 = vmul.f32 %v2707_v15, %v6658_v10  ;;  %v5875_v14 = vld [vmem:[#allocation9 + $0x44] ss:$8 sps:$4 sm:$0xff]   ;;  %v5878_v15 = vld [vmem:[#allocation9 + $0x54] ss:$8 sps:$4 sm:$0xff]  }
 0x928   :  { %v5876_v16 = vld [vmem:[#allocation9 + $0x50] ss:$8 sps:$4 sm:$0xff]  }
 0x929   :  { %v2711_v33 = vmul.f32 %v2708_v60, %v6661_v39  ;;  %v2712_v21 = vmul.f32 %v2708_v60, %v6668_v12  ;;  %v5881_v60 = vld [vmem:[#allocation9 + $0x64] ss:$8 sps:$4 sm:$0xff]  }
 0x92b   :  { %v2714_v45 = vpack.c.bf16 %v2712_v21, %v2710_v20  ;;  %v2713_v23 = vpack.c.bf16 %v2711_v33, %v2709_v19  ;;  %v5879_v19 = vld [vmem:[#allocation9 + $0x60] ss:$8 sps:$4 sm:$0xff]   ;;  %v5884_v33 = vld [vmem:[#allocation9 + $0x74] ss:$8 sps:$4 sm:$0xff]   ;;  %v5882_v20 = vld [vmem:[#allocation9 + $0x70] ss:$8 sps:$4 sm:$0xff]  }
 0x92c   :  { %v5887_v21 = vld [vmem:[#allocation9 + $0x84] ss:$8 sps:$4 sm:$0xff]  }
 0x92d   :  { %3131 = vmatprep.mubr.bf16.mxu0 %v2714_v45  ;;  %3174 = vmatprep.mubr.bf16.mxu1 %v2714_v45  ;;  %v5885_v45 = vld [vmem:[#allocation9 + $0x80] ss:$8 sps:$4 sm:$0xff]  }
 0x92e   :  { %3132 = vmatmul.mubr.bf16.vlgmr.msra.gmra.mrb[16].mxu0 %v2713_v23  ;;  %3175 = vmatmul.mubr.bf16.vlgmr.msra.gmra.mrb[24].mxu1 %v2713_v23  ;;  %v5890_v23 = vld [vmem:[#allocation9 + $0x94] ss:$8 sps:$4 sm:$0xff]  }
 0x92f   :  { %5326 = vmatprep.mubr.msk.bf16.mxu1 %vm6315_vm0, %v6314_v40  ;;  %3644 = vmatpush1.bf16.msra.mxu0 %v5861_v53 }
 0x930   :  { %3645 = vmatprep.subr.bf16.mxu0 %v5866_v5 }
 0x933   :  { %3646 = vmatpush1.bf16.msra.mxu0 %v5864_v17 }
 0x934   :  { %3647 = vmatprep.subr.bf16.mxu0 %v5869_v59 }
 0x937   :  { %3648 = vmatpush1.bf16.msra.mxu0 %v5867_v22 }
 0x938   :  { %3649 = vmatprep.subr.bf16.mxu0 %v5872_v26 }
 0x93b   :  { %3650 = vmatpush1.bf16.msra.mxu0 %v5870_v13 }
 0x93c   :  { %3651 = vmatprep.subr.bf16.mxu0 %v5875_v14 }
 0x93f   :  { %3652 = vmatpush1.bf16.msra.mxu0 %v5873_v4 }
 0x940   :  { %3653 = vmatprep.subr.bf16.mxu0 %v5878_v15 }
 0x943   :  { %3654 = vmatpush1.bf16.msra.mxu0 %v5876_v16  ;;  %v5914_v16 = vld [vmem:[#allocation9 + $0x114] ss:$8 sps:$4 sm:$0xff]  }
 0x944   :  { %3655 = vmatprep.subr.bf16.mxu0 %v5881_v60  ;;  %v5920_v60 = vld [vmem:[#allocation9 + $0x134] ss:$8 sps:$4 sm:$0xff]  }
 0x947   :  { %3656 = vmatpush1.bf16.msra.mxu0 %v5879_v19  ;;  %v5918_v19 = vld [vmem:[#allocation9 + $0x130] ss:$8 sps:$4 sm:$0xff]  }
 0x948   :  { %3657 = vmatprep.subr.bf16.mxu0 %v5884_v33  ;;  %v5923_v33 = vld [vmem:[#allocation9 + $0x144] ss:$8 sps:$4 sm:$0xff]  }
 0x94b   :  { %3658 = vmatpush1.bf16.msra.mxu0 %v5882_v20  ;;  %v5921_v20 = vld [vmem:[#allocation9 + $0x140] ss:$8 sps:$4 sm:$0xff]  }
 0x94c   :  { %3659 = vmatprep.subr.bf16.mxu0 %v5887_v21  ;;  %v5926_v21 = vld [vmem:[#allocation9 + $0x154] ss:$8 sps:$4 sm:$0xff]  }
 0x94f   :  { %3660 = vmatpush1.bf16.msra.mxu0 %v5885_v45  ;;  %v5924_v45 = vld [vmem:[#allocation9 + $0x150] ss:$8 sps:$4 sm:$0xff]  }
 0x950   :  { %3661 = vmatprep.subr.bf16.mxu0 %v5890_v23  ;;  %v5929_v23 = vld [vmem:[#allocation9 + $0x164] ss:$8 sps:$4 sm:$0xff]  }
 0xa01   :  { %v3133_v44 = vpop.f32.mrb[16].mxu0  ;;  %v3176_v46 = vpop.f32.mrb[24].mxu1 }
 0xa02   :  { %v6688_v62 = vadd.f32 %v3133_v44, %v6616_v48  ;;  %v6691_v8 = vadd.f32 %v3176_v46, %v6636_v50  ;;  %v3135_v10 = vpop.f32.mrb[17].mxu0  ;;  %v3178_v39 = vpop.f32.mrb[25].mxu1  ;;  %v5888_v44 = vld [vmem:[#allocation9 + $0x90] ss:$8 sps:$4 sm:$0xff]   ;;  %v5893_v46 = vld [vmem:[#allocation9 + $0xa4] ss:$8 sps:$4 sm:$0xff]  }
 0xa03   :  { %v6694_v12 = vadd.f32 %v3135_v10, %v6609_v41  ;;  %v6697_v24 = vadd.f32 %v3178_v39, %v6623_v37  ;;  %v3137_v27 = vpop.f32.mrb[18].mxu0  ;;  %v3180_v47 = vpop.f32.mrb[26].mxu1  ;;  %3662 = vmatpush1.bf16.msra.mxu0 %v5888_v44  ;;  %v5891_v10 = vld [vmem:[#allocation9 + $0xa0] ss:$8 sps:$4 sm:$0xff]   ;;  %v5896_v39 = vld [vmem:[#allocation9 + $0xb4] ss:$8 sps:$4 sm:$0xff]  }
 0xa04   :  { %v3193_v63 = vmul.f32 %v6688_v62, %v6688_v62  ;;  %v3197_v48 = vmul.f32 %v6691_v8, %v6691_v8  ;;  %v6704_v28 = vadd.f32 %v3137_v27, %v6620_v36  ;;  %v6707_v50 = vadd.f32 %v3180_v47, %v6640_v51  ;;  %v3139_v29 = vpop.f32.mrb[19].mxu0  ;;  %v3182_v41 = vpop.f32.mrb[27].mxu1  ;;  %3663 = vmatprep.subr.bf16.mxu0 %v5893_v46  ;;  %v5894_v27 = vld [vmem:[#allocation9 + $0xb0] ss:$8 sps:$4 sm:$0xff]   ;;  %v5899_v47 = vld [vmem:[#allocation9 + $0xc4] ss:$8 sps:$4 sm:$0xff]  }
 0xa05   :  { %v3194_v37 = vmul.f32 %v6694_v12, %v6694_v12  ;;  %v3198_v30 = vmul.f32 %v6697_v24, %v6697_v24  ;;  %v6714_v49 = vadd.f32 %v3139_v29, %v6612_v43  ;;  %v6717_v31 = vadd.f32 %v3182_v41, %v6626_v38  ;;  %v5900_v29 = vld [vmem:[#allocation9 + $0xd0] ss:$8 sps:$4 sm:$0xff]   ;;  %v5905_v41 = vld [vmem:[#allocation9 + $0xe4] ss:$8 sps:$4 sm:$0xff]   ;;  %v5927_v44 = vld [vmem:[#allocation9 + $0x160] ss:$8 sps:$4 sm:$0xff]  }
 0xa06   :  { %v3201_v2 = vadd.f32 %v3197_v48, %v3193_v63  ;;  %v3195_v36 = vmul.f32 %v6704_v28, %v6704_v28  ;;  %v3199_v51 = vmul.f32 %v6707_v50, %v6707_v50  ;;  %v5897_v63 = vld [vmem:[#allocation9 + $0xc0] ss:$8 sps:$4 sm:$0xff]   ;;  %v5902_v48 = vld [vmem:[#allocation9 + $0xd4] ss:$8 sps:$4 sm:$0xff]  }
 0xa07   :  { %v3202_v32 = vadd.f32 %v3198_v30, %v3194_v37  ;;  %v3196_v34 = vmul.f32 %v6714_v49, %v6714_v49  ;;  %v3200_v35 = vmul.f32 %v6717_v31, %v6717_v31  ;;  %3664 = vmatpush1.bf16.msra.mxu0 %v5891_v10  ;;  %v5903_v37 = vld [vmem:[#allocation9 + $0xe0] ss:$8 sps:$4 sm:$0xff]   ;;  %v5906_v30 = vld [vmem:[#allocation9 + $0xf0] ss:$8 sps:$4 sm:$0xff]   ;;  %v5932_v46 = vld [vmem:[#allocation9 + $0x174] ss:$8 sps:$4 sm:$0xff]  }
 0xa08   :  { %vm3205_vm5 = vcmp.gt.f32.partialorder %v3201_v2, 0.0  ;;  %v3203_v43 = vadd.f32 %v3199_v51, %v3195_v36  ;;  %3665 = vmatprep.subr.bf16.mxu0 %v5896_v39  ;;  %v5911_v36 = vld [vmem:[#allocation9 + $0x104] ss:$8 sps:$4 sm:$0xff]   ;;  %v5930_v10 = vld [vmem:[#allocation9 + $0x170] ss:$8 sps:$4 sm:$0xff]  }
 0xa09   :  { %v3209_v52 = vsel %vm3205_vm5, %v3201_v2, 1.0  ;;  %vm3206_vm6 = vcmp.gt.f32.partialorder %v3202_v32, 0.0  ;;  %v3204_v38 = vadd.f32 %v3200_v35, %v3196_v34  ;;  %v5935_v39 = vld [vmem:[#allocation9 + $0x184] ss:$8 sps:$4 sm:$0xff]  }
 0xa0a   :  { %6101 = vrsqrt.f32 %v3209_v52  ;;  %v3210_v55 = vsel %vm3206_vm6, %v3202_v32, 1.0  ;;  %vm3207_vm7 = vcmp.gt.f32.partialorder %v3203_v43, 0.0 }
 0xa0b   :  { %6103 = vrsqrt.f32 %v3210_v55  ;;  %v3211_v58 = vsel %vm3207_vm7, %v3203_v43, 1.0  ;;  %vm3208_vm8 = vcmp.gt.f32.partialorder %v3204_v38, 0.0  ;;  %3666 = vmatpush1.bf16.msra.mxu0 %v5894_v27  ;;  %v5957_v55 = vld [vmem:[#allocation10] sm:$0xff]  }
 0xa0c   :  { %6105 = vrsqrt.f32 %v3211_v58  ;;  %v3212_v54 = vsel %vm3208_vm8, %v3204_v38, 1.0  ;;  %3667 = vmatprep.subr.bf16.mxu0 %v5899_v47  ;;  %5311 = vmatpush3.bf16.msra.mxu1 %v5957_v55  ;;  %v5958_v58 = vld [vmem:[#allocation10 + $0x8] sm:$0xff]   ;;  %v5938_v47 = vld [vmem:[#allocation9 + $0x194] ss:$8 sps:$4 sm:$0xff]  }
 0xa0d   :  { %6107 = vrsqrt.f32 %v3212_v54  ;;  %5312 = vmatprep.subr.bf16.mxu1 %v6314_v40  ;;  %v5959_v54 = vld [vmem:[#allocation10 + $0x10] sm:$0xff]   ;;  %v5933_v27 = vld [vmem:[#allocation9 + $0x180] ss:$8 sps:$4 sm:$0xff]  }
 0xa0f   :  { %3668 = vmatpush1.bf16.msra.mxu0 %v5897_v63  ;;  %v5936_v63 = vld [vmem:[#allocation9 + $0x190] ss:$8 sps:$4 sm:$0xff]  }
 0xa10   :  { %3669 = vmatprep.subr.bf16.mxu0 %v5902_v48  ;;  %5313 = vmatpush3.bf16.msra.mxu1 %v5958_v58  ;;  %v5941_v48 = vld [vmem:[#allocation9 + $0x1a4] ss:$8 sps:$4 sm:$0xff]  }
 0xa11   :  { %5314 = vmatprep.subr.bf16.mxu1 %v6314_v40  ;;  %v5962_v58 = vld [vmem:[#allocation10 + $0x28] sm:$0xff]  }
 0xa13   :  { %3670 = vmatpush1.bf16.msra.mxu0 %v5900_v29  ;;  %v5939_v29 = vld [vmem:[#allocation9 + $0x1a0] ss:$8 sps:$4 sm:$0xff]  }
 0xa14   :  { %v6727_v61 = vpop.eup %6101  ;;  %3671 = vmatprep.subr.bf16.mxu0 %v5905_v41  ;;  %5315 = vmatpush3.bf16.msra.mxu1 %v5959_v54  ;;  %v5944_v41 = vld [vmem:[#allocation9 + $0x1b4] ss:$8 sps:$4 sm:$0xff]  }
 0xa15   :  { %v6729_v0 = vpop.eup %6103  ;;  %v6734_v3 = vmul.f32 %v6727_v61, %v3201_v2  ;;  %v5908_v2 = vld [vmem:[#allocation9 + $0xf4] ss:$8 sps:$4 sm:$0xff]   ;;  %5316 = vmatprep.subr.bf16.mxu1 %v6314_v40 }
 0xa16   :  { %v6731_v1 = vpop.eup %6105  ;;  %v6737_v6 = vmul.f32 %v6729_v0, %v3202_v32  ;;  %v5963_v54 = vld [vmem:[#allocation10 + $0x30] sm:$0xff]  }
 0xa17   :  { %v6739_v7 = vpop.eup %6107  ;;  %v6742_v9 = vmul.f32 %v6731_v1, %v3203_v43  ;;  %3672 = vmatpush1.bf16.msra.mxu0 %v5903_v37  ;;  %v5942_v37 = vld [vmem:[#allocation9 + $0x1b0] ss:$8 sps:$4 sm:$0xff]  }
 0xa18   :  { %v6745_v11 = vmul.f32 %v6739_v7, %v3204_v38  ;;  %v3221_v57 = vmax.f32 %v6734_v3, %v6737_v6  ;;  %3673 = vmatprep.subr.bf16.mxu0 %v5908_v2  ;;  %v5945_v2 = vld [vmem:[#allocation9 + $0x1c0] ss:$8 sps:$4 sm:$0xff]  }
 0xa1a   :  { %v3222_v42 = vmax.f32 %v6742_v9, %v6745_v11 }
 0xa1b   :  { %3674 = vmatpush1.bf16.msra.mxu0 %v5906_v30  ;;  %v5947_v30 = vld [vmem:[#allocation9 + $0x1c4] ss:$8 sps:$4 sm:$0xff]  }
 0xa1c   :  { %v3223_v25 = vmax.f32 %v3221_v57, %v3222_v42  ;;  %3686 = vmatprep.subr.bf16.mxu0 %v5911_v36  ;;  %v5960_v57 = vld [vmem:[#allocation10 + $0x18] sm:$0xff]   ;;  %v5961_v42 = vld [vmem:[#allocation10 + $0x20] sm:$0xff]  }
 0xa1d   :  { %5317 = vmatpush3.bf16.msra.mxu1 %v5960_v57  ;;  %v5950_v36 = vld [vmem:[#allocation9 + $0x1d4] ss:$8 sps:$4 sm:$0xff]  }
 0xa1e   :  { %3224 = vmax.xlane.f32.xlu0 %v3223_v25  ;;  %5318 = vmatprep.subr.bf16.mxu1 %v6314_v40  ;;  %v5964_v57 = vld [vmem:[#allocation10 + $0x38] sm:$0xff]  }
 0xa21   :  { %5319 = vmatpush3.bf16.msra.mxu1 %v5961_v42  ;;  %v6157_v42 = vld [vmem:[#allocation4] sm:$0xff] }
 0xa22   :  { %5320 = vmatprep.subr.bf16.mxu1 %v6314_v40 }
 0xa25   :  { %5321 = vmatpush3.bf16.msra.mxu1 %v5962_v58  ;;  %v6032_v58 = vld [vmem:[#allocation7 + $0x108] ss:$16 sps:$4 sm:$0xff]  }
 0xa26   :  { %5322 = vmatprep.subr.bf16.mxu1 %v6314_v40 }
 0xa29   :  { %5323 = vmatpush3.bf16.msra.mxu1 %v5963_v54  ;;  %v6040_v54 = vld [vmem:[#allocation7 + $0x12c] ss:$16 sps:$4 sm:$0xff]  }
 0xa2a   :  { %5324 = vmatprep.subr.bf16.mxu1 %v6314_v40 }
 0xa2d   :  { %5325 = vmatpush3.bf16.msra.mxu1 %v5964_v57  ;;  %v6038_v57 = vld [vmem:[#allocation7 + $0x128] ss:$16 sps:$4 sm:$0xff]  }
 0xaab   :  { %v3225_v51 = vpop.xlane.xlu0 %3224 }
 0xaac   :  { %v3226_v32 = vrot.slane %v3225_v51, 4 }
 0xaae   :  { %v3227_v34 = vmax.f32 %v3225_v51, %v3226_v32  ;;  %v5948_v51 = vld [vmem:[#allocation9 + $0x1d0] ss:$8 sps:$4 sm:$0xff]   ;;  %v5953_v32 = vld [vmem:[#allocation9 + $0x1e4] ss:$8 sps:$4 sm:$0xff]  }
 0xab0   :  { %v3228_v35 = vrot.slane %v3227_v34, 2 }
 0xab2   :  { %v3229_v43 = vmax.f32 %v3227_v34, %v3228_v35  ;;  %v5951_v34 = vld [vmem:[#allocation9 + $0x1e0] ss:$8 sps:$4 sm:$0xff]   ;;  %v5956_v35 = vld [vmem:[#allocation9 + $0x1f4] ss:$8 sps:$4 sm:$0xff]  }
 0xab4   :  { %v3230_v52 = vrot.slane %v3229_v43, 1 }
 0xab6   :  { %v3231_v38 = vmax.f32 %v3229_v43, %v3230_v52  ;;  %v5954_v43 = vld [vmem:[#allocation9 + $0x1f0] ss:$8 sps:$4 sm:$0xff]  }
 0xab8   :  { %5344 = vpush %v3231_v38 }
 0xae9   :  { %s5345_s13 = spop %5344 }
 0xaea   :  { %s3233_s15 = smul.f32 %s5345_s13, %s6904_s7 }
 0xaec   :  { %v3234_v25 = vstv %s3233_s15 }
 0xaed   :  { %v3235_v53 = vsub.f32 %v6734_v3, %v3234_v25  ;;  %v3236_v56 = vsub.f32 %v6737_v6, %v3234_v25  ;;  %v3237_v17 = vsub.f32 %v6742_v9, %v3234_v25  ;;  %v3238_v5 = vsub.f32 %v6745_v11, %v3234_v25 }
 0xaef   :  { %v3239_v59 = vmax.f32 %v3235_v53, 0.0  ;;  %v3240_v22 = vmax.f32 %v3236_v56, 0.0  ;;  %v3241_v26 = vmax.f32 %v3237_v17, 0.0  ;;  %v3242_v13 = vmax.f32 %v3238_v5, 0.0  ;;  %v6158_v53 = vld [vmem:[#allocation4 + $0x8] sm:$0xff]  ;;  %v6159_v5 = vld [vmem:[#allocation4 + $0x10] sm:$0xff] }
 0xaf1   :  { %v6764_v14 = vmul.f32 %v6727_v61, %v3239_v59  ;;  %v3244_v4 = vmul.f32 %v6729_v0, %v3240_v22  ;;  %v6768_v15 = vmul.f32 %v6731_v1, %v3241_v26  ;;  %v3246_v3 = vmul.f32 %v6739_v7, %v3242_v13  ;;  %v5909_v7 = vld [vmem:[#allocation9 + $0x100] ss:$8 sps:$4 sm:$0xff]   ;;  %v6160_v13 = vld [vmem:[#allocation4 + $0x18] sm:$0xff] }
 0xaf3   :  { %v6772_v6 = vmul.f32 %v3244_v4, %v6694_v12  ;;  %v6775_v9 = vmul.f32 %v3246_v3, %v6714_v49  ;;  %v6779_v11 = vmul.f32 %v6764_v14, %v6688_v62  ;;  %v6783_v61 = vmul.f32 %v6768_v15, %v6704_v28  ;;  %v5917_v28 = vld [vmem:[#allocation9 + $0x124] ss:$8 sps:$4 sm:$0xff]  }
 0xaf4   :  { %v6786_v0 = vmul.f32 %v3244_v4, %v6697_v24  ;;  %v6789_v1 = vmul.f32 %v3246_v3, %v6717_v31  ;;  %v5912_v24 = vld [vmem:[#allocation9 + $0x110] ss:$8 sps:$4 sm:$0xff]   ;;  %v5915_v31 = vld [vmem:[#allocation9 + $0x120] ss:$8 sps:$4 sm:$0xff]   ;;  %v6799_v52 = vmul.f32 %v6764_v14, %v6691_v8  ;;  %v6803_v38 = vmul.f32 %v6768_v15, %v6707_v50 }
 0xaf5   :  { %v3256_v12 = vpack.c.bf16 %v6775_v9, %v6772_v6  ;;  %v3255_v49 = vpack.c.bf16 %v6783_v61, %v6779_v11 }
 0xaf6   :  { %v3258_v62 = vpack.c.bf16 %v6789_v1, %v6786_v0  ;;  %v3257_v55 = vpack.c.bf16 %v6803_v38, %v6799_v52 }
 0xaf7   :  { %3675 = vmatprep.mubr.bf16.mxu0 %v3256_v12 }
 0xaf8   :  { %3676 = vmatmul.mubr.bf16.vlgmr.msra.gmra.mrb[20].mxu0 %v3255_v49  ;;  %v5965_v49 = vld [vmem:[#allocation12 + $0x40] sm:$0xff]  }
 0xaf9   :  { %3687 = vmatpush1.bf16.msra.mxu0 %v5909_v7  ;;  %3718 = vmatprep.mubr.bf16.mxu0 %v3258_v62  ;;  %v5967_v62 = vld [vmem:[#allocation12 + $0x48] sm:$0xff]  }
 0xafa   :  { %3688 = vmatprep.subr.bf16.mxu0 %v5914_v16  ;;  %v5966_v16 = vld [vmem:[#allocation12] sm:$0xff]   ;;  %5248 = vmatprep.subr.bf16.mxu1 %v5965_v49 }
 0xafd   :  { %3689 = vmatpush1.bf16.msra.mxu0 %v5912_v24  ;;  %v5968_v24 = vld [vmem:[#allocation12 + $0x8] sm:$0xff]  }
 0xafe   :  { %3690 = vmatprep.subr.bf16.mxu0 %v5917_v28  ;;  %v5969_v28 = vld [vmem:[#allocation12 + $0x50] sm:$0xff]  }
 0xb01   :  { %3691 = vmatpush1.bf16.msra.mxu0 %v5915_v31  ;;  %v5970_v31 = vld [vmem:[#allocation12 + $0x10] sm:$0xff]  }
 0xb02   :  { %3692 = vmatprep.subr.bf16.mxu0 %v5920_v60  ;;  %v5971_v60 = vld [vmem:[#allocation12 + $0x58] sm:$0xff]  }
 0xb05   :  { %3693 = vmatpush1.bf16.msra.mxu0 %v5918_v19  ;;  %v5972_v19 = vld [vmem:[#allocation12 + $0x18] sm:$0xff]  }
 0xb06   :  { %3694 = vmatprep.subr.bf16.mxu0 %v5923_v33  ;;  %v5973_v33 = vld [vmem:[#allocation12 + $0x60] sm:$0xff]  }
 0xb09   :  { %3695 = vmatpush1.bf16.msra.mxu0 %v5921_v20  ;;  %v5974_v20 = vld [vmem:[#allocation12 + $0x20] sm:$0xff]  }
 0xb0a   :  { %3696 = vmatprep.subr.bf16.mxu0 %v5926_v21  ;;  %v5976_v21 = vld [vmem:[#allocation12 + $0x28] sm:$0xff]  }
 0xb0d   :  { %3697 = vmatpush1.bf16.msra.mxu0 %v5924_v45  ;;  %v5977_v45 = vld [vmem:[#allocation12 + $0x70] sm:$0xff]  }
 0xb0e   :  { %3698 = vmatprep.subr.bf16.mxu0 %v5929_v23  ;;  %v5978_v23 = vld [vmem:[#allocation12 + $0x30] sm:$0xff]  }
 0xb11   :  { %3699 = vmatpush1.bf16.msra.mxu0 %v5927_v44  ;;  %v5979_v44 = vld [vmem:[#allocation12 + $0x78] sm:$0xff]  }
 0xb12   :  { %3700 = vmatprep.subr.bf16.mxu0 %v5932_v46  ;;  %v5980_v46 = vld [vmem:[#allocation12 + $0x38] sm:$0xff]  }
 0xb15   :  { %3701 = vmatpush1.bf16.msra.mxu0 %v5930_v10  ;;  %v5983_v10 = vld [vmem:[#allocation7 + $0x4] ss:$16 sps:$4 sm:$0xff]  }
 0xb16   :  { %3702 = vmatprep.subr.bf16.mxu0 %v5935_v39  ;;  %v5984_v39 = vld [vmem:[#allocation7 + $0x8] ss:$16 sps:$4 sm:$0xff]  }
 0xb19   :  { %3703 = vmatpush1.bf16.msra.mxu0 %v5933_v27  ;;  %v5986_v27 = vld [vmem:[#allocation7 + $0xc] ss:$16 sps:$4 sm:$0xff]  }
 0xb1a   :  { %3704 = vmatprep.subr.bf16.mxu0 %v5938_v47  ;;  %v5992_v47 = vld [vmem:[#allocation7 + $0x2c] ss:$16 sps:$4 sm:$0xff]  }
 0xb1d   :  { %3705 = vmatpush1.bf16.msra.mxu0 %v5936_v63  ;;  %v5990_v63 = vld [vmem:[#allocation7 + $0x28] ss:$16 sps:$4 sm:$0xff]  }
 0xb1e   :  { %3706 = vmatprep.subr.bf16.mxu0 %v5941_v48  ;;  %v5998_v48 = vld [vmem:[#allocation7 + $0x4c] ss:$16 sps:$4 sm:$0xff]  }
 0xb21   :  { %3707 = vmatpush1.bf16.msra.mxu0 %v5939_v29  ;;  %v5996_v29 = vld [vmem:[#allocation7 + $0x48] ss:$16 sps:$4 sm:$0xff]  }
 0xb22   :  { %3708 = vmatprep.subr.bf16.mxu0 %v5944_v41  ;;  %v6004_v41 = vld [vmem:[#allocation7 + $0x6c] ss:$16 sps:$4 sm:$0xff]  }
 0xb25   :  { %3709 = vmatpush1.bf16.msra.mxu0 %v5942_v37  ;;  %v6002_v37 = vld [vmem:[#allocation7 + $0x68] ss:$16 sps:$4 sm:$0xff]  }
 0xb26   :  { %3710 = vmatprep.subr.bf16.mxu0 %v5947_v30  ;;  %v6010_v30 = vld [vmem:[#allocation7 + $0x8c] ss:$16 sps:$4 sm:$0xff]  }
 0xb29   :  { %3711 = vmatpush1.bf16.msra.mxu0 %v5945_v2  ;;  %v6008_v2 = vld [vmem:[#allocation7 + $0x88] ss:$16 sps:$4 sm:$0xff]  }
 0xb2a   :  { %3712 = vmatprep.subr.bf16.mxu0 %v5950_v36  ;;  %v6016_v36 = vld [vmem:[#allocation7 + $0xac] ss:$16 sps:$4 sm:$0xff]  }
 0xb2d   :  { %3713 = vmatpush1.bf16.msra.mxu0 %v5948_v51  ;;  %v6014_v51 = vld [vmem:[#allocation7 + $0xa8] ss:$16 sps:$4 sm:$0xff]  }
 0xb2e   :  { %3714 = vmatprep.subr.bf16.mxu0 %v5953_v32  ;;  %v6022_v32 = vld [vmem:[#allocation7 + $0xcc] ss:$16 sps:$4 sm:$0xff]  }
 0xb31   :  { %3715 = vmatpush1.bf16.msra.mxu0 %v5951_v34  ;;  %v6020_v34 = vld [vmem:[#allocation7 + $0xc8] ss:$16 sps:$4 sm:$0xff]  }
 0xb32   :  { %3716 = vmatprep.subr.bf16.mxu0 %v5956_v35  ;;  %v6028_v35 = vld [vmem:[#allocation7 + $0xec] ss:$16 sps:$4 sm:$0xff]  }
 0xb35   :  { %3717 = vmatpush1.bf16.msra.mxu0 %v5954_v43  ;;  %v6026_v43 = vld [vmem:[#allocation7 + $0xe8] ss:$16 sps:$4 sm:$0xff]  }
 0xb36   :  { %4473 = vmatprep.subr.bf16.mxu0 %v5986_v27  ;;  %v6025_v27 = vld [vmem:[#allocation7 + $0xe4] ss:$16 sps:$4 sm:$0xff]  }
 0xb38   :  { %3719 = vmatmul.mubr.bf16.vlgmr.msra.gmra.mrb[20].mxu0 %v3257_v55  ;;  %v6034_v55 = vld [vmem:[#allocation7 + $0x10c] ss:$16 sps:$4 sm:$0xff]  }
 0xb39   :  { %4474 = vmatpush1.bf16.msra.mxu0 %v5984_v39  ;;  %v6017_v39 = vld [vmem:[#allocation7 + $0xc0] ss:$16 sps:$4 sm:$0xff]  }
 0xb3a   :  { %4475 = vmatprep.subr.bf16.mxu0 %v5992_v47  ;;  %v6023_v47 = vld [vmem:[#allocation7 + $0xe0] ss:$16 sps:$4 sm:$0xff]  }
 0xb3d   :  { %4476 = vmatpush1.bf16.msra.mxu0 %v5990_v63  ;;  %v6031_v63 = vld [vmem:[#allocation7 + $0x104] ss:$16 sps:$4 sm:$0xff]  }
 0xb3e   :  { %4477 = vmatprep.subr.bf16.mxu0 %v5998_v48  ;;  %v6029_v48 = vld [vmem:[#allocation7 + $0x100] ss:$16 sps:$4 sm:$0xff]  }
 0xb41   :  { %4478 = vmatpush1.bf16.msra.mxu0 %v5996_v29  ;;  %v6037_v29 = vld [vmem:[#allocation7 + $0x124] ss:$16 sps:$4 sm:$0xff]  }
 0xb42   :  { %4479 = vmatprep.subr.bf16.mxu0 %v6004_v41  ;;  %v6035_v41 = vld [vmem:[#allocation7 + $0x120] ss:$16 sps:$4 sm:$0xff]  }
 0xb45   :  { %4480 = vmatpush1.bf16.msra.mxu0 %v6002_v37  ;;  %v6043_v37 = vld [vmem:[#allocation7 + $0x144] ss:$16 sps:$4 sm:$0xff]  }
 0xb46   :  { %4481 = vmatprep.subr.bf16.mxu0 %v6010_v30  ;;  %v6041_v30 = vld [vmem:[#allocation7 + $0x140] ss:$16 sps:$4 sm:$0xff]  }
 0xb49   :  { %4482 = vmatpush1.bf16.msra.mxu0 %v6008_v2  ;;  %v6049_v2 = vld [vmem:[#allocation7 + $0x164] ss:$16 sps:$4 sm:$0xff]  }
 0xb4a   :  { %4483 = vmatprep.subr.bf16.mxu0 %v6016_v36  ;;  %v6047_v36 = vld [vmem:[#allocation7 + $0x160] ss:$16 sps:$4 sm:$0xff]  }
 0xb4d   :  { %4484 = vmatpush1.bf16.msra.mxu0 %v6014_v51  ;;  %v6055_v51 = vld [vmem:[#allocation7 + $0x184] ss:$16 sps:$4 sm:$0xff]  }
 0xb4e   :  { %4485 = vmatprep.subr.bf16.mxu0 %v6022_v32  ;;  %v6058_v32 = vld [vmem:[#allocation7 + $0x18c] ss:$16 sps:$4 sm:$0xff]  }
 0xb51   :  { %4486 = vmatpush1.bf16.msra.mxu0 %v6020_v34  ;;  %v6053_v34 = vld [vmem:[#allocation7 + $0x180] ss:$16 sps:$4 sm:$0xff]  }
 0xb52   :  { %4487 = vmatprep.subr.bf16.mxu0 %v6028_v35  ;;  %v6056_v35 = vld [vmem:[#allocation7 + $0x188] ss:$16 sps:$4 sm:$0xff]  }
 0xb55   :  { %4488 = vmatpush1.bf16.msra.mxu0 %v6026_v43  ;;  %v6061_v43 = vld [vmem:[#allocation7 + $0x1a4] ss:$16 sps:$4 sm:$0xff]  }
 0xb56   :  { %4489 = vmatprep.subr.bf16.mxu0 %v6034_v55  ;;  %v6064_v55 = vld [vmem:[#allocation7 + $0x1ac] ss:$16 sps:$4 sm:$0xff]  }
 0xb59   :  { %4490 = vmatpush1.bf16.msra.mxu0 %v6032_v58  ;;  %v6059_v58 = vld [vmem:[#allocation7 + $0x1a0] ss:$16 sps:$4 sm:$0xff]  }
 0xb5a   :  { %4491 = vmatprep.subr.bf16.mxu0 %v6040_v54  ;;  %v6062_v54 = vld [vmem:[#allocation7 + $0x1a8] ss:$16 sps:$4 sm:$0xff]  }
 0xb5d   :  { %4492 = vmatpush1.bf16.msra.mxu0 %v6038_v57  ;;  %v6067_v57 = vld [vmem:[#allocation7 + $0x1c4] ss:$16 sps:$4 sm:$0xff]  }
 0xc0b   :  { %v3720_v8 = vpop.f32.mrb[20].mxu0 }
 0xc0c   :  { %v6809_v25 = vsub.f32 %v6157_v42, %v3720_v8  ;;  %v3722_v50 = vpop.f32.mrb[21].mxu0  ;;  %v6046_v8 = vld [vmem:[#allocation7 + $0x14c] ss:$16 sps:$4 sm:$0xff]   ;;  %v6044_v42 = vld [vmem:[#allocation7 + $0x148] ss:$16 sps:$4 sm:$0xff]  }
 0xc0d   :  { %v6811_v56 = vsub.f32 %v6158_v53, %v3722_v50  ;;  %v3724_v17 = vpop.f32.mrb[22].mxu0  ;;  %4493 = vmatprep.subr.bf16.mxu0 %v6046_v8  ;;  %v6052_v50 = vld [vmem:[#allocation7 + $0x16c] ss:$16 sps:$4 sm:$0xff]   ;;  %v6050_v53 = vld [vmem:[#allocation7 + $0x168] ss:$16 sps:$4 sm:$0xff]  }
 0xc0e   :  { %v6813_v59 = vsub.f32 %v6159_v5, %v3724_v17  ;;  %v3726_v22 = vpop.f32.mrb[23].mxu0  ;;  %v3733_v26 = vmul.f32 %v6809_v25, %v6809_v25  ;;  %4494 = vmatpush1.bf16.msra.mxu0 %v6044_v42  ;;  %v6161_v5 = vld [vmem:[%s6902_s5] ss:$0 sm:$0xff]  ;;  %v6070_v8 = vld [vmem:[#allocation7 + $0x1cc] ss:$16 sps:$4 sm:$0xff]  }
 0xc0f   :  { %v3735_v40 = vmul.f32 %v6811_v56, %v6811_v56  ;;  %v6819_v14 = vsub.f32 %v6160_v13, %v3726_v22  ;;  %4495 = vmatprep.subr.bf16.mxu0 %v6052_v50  ;;  %v6065_v42 = vld [vmem:[#allocation7 + $0x1c0] ss:$16 sps:$4 sm:$0xff]   ;;  %v6068_v50 = vld [vmem:[#allocation7 + $0x1c8] ss:$16 sps:$4 sm:$0xff]  }
 0xc10   :  { %v3734_v4 = vmul.f32 %v6813_v59, %v6813_v59 }
 0xc11   :  { %v3736_v15 = vmul.f32 %v6819_v14, %v6819_v14  ;;  %v3737_v3 = vadd.f32 %v3735_v40, %v3733_v26 }
 0xc12   :  { %4496 = vmatpush1.bf16.msra.mxu0 %v6050_v53  ;;  %v6073_v53 = vld [vmem:[#allocation7 + $0x1e4] ss:$16 sps:$4 sm:$0xff]  }
 0xc13   :  { %v3738_v12 = vadd.f32 %v3736_v15, %v3734_v4  ;;  %4497 = vmatprep.subr.bf16.mxu0 %v6058_v32 }
 0xc15   :  { %v3739_v7 = vpack.c.bf16 %v3738_v12, %v3737_v3 }
 0xc16   :  { %4498 = vmatpush1.bf16.msra.mxu0 %v6056_v35 }
 0xc17   :  { %5327 = vmatmul.mubr.bf16.vlgmr.msra.gmra.mrb[28].mxu1 %v3739_v7  ;;  %4499 = vmatprep.subr.bf16.mxu0 %v6064_v55 }
 0xc18   :  { %4025 = vmatprep.mubr.bf16.mxu1 %v6679_v18  ;;  %5249 = vmatpush3.bf16.msra.mxu1 %v5966_v16  ;;  %v5975_v18 = vld [vmem:[#allocation12 + $0x68] sm:$0xff]  }
 0xc19   :  { %5250 = vmatprep.subr.bf16.mxu1 %v5967_v62 }
 0xc1a   :  { %4500 = vmatpush1.bf16.msra.mxu0 %v6062_v54 }
 0xc1b   :  { %4501 = vmatprep.subr.bf16.mxu0 %v6070_v8 }
 0xc1c   :  { %5251 = vmatpush3.bf16.msra.mxu1 %v5968_v24 }
 0xc1d   :  { %5252 = vmatprep.subr.bf16.mxu1 %v5969_v28  ;;  %v5981_v28 = vld [vmem:[#allocation7] ss:$16 sps:$4 sm:$0xff]  }
 0xc1e   :  { %4502 = vmatpush1.bf16.msra.mxu0 %v6068_v50 }
 0xc20   :  { %5253 = vmatpush3.bf16.msra.mxu1 %v5970_v31 }
 0xc21   :  { %5254 = vmatprep.subr.bf16.mxu1 %v5971_v60  ;;  %v5989_v60 = vld [vmem:[#allocation7 + $0x24] ss:$16 sps:$4 sm:$0xff]  }
 0xc24   :  { %5255 = vmatpush3.bf16.msra.mxu1 %v5972_v19  ;;  %v5987_v19 = vld [vmem:[#allocation7 + $0x20] ss:$16 sps:$4 sm:$0xff]  }
 0xc25   :  { %5256 = vmatprep.subr.bf16.mxu1 %v5973_v33  ;;  %v5995_v33 = vld [vmem:[#allocation7 + $0x44] ss:$16 sps:$4 sm:$0xff]  }
 0xc28   :  { %5257 = vmatpush3.bf16.msra.mxu1 %v5974_v20  ;;  %v5993_v20 = vld [vmem:[#allocation7 + $0x40] ss:$16 sps:$4 sm:$0xff]  }
 0xc29   :  { %5258 = vmatprep.subr.bf16.mxu1 %v5975_v18  ;;  %v6001_v18 = vld [vmem:[#allocation7 + $0x64] ss:$16 sps:$4 sm:$0xff]  }
 0xc2c   :  { %5259 = vmatpush3.bf16.msra.mxu1 %v5976_v21  ;;  %v5999_v21 = vld [vmem:[#allocation7 + $0x60] ss:$16 sps:$4 sm:$0xff]  }
 0xc2d   :  { %5260 = vmatprep.subr.bf16.mxu1 %v5977_v45  ;;  %v6007_v45 = vld [vmem:[#allocation7 + $0x84] ss:$16 sps:$4 sm:$0xff]  }
 0xc30   :  { %5261 = vmatpush3.bf16.msra.mxu1 %v5978_v23  ;;  %v6005_v23 = vld [vmem:[#allocation7 + $0x80] ss:$16 sps:$4 sm:$0xff]  }
 0xc31   :  { %5262 = vmatprep.subr.bf16.mxu1 %v5979_v44  ;;  %v6013_v44 = vld [vmem:[#allocation7 + $0xa4] ss:$16 sps:$4 sm:$0xff]  }
 0xc34   :  { %5263 = vmatpush3.bf16.msra.mxu1 %v5980_v46  ;;  %v6011_v46 = vld [vmem:[#allocation7 + $0xa0] ss:$16 sps:$4 sm:$0xff]  }
 0xc35   :  { %4430 = vmatprep.subr.bf16.mxu1 %v5983_v10  ;;  %v6019_v10 = vld [vmem:[#allocation7 + $0xc4] ss:$16 sps:$4 sm:$0xff]  }
 0xcea   :  { %v3838_v17 = vpop.f32.mrb[28].mxu1 }
 0xceb   :  { %v3839_v22 = vadd.f32 %v6161_v5, %v3838_v17  ;;  %v5328_v26 = vpop.f32.mrb[29].mxu1  ;;  %v6076_v17 = vld [vmem:[#allocation7 + $0x1ec] ss:$16 sps:$4 sm:$0xff]  }
 0xcec   :  { %v3841_v40 = vpop.f32.mrb[30].mxu1  ;;  %4503 = vmatprep.subr.bf16.mxu0 %v6076_v17 }
 0xced   :  { %v5095_v13 = vmul.f32 -1.442695, %v3839_v22  ;;  %v3842_v4 = vadd.f32 %v6161_v5, %v3841_v40  ;;  %v5329_v15 = vpop.f32.mrb[31].mxu1  ;;  %v6071_v5 = vld [vmem:[#allocation7 + $0x1e0] ss:$16 sps:$4 sm:$0xff]  }
 0xcee   :  { %v6074_v22 = vld [vmem:[#allocation7 + $0x1e8] ss:$16 sps:$4 sm:$0xff]  }
 0xcef   :  { %6109 = vpow2.f32 %v5095_v13  ;;  %v5096_v3 = vmul.f32 -1.442695, %v3842_v4  ;;  %4504 = vmatpush1.bf16.msra.mxu0 %v6074_v22 }
 0xcf1   :  { %6111 = vpow2.f32 %v5096_v3  ;;  %v6162_v3 = vld [vmem:[%s6903_s6] ss:$0 sm:$0xff] }
 0xcf9   :  { %v6110_v12 = vpop.eup %6109 }
 0xcfa   :  { %v3851_v7 = vadd.f32 1.0, %v6110_v12 }
 0xcfb   :  { %v6112_v49 = vpop.eup %6111 }
 0xcfc   :  { %v3852_v16 = vadd.f32 1.0, %v6112_v49  ;;  %6113 = vrcp.f32 %v3851_v7 }
 0xcfe   :  { %6115 = vrcp.f32 %v3852_v16 }
 0xd06   :  { %v6114_v62 = vpop.eup %6113 }
 0xd08   :  { %v6116_v24 = vpop.eup %6115 }
 0xd09   :  { %v3863_v31 = vpack.c.bf16 %v6116_v24, %v6114_v62 }
 0xd0b   :  { %4026 = vmatmul.mubr.bf16.vlgmr.msra.gmra.mrb[32].mxu1 %v3863_v31 }
 0xd0c   :  { %4431 = vmatpush1.bf16.msra.mxu1 %v5981_v28 }
 0xd0d   :  { %4432 = vmatprep.subr.bf16.mxu1 %v5989_v60 }
 0xd10   :  { %4433 = vmatpush1.bf16.msra.mxu1 %v5987_v19 }
 0xd11   :  { %4434 = vmatprep.subr.bf16.mxu1 %v5995_v33 }
 0xd14   :  { %4435 = vmatpush1.bf16.msra.mxu1 %v5993_v20 }
 0xd15   :  { %4436 = vmatprep.subr.bf16.mxu1 %v6001_v18 }
 0xd18   :  { %4437 = vmatpush1.bf16.msra.mxu1 %v5999_v21 }
 0xd19   :  { %4438 = vmatprep.subr.bf16.mxu1 %v6007_v45 }
 0xd1c   :  { %4439 = vmatpush1.bf16.msra.mxu1 %v6005_v23 }
 0xd1d   :  { %4440 = vmatprep.subr.bf16.mxu1 %v6013_v44 }
 0xd20   :  { %4441 = vmatpush1.bf16.msra.mxu1 %v6011_v46 }
 0xd21   :  { %4442 = vmatprep.subr.bf16.mxu1 %v6019_v10 }
 0xd24   :  { %4443 = vmatpush1.bf16.msra.mxu1 %v6017_v39 }
 0xd25   :  { %4444 = vmatprep.subr.bf16.mxu1 %v6025_v27 }
 0xd28   :  { %4445 = vmatpush1.bf16.msra.mxu1 %v6023_v47 }
 0xd29   :  { %4446 = vmatprep.subr.bf16.mxu1 %v6031_v63 }
 0xd2c   :  { %4447 = vmatpush1.bf16.msra.mxu1 %v6029_v48 }
 0xd2d   :  { %4448 = vmatprep.subr.bf16.mxu1 %v6037_v29 }
 0xd30   :  { %4449 = vmatpush1.bf16.msra.mxu1 %v6035_v41 }
 0xd31   :  { %4450 = vmatprep.subr.bf16.mxu1 %v6043_v37 }
 0xd34   :  { %4451 = vmatpush1.bf16.msra.mxu1 %v6041_v30 }
 0xd35   :  { %4452 = vmatprep.subr.bf16.mxu1 %v6049_v2 }
 0xd38   :  { %4453 = vmatpush1.bf16.msra.mxu1 %v6047_v36 }
 0xd39   :  { %4454 = vmatprep.subr.bf16.mxu1 %v6055_v51 }
 0xd3c   :  { %4455 = vmatpush1.bf16.msra.mxu1 %v6053_v34 }
 0xd3d   :  { %4456 = vmatprep.subr.bf16.mxu1 %v6061_v43 }
 0xd40   :  { %4457 = vmatpush1.bf16.msra.mxu1 %v6059_v58 }
 0xd41   :  { %4458 = vmatprep.subr.bf16.mxu1 %v6067_v57 }
 0xd44   :  { %4459 = vmatpush1.bf16.msra.mxu1 %v6065_v42 }
 0xd45   :  { %4460 = vmatprep.subr.bf16.mxu1 %v6073_v53 }
 0xd48   :  { %4461 = vmatpush1.bf16.msra.mxu1 %v6071_v5 }
 0xdde   :  { %v5264_v26 = vpop.f32.mrb[32].mxu1 }
 0xddf   :  { %v5265_v40 = vpop.f32.mrb[33].mxu1 }
 0xde0   :  { %v5266_v13 = vadd.f32 %v5265_v40, %v5264_v26  ;;  %v5267_v4 = vpop.f32.mrb[34].mxu1 }
 0xde1   :  { %v5268_v15 = vpop.f32.mrb[35].mxu1 }
 0xde2   :  { %v4028_v12 = vadd.f32 %v6162_v3, %v5266_v13  ;;  %v5269_v7 = vadd.f32 %v5268_v15, %v5267_v4 }
 0xde4   :  { %v4034_v49 = vmax.f32 %v4028_v12, 0.0  ;;  %v4031_v16 = vadd.f32 %v6162_v3, %v5269_v7 }
 0xde6   :  { %v4038_v62 = vmul.f32 0.0078125, %v4034_v49  ;;  %v4035_v24 = vmax.f32 %v4031_v16, 0.0 }
 0xde8   :  { %v4039_v28 = vmul.f32 0.0078125, %v4035_v24  ;;  %v4040_v31 = vmul.f32 %v4038_v62, %v6809_v25  ;;  %v4041_v60 = vmul.f32 %v4038_v62, %v6811_v56 }
 0xdea   :  { %v4042_v19 = vmul.f32 %v4039_v28, %v6813_v59  ;;  %v4043_v33 = vmul.f32 %v4039_v28, %v6819_v14 }
 0xdec   :  { %v4045_v20 = vpack.c.bf16 %v4043_v33, %v4041_v60  ;;  %v4044_v18 = vpack.c.bf16 %v4042_v19, %v4040_v31 }
 0xdee   :  { %4462 = vmatprep.mubr.bf16.mxu1 %v4045_v20  ;;  %4505 = vmatprep.mubr.bf16.mxu0 %v4045_v20 }
 0xdef   :  { %4463 = vmatmul.mubr.bf16.vlgmr.msra.gmra.mrb[36].mxu1 %v4044_v18  ;;  %4506 = vmatmul.mubr.bf16.vlgmr.msra.gmra.mrb[24].mxu0 %v4044_v18 }
 0xec2   :  { %v4464_v21 = vpop.f32.mrb[36].mxu1  ;;  %v4507_v45 = vpop.f32.mrb[24].mxu0 }
 0xec3   :  { %v6837_v23 = vadd.f32 %v4464_v21, %v6779_v11  ;;  %v6840_v44 = vadd.f32 %v4507_v45, %v6799_v52  ;;  %v4466_v25 = vpop.f32.mrb[37].mxu1  ;;  %v4509_v56 = vpop.f32.mrb[25].mxu0 }
 0xec4   :  { %v6843_v59 = vadd.f32 %v4466_v25, %v6772_v6  ;;  %v6846_v14 = vadd.f32 %v4509_v56, %v6786_v0  ;;  %v4468_v46 = vpop.f32.mrb[38].mxu1  ;;  %v4511_v10 = vpop.f32.mrb[26].mxu0 }
 0xec5   :  { %v4524_v39 = vmul.f32 %v6837_v23, %v6837_v23  ;;  %v4528_v11 = vmul.f32 %v6840_v44, %v6840_v44  ;;  %v6853_v27 = vadd.f32 %v4468_v46, %v6783_v61  ;;  %v6856_v52 = vadd.f32 %v4511_v10, %v6803_v38  ;;  %v4470_v47 = vpop.f32.mrb[39].mxu1  ;;  %v4513_v6 = vpop.f32.mrb[27].mxu0 }
 0xec6   :  { %v4525_v0 = vmul.f32 %v6843_v59, %v6843_v59  ;;  %v4529_v63 = vmul.f32 %v6846_v14, %v6846_v14  ;;  %v4521_v48 = vadd.f32 %v4470_v47, %v6775_v9  ;;  %v6864_v29 = vadd.f32 %v4513_v6, %v6789_v1 }
 0xec7   :  { %v4532_v41 = vadd.f32 %v4528_v11, %v4524_v39  ;;  %v4526_v61 = vmul.f32 %v6853_v27, %v6853_v27  ;;  %v4530_v38 = vmul.f32 %v6856_v52, %v6856_v52 }
 0xec8   :  { %v4533_v37 = vadd.f32 %v4529_v63, %v4525_v0  ;;  %v4527_v30 = vmul.f32 %v4521_v48, %v4521_v48  ;;  %v4531_v2 = vmul.f32 %v6864_v29, %v6864_v29 }
 0xec9   :  { %vm4536_vm9 = vcmp.gt.f32.partialorder %v4532_v41, 0.0  ;;  %v4534_v36 = vadd.f32 %v4530_v38, %v4526_v61 }
 0xeca   :  { %v4540_v51 = vsel %vm4536_vm9, %v4532_v41, 1.0  ;;  %vm4537_vm10 = vcmp.gt.f32.partialorder %v4533_v37, 0.0  ;;  %v4535_v9 = vadd.f32 %v4531_v2, %v4527_v30 }
 0xecb   :  { %6117 = vrsqrt.f32 %v4540_v51  ;;  %v4541_v1 = vsel %vm4537_vm10, %v4533_v37, 1.0  ;;  %vm4538_vm11 = vcmp.gt.f32.partialorder %v4534_v36, 0.0 }
 0xecc   :  { %6119 = vrsqrt.f32 %v4541_v1  ;;  %v4542_v32 = vsel %vm4538_vm11, %v4534_v36, 1.0  ;;  %vm4539_vm12 = vcmp.gt.f32.partialorder %v4535_v9, 0.0 }
 0xecd   :  { %6121 = vrsqrt.f32 %v4542_v32  ;;  %v4543_v34 = vsel %vm4539_vm12, %v4535_v9, 1.0 }
 0xece   :  { %6123 = vrsqrt.f32 %v4543_v34 }
 0xed5   :  { %v6118_v35 = vpop.eup %6117 }
 0xed6   :  { %v6120_v43 = vpop.eup %6119  ;;  %v4548_v58 = vmul.f32 %v6118_v35, %v4532_v41 }
 0xed7   :  { %v6122_v55 = vpop.eup %6121  ;;  %v4549_v54 = vmul.f32 %v6120_v43, %v4533_v37 }
 0xed8   :  { %v6124_v57 = vpop.eup %6123  ;;  %v4550_v8 = vmul.f32 %v6122_v55, %v4534_v36 }
 0xed9   :  { %v4551_v42 = vmul.f32 %v6124_v57, %v4535_v9  ;;  %v4552_v50 = vmax.f32 %v4548_v58, %v4549_v54 }
 0xedb   :  { %v4553_v53 = vmax.f32 %v4550_v8, %v4551_v42 }
 0xedd   :  { %v4554_v17 = vmax.f32 %v4552_v50, %v4553_v53 }
 0xedf   :  { %4555 = vmax.xlane.f32.xlu1 %v4554_v17 }
 0xf6c   :  { %v4556_v5 = vpop.xlane.xlu1 %4555 }
 0xf6d   :  { %v4557_v22 = vrot.slane %v4556_v5, 4 }
 0xf6f   :  { %v4558_v26 = vmax.f32 %v4556_v5, %v4557_v22 }
 0xf71   :  { %v4559_v40 = vrot.slane %v4558_v26, 2 }
 0xf73   :  { %v4560_v13 = vmax.f32 %v4558_v26, %v4559_v40 }
 0xf75   :  { %v4561_v4 = vrot.slane %v4560_v13, 1 }
 0xf77   :  { %v4562_v15 = vmax.f32 %v4560_v13, %v4561_v4 }
 0xf79   :  { %5346 = vpush %v4562_v15 }
 0xfaa   :  { %s5347_s6 = spop %5346 }
 0xfab   :  { %s4564_s23 = smul.f32 %s5347_s6, %s6904_s7  ;;  %s6317_s7 = smov [#allocation13]  }
 0xfac   :  { %s4635_s3 = sshll.u32 %s6317_s7, 4  ;;  %s4636_s3 = int_to_ptr.vmem [resolvable:$true] %s4635_s3 }
 0xfad   :  { %v4565_v3 = vstv %s4564_s23  ;;  %s6273_s30 = scalar_lea.vmem %s4636_s3, 512  ;;  %p6278_p13 = scmp.lt.s32.totalorder %s4636_s3, %s4636_s3 }
 0xfae   :  { %v4566_v12 = vsub.f32 %v4548_v58, %v4565_v3  ;;  %v4567_v7 = vsub.f32 %v4549_v54, %v4565_v3  ;;  %v4568_v49 = vsub.f32 %v4550_v8, %v4565_v3  ;;  %v4569_v16 = vsub.f32 %v4551_v42, %v4565_v3  ;;  %p6274_p12 = scmp.ne.s32.totalorder %s4636_s3, %s6273_s30  ;;  %p6279_p0 = scmp.lt.s32.totalorder %s6273_s30, %s6273_s30 }
 0xfb0   :  { %v4570_v62 = vmax.f32 %v4566_v12, 0.0  ;;  %v4571_v24 = vmax.f32 %v4567_v7, 0.0  ;;  %v4572_v28 = vmax.f32 %v4568_v49, 0.0  ;;  %v4573_v31 = vmax.f32 %v4569_v16, 0.0  ;;  %p6280_p1 = por %p6279_p0, %p6278_p13 }
 0xfb2   :  { %v4574_v60 = vmul.f32 %v6118_v35, %v4570_v62  ;;  %v4575_v19 = vmul.f32 %v6120_v43, %v4571_v24  ;;  %v4576_v33 = vmul.f32 %v6122_v55, %v4572_v28  ;;  %v4577_v20 = vmul.f32 %v6124_v57, %v4573_v31  ;;  %p6281_p2 = pnand %p6280_p1, %p6274_p12 }
 0xfb4   :  { %v4578_v18 = vmul.f32 %v4574_v60, %v6837_v23  ;;  %v4579_v21 = vmul.f32 %v4575_v19, %v6843_v59  ;;  %v4580_v45 = vmul.f32 %v4574_v60, %v6840_v44  ;;  %v4581_v25 = vmul.f32 %v4575_v19, %v6846_v14 }
 0xfb5   :  { %v4582_v56 = vmul.f32 %v4576_v33, %v6853_v27  ;;  %v4583_v46 = vmul.f32 %v4577_v20, %v4521_v48  ;;  %v4584_v10 = vmul.f32 %v4576_v33, %v6856_v52  ;;  %v4585_v39 = vmul.f32 %v4577_v20, %v6864_v29 }
 0xfb6   :  { %v4586_v11 = vmul.f32 %v4578_v18, %v4578_v18  ;;  %v4587_v47 = vmul.f32 %v4579_v21, %v4579_v21  ;;  %v4590_v6 = vmul.f32 %v4580_v45, %v4580_v45  ;;  %v4591_v0 = vmul.f32 %v4581_v25, %v4581_v25 }
 0xfb7   :  { %v4588_v63 = vmul.f32 %v4582_v56, %v4582_v56  ;;  %v4589_v41 = vmul.f32 %v4583_v46, %v4583_v46  ;;  %v4592_v23 = vmul.f32 %v4584_v10, %v4584_v10  ;;  %v4593_v61 = vmul.f32 %v4585_v39, %v4585_v39 }
 0xfb8   :  { %v4594_v59 = vadd.f32 %v4590_v6, %v4586_v11  ;;  %v4595_v38 = vadd.f32 %v4591_v0, %v4587_v47 }
 0xfb9   :  { %v4596_v44 = vadd.f32 %v4592_v23, %v4588_v63  ;;  %v4597_v37 = vadd.f32 %v4593_v61, %v4589_v41 }
 0xfba   :  { %6125 = vrsqrt.f32 %v4594_v59  ;;  %vm4600_vm13 = vcmp.eq.f32.partialorder %v4594_v59, inf  ;;  %vm4602_vm14 = vcmp.eq.f32.partialorder %v4594_v59, 0.0  ;;  %v4603_v48 = vand.u32 2147483648, %v4594_v59 }
 0xfbb   :  { %6127 = vrsqrt.f32 %v4595_v38  ;;  %vm4607_vm15 = vcmp.eq.f32.partialorder %v4595_v38, inf  ;;  %vm4609_vm0 = vcmp.eq.f32.partialorder %v4595_v38, 0.0  ;;  %v4610_v2 = vand.u32 2147483648, %v4595_v38 }
 0xfbc   :  { %6129 = vrsqrt.f32 %v4596_v44  ;;  %vm4614_vm1 = vcmp.eq.f32.partialorder %v4596_v44, inf  ;;  %vm4616_vm2 = vcmp.eq.f32.partialorder %v4596_v44, 0.0  ;;  %v4617_v34 = vand.u32 2147483648, %v4596_v44 }
 0xfbd   :  { %6131 = vrsqrt.f32 %v4597_v37  ;;  %vm4621_vm3 = vcmp.eq.f32.partialorder %v4597_v37, inf  ;;  %v4624_v58 = vand.u32 2147483648, %v4597_v37  ;;  %vm4623_vm4 = vcmp.eq.f32.partialorder %v4597_v37, 0.0 }
 0xfc4   :  { %v6126_v14 = vpop.eup %6125 }
 0xfc5   :  { %v6128_v27 = vpop.eup %6127  ;;  %v4599_v52 = vmul.f32 %v6126_v14, %v4594_v59 }
 0xfc6   :  { %v6130_v29 = vpop.eup %6129  ;;  %v4606_v30 = vmul.f32 %v6128_v27, %v4595_v38 }
 0xfc7   :  { %v6132_v36 = vpop.eup %6131  ;;  %v4601_v51 = vsel %vm4600_vm13, %v4594_v59, %v4599_v52  ;;  %v4613_v9 = vmul.f32 %v6130_v29, %v4596_v44 }
 0xfc8   :  { %v4604_v1 = vsel %vm4602_vm14, %v4603_v48, %v4601_v51  ;;  %v4608_v32 = vsel %vm4607_vm15, %v4595_v38, %v4606_v30  ;;  %v4620_v35 = vmul.f32 %v6132_v36, %v4597_v37 }
 0xfc9   :  { %v4611_v43 = vsel %vm4609_vm0, %v4610_v2, %v4608_v32  ;;  %v4615_v55 = vsel %vm4614_vm1, %v4596_v44, %v4613_v9  ;;  %4626 = vst [vmem:[#allocation13] sm:$0xff] %v4604_v1 }
 0xfca   :  { %v4618_v54 = vsel %vm4616_vm2, %v4617_v34, %v4615_v55  ;;  %v4622_v57 = vsel %vm4621_vm3, %v4597_v37, %v4620_v35  ;;  %4627 = vst [vmem:[#allocation13 + $0x8] sm:$0xff] %v4611_v43 }
 0xfcb   :  { %v4625_v8 = vsel %vm4623_vm4, %v4624_v58, %v4622_v57  ;;  %4628 = vst [vmem:[#allocation13 + $0x10] sm:$0xff] %v4618_v54 }
 0xfcc   :  { %4629 = vst [vmem:[#allocation13 + $0x18] sm:$0xff] %v4625_v8 }
 0xfcd   :  { %6284 = shalt.err (!%p6281_p2)
}
 0xfce   :  { %s6285_s26 = scalar_lea.hbm %s6905_s8, 512 }
 0xfcf   :  { %p6286_p3 = scmp.ne.s32.totalorder %s6905_s8, %s6285_s26  ;;  %p6289_p4 = scmp.lt.u32.totalorder %s6285_s26, %s6905_s8 }
 0xfd1   :  { %p6291_p5 = pnand %p6289_p4, %p6286_p3 }
 0xfd3   :  { %6294 = shalt.err (!%p6291_p5)
}
 0xfd4   :  { %4641 = dma.vmem_to_hbm [thread:$0]  %s4636_s3, 512, %s6905_s8, [#allocation6], %s6305_s17, %s6305_s17, %s6306_s18  }
 0xfd5   :  { %6301 = dma.done.wait [#allocation6], 512  }
 0xfd6   :  { %6302 = vsyncadd [#allocation6], 4294966784 }
 0xfd7   :  { %4645 = vsyncpa [#allocation5], 1 }
 0xfd8   :  { %4646 = vsyncpa [#allocation8], 1 }
 0xfd9   :  { %4647 = vsyncpa [#allocation11], 1 }
 0xfda   :  { %4648 = vsyncpa [#allocation6], 1 }

</bundles_post_ra>
